<compile_context>
chip_gen: v6e
topology: v6e:2x2x1
jax: 0.10.0
libtpu: 0.0.40
codegen_flags: <defaults>
</compile_context>

<pallas_src>
import jax
import jax.numpy as jnp
import numpy as np
from jax import lax
from jax.experimental import pallas as pl
from jax.experimental.pallas import tpu as pltpu

LEAKY = 0.2
BN_EPS = 1e-5

# dot_general dimension numbers for A @ B^T (both contraction dims minor).
NT_DIMS = (((1,), (1,)), ((), ()))


def decoder_kernel(z_ref, fc_w_ref, fc_b_ref, w_lstm_ref, b_lstm_ref,
                   ow1t_ref, ob1_ref, ow2t_ref, ob2_ref,
                   out_ref,
                   hseq_ref):
    H = w_lstm_ref.shape[0] // 4
    B = z_ref.shape[0]
    T = hseq_ref.shape[0] // B

    def leaky_relu(x):
        return jnp.where(x > 0, x, LEAKY * x)

    # ---- fc_init: Linear (BN1 pre-folded into fc_w/fc_b) -> LeakyReLU(0.2)
    #      -> Dropout (identity in eval mode).  Stays f32.
    h = leaky_relu(jnp.dot(z_ref[...], fc_w_ref[...],
                           preferred_element_type=jnp.float32) + fc_b_ref[...])

    # ---- Loop-invariant values, hoisted out of the time loop.
    # Packed weight slab is bf16 (MXU-native); slices are vreg-aligned (H=32).
    whh0 = w_lstm_ref[H:2 * H, :]
    wih1 = w_lstm_ref[2 * H:3 * H, :]
    whh1 = w_lstm_ref[3 * H:4 * H, :]
    # The LSTM input is the same `h` every step -> layer-0 input-gate
    # contribution (incl. bias) computed once; bf16 operands, f32 accumulate.
    xg0 = (jnp.dot(h.astype(jnp.bfloat16), w_lstm_ref[0:H, :],
                   preferred_element_type=jnp.float32)
           + b_lstm_ref[0:1, :])
    # Hoisted broadcast (JAX does not CSE broadcast_in_dim inside the loop).
    b1 = jnp.broadcast_to(b_lstm_ref[1:2, :], (B, 4 * H))

    def lstm_cell(tg, c_prev):
        # tg = tanh(gate pre-activations).  The i/f/o gate columns were
        # pre-scaled by 0.5 in the wrapper, so sigmoid(x) = 0.5*tanh(x/2)+0.5
        # costs a single EUP tanh over the whole (B,4H) vreg.
        i = 0.5 * tg[:, 0:H] + 0.5
        f = 0.5 * tg[:, H:2 * H] + 0.5
        g = tg[:, 2 * H:3 * H]
        o = 0.5 * tg[:, 3 * H:4 * H] + 0.5
        c_new = f * c_prev + i * g
        h_new = o * jnp.tanh(c_new)
        return h_new, c_new

    zeros = jnp.zeros((B, H), jnp.float32)
    h0, c0, h1, c1 = zeros, zeros, zeros, zeros

    # ---- Statically unrolled time loop: state lives in vregs; the only VMEM
    # traffic per step is the off-critical-path stash of h1_t.
    for t in range(T):
        # layer 0
        g0 = xg0 + jnp.dot(h0.astype(jnp.bfloat16), whh0,
                           preferred_element_type=jnp.float32)
        h0, c0 = lstm_cell(jnp.tanh(g0), c0)
        # layer 1 (inter-layer dropout = identity in eval mode); the bias add
        # is folded onto the off-critical-path dot(h1_{t-1}, whh1) branch.
        g1 = (jnp.dot(h0.astype(jnp.bfloat16), wih1,
                      preferred_element_type=jnp.float32)
              + (jnp.dot(h1.astype(jnp.bfloat16), whh1,
                         preferred_element_type=jnp.float32) + b1))
        h1, c1 = lstm_cell(jnp.tanh(g1), c1)
        # static offset, sublane-aligned stash (B = 8)
        hseq_ref[pl.ds(t * B, B), :] = h1

    # ---- Feature-major (lane-dense) output head over all T*B rows:
    # Linear (BN2 pre-folded) -> LeakyReLU -> Linear -> Tanh.
    hs = hseq_ref[...]                                           # (T*B, H)
    y = lax.dot_general(ow1t_ref[...], hs, NT_DIMS,              # (H/2, T*B)
                        preferred_element_type=jnp.float32) + ob1_ref[...]
    y = leaky_relu(y)
    y = jnp.dot(ow2t_ref[...], y,                                # (OUT, T*B)
                preferred_element_type=jnp.float32) + ob2_ref[...]
    out_ref[...] = jnp.tanh(y)


def improved_decoder_forward(z, params, *, seq_len):
    B = z.shape[0]
    H = params["whh0"].shape[0]
    out_dim = params["ow2"].shape[1]

    # Fold eval-mode BatchNorm running stats into per-feature scale/shift ...
    def bn_fold(gamma, beta, mean, var):
        scale = gamma * jax.lax.rsqrt(var + BN_EPS)
        shift = beta - mean * scale
        return scale, shift

    bn1_s, bn1_t = bn_fold(params["bn1_g"], params["bn1_b"],
                           params["bn1_m"], params["bn1_v"])
    bn2_s, bn2_t = bn_fold(params["bn2_g"], params["bn2_b"],
                           params["bn2_m"], params["bn2_v"])

    # ... and fold those affines straight into the adjacent Linear layers.
    fc_w = params["fc_w"] * bn1_s                         # (LATENT, H)
    fc_b = params["fc_b"] * bn1_s + bn1_t                 # (1, H)
    ow1 = params["ow1"] * bn2_s                           # (H, H//2)
    ob1 = params["ob1"] * bn2_s + bn2_t                   # (1, H//2)

    # Transposed (feature-major) head weights.
    ow1_t = ow1.T                                         # (H//2, H)
    ob1_t = ob1.T                                         # (H//2, 1)
    ow2_t = params["ow2"].T                               # (OUT, H//2)
    ob2_t = params["ob2"].T                               # (OUT, 1)

    # Pack the LSTM weights/biases into single slabs and fold the 0.5 scale of
    # the sigmoid-as-tanh trick into the i/f/o gate columns (exact: *0.5 is a
    # power of two).  Weight slab goes to bf16 (MXU operand); biases stay f32.
    gate_scale = jnp.concatenate(
        [jnp.full((1, H), 0.5, jnp.float32),     # i
         jnp.full((1, H), 0.5, jnp.float32),     # f
         jnp.ones((1, H), jnp.float32),          # g (tanh gate, unscaled)
         jnp.full((1, H), 0.5, jnp.float32)],    # o
        axis=1)                                            # (1, 4H)
    w_lstm = (jnp.concatenate([params["wih0"], params["whh0"],
                               params["wih1"], params["whh1"]], axis=0)
              * gate_scale).astype(jnp.bfloat16)           # (4H, 4H) bf16
    b_lstm = (jnp.concatenate([params["b0"], params["b1"]], axis=0)
              * gate_scale)                                # (2, 4H) f32

    vmem = pl.BlockSpec(memory_space=pltpu.MemorySpace.VMEM)

    out_flat = pl.pallas_call(
        decoder_kernel,
        out_shape=jax.ShapeDtypeStruct((out_dim, seq_len * B), jnp.float32),
        in_specs=[vmem] * 9,
        out_specs=vmem,
        scratch_shapes=[
            pltpu.VMEM((seq_len * B, H), jnp.float32),     # h1 sequence stash
        ],
    )(z, fc_w, fc_b, w_lstm, b_lstm, ow1_t, ob1_t, ow2_t, ob2_t)

    # Columns are ordered (t, b): reshape + transpose to PyTorch (B, T, OUT).
    return jnp.transpose(out_flat.reshape(out_dim, seq_len, B), (2, 1, 0))


def init_params(key, latent_dim, hidden_dim, output_dim):
    """Deterministic synthetic parameters (PyTorch-style uniform fan-in init)."""
    ks = jax.random.split(key, 12)

    def u(k, shape, fan_in):
        bound = 1.0 / np.sqrt(fan_in)
        return jax.random.uniform(k, shape, jnp.float32, -bound, bound)

    H = hidden_dim
    p = {}
    p["fc_w"] = u(ks[0], (latent_dim, H), latent_dim)
    p["fc_b"] = u(ks[1], (1, H), latent_dim)
    p["bn1_g"] = jnp.ones((1, H), jnp.float32)
    p["bn1_b"] = jnp.zeros((1, H), jnp.float32)
    p["bn1_m"] = jnp.zeros((1, H), jnp.float32)     # BN running mean
    p["bn1_v"] = jnp.ones((1, H), jnp.float32)      # BN running var
    # LSTM layer 0 / 1 (b = b_ih + b_hh combined), gate order [i, f, g, o]
    p["wih0"] = u(ks[2], (H, 4 * H), H)
    p["whh0"] = u(ks[3], (H, 4 * H), H)
    p["b0"] = u(ks[4], (1, 4 * H), H)
    p["wih1"] = u(ks[5], (H, 4 * H), H)
    p["whh1"] = u(ks[6], (H, 4 * H), H)
    p["b1"] = u(ks[7], (1, 4 * H), H)
    # output head
    p["ow1"] = u(ks[8], (H, H // 2), H)
    p["ob1"] = u(ks[9], (1, H // 2), H)
    p["bn2_g"] = jnp.ones((1, H // 2), jnp.float32)
    p["bn2_b"] = jnp.zeros((1, H // 2), jnp.float32)
    p["bn2_m"] = jnp.zeros((1, H // 2), jnp.float32)
    p["bn2_v"] = jnp.ones((1, H // 2), jnp.float32)
    p["ow2"] = u(ks[10], (H // 2, output_dim), H // 2)
    p["ob2"] = u(ks[11], (1, output_dim), H // 2)
    return p


def reference_forward(z, p, seq_len, *, mxu_bf16=False):
    """Pure-JAX reference with the module's eval-mode semantics.

    mxu_bf16=False : true f32 semantics (Precision.HIGHEST matmuls).
    mxu_bf16=True  : mirrors the kernel's precision policy (bf16 operands on
                     the recurrent-chain matmuls, f32 accumulate/elementwise).
    """
    H = p["whh0"].shape[0]
    B = z.shape[0]

    def mm(a, b):
        return jnp.dot(a, b, precision=lax.Precision.HIGHEST)

    def cast(x):
        return x.astype(jnp.bfloat16).astype(jnp.float32) if mxu_bf16 else x

    def leaky(x):
        return jnp.where(x > 0, x, LEAKY * x)

    def bn(x, g, b, m, v):
        return (x - m) * jax.lax.rsqrt(v + BN_EPS) * g + b

    def cell(gates, c):
        i = jax.nn.sigmoid(gates[:, :H])
        f = jax.nn.sigmoid(gates[:, H:2 * H])
        g = jnp.tanh(gates[:, 2 * H:3 * H])
        o = jax.nn.sigmoid(gates[:, 3 * H:])
        c = f * c + i * g
        return o * jnp.tanh(c), c

    h = leaky(bn(mm(z, p["fc_w"]) + p["fc_b"],
                 p["bn1_g"], p["bn1_b"], p["bn1_m"], p["bn1_v"]))
    wih0, whh0 = cast(p["wih0"]), cast(p["whh0"])
    wih1, whh1 = cast(p["wih1"]), cast(p["whh1"])
    xg0 = mm(cast(h), wih0) + p["b0"]
    h0 = c0 = h1 = c1 = jnp.zeros((B, H), jnp.float32)
    outs = []
    for _ in range(seq_len):
        g0 = xg0 + mm(cast(h0), whh0)
        h0, c0 = cell(g0, c0)
        g1 = mm(cast(h0), wih1) + mm(cast(h1), whh1) + p["b1"]
        h1, c1 = cell(g1, c1)
        y = mm(h1, p["ow1"]) + p["ob1"]
        y = leaky(bn(y, p["bn2_g"], p["bn2_b"], p["bn2_m"], p["bn2_v"]))
        y = jnp.tanh(mm(y, p["ow2"]) + p["ob2"])
        outs.append(y)
    return jnp.stack(outs, axis=1)


if __name__ == "__main__":
    # Small shapes consistent with the module: latent_dim=8, hidden_dim=32,
    # output_dim=1, seq_len=16, num_layers=2.  batch=8 fills the f32 sublanes.
    B, LATENT, H, T, OUT = 8, 8, 32, 16, 1

    key = jax.random.PRNGKey(0)
    k_z, k_p = jax.random.split(key)
    z = jax.random.normal(k_z, (B, LATENT), jnp.float32)
    params = init_params(k_p, LATENT, H, OUT)

    out = improved_decoder_forward(z, params, seq_len=T)
    out = jax.block_until_ready(out)
    assert out.shape == (B, T, OUT), out.shape

    # (a) Tight check vs a reference mirroring the kernel's bf16-MXU-operand
    #     precision policy -> validates the implementation itself.
    ref_mirror = reference_forward(z, params, T, mxu_bf16=True)
    np.testing.assert_allclose(np.asarray(out), np.asarray(ref_mirror),
                               rtol=5e-3, atol=5e-3)

    # (b) Looser check vs true f32 module semantics -> bf16 recurrent-chain
    #     rounding stays well-bounded over the 16-step recurrence.
    ref_f32 = reference_forward(z, params, T, mxu_bf16=False)
    np.testing.assert_allclose(np.asarray(out), np.asarray(ref_f32),
                               rtol=3e-2, atol=3e-2)

    print("KERNEL_OK")
</pallas_src>

<mosaic_0001>
module attributes {stable_mosaic.version = 11 : i64} {
  func.func @decoder_kernel(%arg0: memref<8x8xf32, #tpu.memory_space<vmem>>, %arg1: memref<8x32xf32, #tpu.memory_space<vmem>>, %arg2: memref<1x32xf32, #tpu.memory_space<vmem>>, %arg3: memref<128x128xbf16, #tpu.memory_space<vmem>>, %arg4: memref<2x128xf32, #tpu.memory_space<vmem>>, %arg5: memref<16x32xf32, #tpu.memory_space<vmem>>, %arg6: memref<16x1xf32, #tpu.memory_space<vmem>>, %arg7: memref<1x16xf32, #tpu.memory_space<vmem>>, %arg8: memref<1x1xf32, #tpu.memory_space<vmem>>, %arg9: memref<1x128xf32, #tpu.memory_space<vmem>>, %arg10: memref<128x32xf32, #tpu.memory_space<vmem>>) attributes {dimension_semantics = [], scalar_prefetch = 0 : i64, scratch_operands = 1 : i64, tpu.core_type = #tpu.core_type<tc>} {
    %c0 = arith.constant 0 : index
    %c0_0 = arith.constant 0 : index
    %0 = vector.load %arg0[%c0, %c0_0] : memref<8x8xf32, #tpu.memory_space<vmem>>, vector<8x8xf32>
    %c0_1 = arith.constant 0 : index
    %c0_2 = arith.constant 0 : index
    %1 = vector.load %arg1[%c0_1, %c0_2] : memref<8x32xf32, #tpu.memory_space<vmem>>, vector<8x32xf32>
    %cst = arith.constant dense<0.000000e+00> : vector<8x32xf32>
    %2 = tpu.matmul %0, %1, %cst {dimension_numbers = #tpu.dot_dimension_numbers<[1], [0], [0], [1], [0, 0, 1, 1], [], []>} : vector<8x8xf32>, vector<8x32xf32>, vector<8x32xf32> -> vector<8x32xf32>
    %c0_3 = arith.constant 0 : index
    %c0_4 = arith.constant 0 : index
    %3 = vector.load %arg2[%c0_3, %c0_4] : memref<1x32xf32, #tpu.memory_space<vmem>>, vector<1x32xf32>
    %4 = vector.broadcast %3 : vector<1x32xf32> to vector<8x32xf32>
    %5 = arith.addf %2, %4 : vector<8x32xf32>
    %cst_5 = arith.constant 0.000000e+00 : f32
    %6 = vector.broadcast %cst_5 : f32 to vector<8x32xf32>
    %7 = arith.cmpf ogt, %5, %6 : vector<8x32xf32>
    %cst_6 = arith.constant 2.000000e-01 : f32
    %8 = vector.broadcast %cst_6 : f32 to vector<8x32xf32>
    %9 = arith.mulf %8, %5 : vector<8x32xf32>
    %10 = arith.select %7, %5, %9 : vector<8x32xi1>, vector<8x32xf32>
    %c32 = arith.constant 32 : index
    %c0_7 = arith.constant 0 : index
    %11 = vector.load %arg3[%c32, %c0_7] : memref<128x128xbf16, #tpu.memory_space<vmem>>, vector<32x128xbf16>
    %c64 = arith.constant 64 : index
    %c0_8 = arith.constant 0 : index
    %12 = vector.load %arg3[%c64, %c0_8] : memref<128x128xbf16, #tpu.memory_space<vmem>>, vector<32x128xbf16>
    %c96 = arith.constant 96 : index
    %c0_9 = arith.constant 0 : index
    %13 = vector.load %arg3[%c96, %c0_9] : memref<128x128xbf16, #tpu.memory_space<vmem>>, vector<32x128xbf16>
    %14 = arith.truncf %10 : vector<8x32xf32> to vector<8x32xbf16>
    %c0_10 = arith.constant 0 : index
    %c0_11 = arith.constant 0 : index
    %15 = vector.load %arg3[%c0_10, %c0_11] : memref<128x128xbf16, #tpu.memory_space<vmem>>, vector<32x128xbf16>
    %cst_12 = arith.constant dense<0.000000e+00> : vector<8x128xf32>
    %16 = tpu.matmul %14, %15, %cst_12 {dimension_numbers = #tpu.dot_dimension_numbers<[1], [0], [0], [1], [0, 0, 1, 1], [], []>} : vector<8x32xbf16>, vector<32x128xbf16>, vector<8x128xf32> -> vector<8x128xf32>
    %c0_13 = arith.constant 0 : index
    %c0_14 = arith.constant 0 : index
    %17 = vector.load %arg4[%c0_13, %c0_14] : memref<2x128xf32, #tpu.memory_space<vmem>>, vector<1x128xf32>
    %18 = vector.broadcast %17 : vector<1x128xf32> to vector<8x128xf32>
    %19 = arith.addf %16, %18 : vector<8x128xf32>
    %c1 = arith.constant 1 : index
    %c0_15 = arith.constant 0 : index
    %20 = vector.load %arg4[%c1, %c0_15] : memref<2x128xf32, #tpu.memory_space<vmem>>, vector<1x128xf32>
    %21 = vector.shape_cast %20 : vector<1x128xf32> to vector<1x128xf32>
    %22 = vector.broadcast %21 : vector<1x128xf32> to vector<8x128xf32>
    %cst_16 = arith.constant 0.000000e+00 : f32
    %23 = vector.broadcast %cst_16 : f32 to vector<8x32xf32>
    %24 = arith.truncf %23 : vector<8x32xf32> to vector<8x32xbf16>
    %cst_17 = arith.constant dense<0.000000e+00> : vector<8x128xf32>
    %25 = tpu.matmul %24, %11, %cst_17 {dimension_numbers = #tpu.dot_dimension_numbers<[1], [0], [0], [1], [0, 0, 1, 1], [], []>} : vector<8x32xbf16>, vector<32x128xbf16>, vector<8x128xf32> -> vector<8x128xf32>
    %26 = arith.addf %19, %25 : vector<8x128xf32>
    %27 = math.tanh %26 : vector<8x128xf32>
    %28 = vector.extract_strided_slice %27 {offsets = [0, 0], sizes = [8, 32], strides = [1, 1]} : vector<8x128xf32> to vector<8x32xf32>
    %cst_18 = arith.constant 5.000000e-01 : f32
    %29 = vector.broadcast %cst_18 : f32 to vector<8x32xf32>
    %30 = arith.mulf %29, %28 : vector<8x32xf32>
    %cst_19 = arith.constant 5.000000e-01 : f32
    %31 = vector.broadcast %cst_19 : f32 to vector<8x32xf32>
    %32 = arith.addf %30, %31 : vector<8x32xf32>
    %33 = vector.extract_strided_slice %27 {offsets = [0, 32], sizes = [8, 32], strides = [1, 1]} : vector<8x128xf32> to vector<8x32xf32>
    %cst_20 = arith.constant 5.000000e-01 : f32
    %34 = vector.broadcast %cst_20 : f32 to vector<8x32xf32>
    %35 = arith.mulf %34, %33 : vector<8x32xf32>
    %cst_21 = arith.constant 5.000000e-01 : f32
    %36 = vector.broadcast %cst_21 : f32 to vector<8x32xf32>
    %37 = arith.addf %35, %36 : vector<8x32xf32>
    %38 = vector.extract_strided_slice %27 {offsets = [0, 64], sizes = [8, 32], strides = [1, 1]} : vector<8x128xf32> to vector<8x32xf32>
    %39 = vector.extract_strided_slice %27 {offsets = [0, 96], sizes = [8, 32], strides = [1, 1]} : vector<8x128xf32> to vector<8x32xf32>
    %cst_22 = arith.constant 5.000000e-01 : f32
    %40 = vector.broadcast %cst_22 : f32 to vector<8x32xf32>
    %41 = arith.mulf %40, %39 : vector<8x32xf32>
    %cst_23 = arith.constant 5.000000e-01 : f32
    %42 = vector.broadcast %cst_23 : f32 to vector<8x32xf32>
    %43 = arith.addf %41, %42 : vector<8x32xf32>
    %44 = arith.mulf %37, %23 : vector<8x32xf32>
    %45 = arith.mulf %32, %38 : vector<8x32xf32>
    %46 = arith.addf %44, %45 : vector<8x32xf32>
    %47 = math.tanh %46 : vector<8x32xf32>
    %48 = arith.mulf %43, %47 : vector<8x32xf32>
    %49 = arith.truncf %48 : vector<8x32xf32> to vector<8x32xbf16>
    %cst_24 = arith.constant dense<0.000000e+00> : vector<8x128xf32>
    %50 = tpu.matmul %49, %12, %cst_24 {dimension_numbers = #tpu.dot_dimension_numbers<[1], [0], [0], [1], [0, 0, 1, 1], [], []>} : vector<8x32xbf16>, vector<32x128xbf16>, vector<8x128xf32> -> vector<8x128xf32>
    %51 = arith.truncf %23 : vector<8x32xf32> to vector<8x32xbf16>
    %cst_25 = arith.constant dense<0.000000e+00> : vector<8x128xf32>
    %52 = tpu.matmul %51, %13, %cst_25 {dimension_numbers = #tpu.dot_dimension_numbers<[1], [0], [0], [1], [0, 0, 1, 1], [], []>} : vector<8x32xbf16>, vector<32x128xbf16>, vector<8x128xf32> -> vector<8x128xf32>
    %53 = arith.addf %52, %22 : vector<8x128xf32>
    %54 = arith.addf %50, %53 : vector<8x128xf32>
    %55 = math.tanh %54 : vector<8x128xf32>
    %56 = vector.extract_strided_slice %55 {offsets = [0, 0], sizes = [8, 32], strides = [1, 1]} : vector<8x128xf32> to vector<8x32xf32>
    %cst_26 = arith.constant 5.000000e-01 : f32
    %57 = vector.broadcast %cst_26 : f32 to vector<8x32xf32>
    %58 = arith.mulf %57, %56 : vector<8x32xf32>
    %cst_27 = arith.constant 5.000000e-01 : f32
    %59 = vector.broadcast %cst_27 : f32 to vector<8x32xf32>
    %60 = arith.addf %58, %59 : vector<8x32xf32>
    %61 = vector.extract_strided_slice %55 {offsets = [0, 32], sizes = [8, 32], strides = [1, 1]} : vector<8x128xf32> to vector<8x32xf32>
    %cst_28 = arith.constant 5.000000e-01 : f32
    %62 = vector.broadcast %cst_28 : f32 to vector<8x32xf32>
    %63 = arith.mulf %62, %61 : vector<8x32xf32>
    %cst_29 = arith.constant 5.000000e-01 : f32
    %64 = vector.broadcast %cst_29 : f32 to vector<8x32xf32>
    %65 = arith.addf %63, %64 : vector<8x32xf32>
    %66 = vector.extract_strided_slice %55 {offsets = [0, 64], sizes = [8, 32], strides = [1, 1]} : vector<8x128xf32> to vector<8x32xf32>
    %67 = vector.extract_strided_slice %55 {offsets = [0, 96], sizes = [8, 32], strides = [1, 1]} : vector<8x128xf32> to vector<8x32xf32>
    %cst_30 = arith.constant 5.000000e-01 : f32
    %68 = vector.broadcast %cst_30 : f32 to vector<8x32xf32>
    %69 = arith.mulf %68, %67 : vector<8x32xf32>
    %cst_31 = arith.constant 5.000000e-01 : f32
    %70 = vector.broadcast %cst_31 : f32 to vector<8x32xf32>
    %71 = arith.addf %69, %70 : vector<8x32xf32>
    %72 = arith.mulf %65, %23 : vector<8x32xf32>
    %73 = arith.mulf %60, %66 : vector<8x32xf32>
    %74 = arith.addf %72, %73 : vector<8x32xf32>
    %75 = math.tanh %74 : vector<8x32xf32>
    %76 = arith.mulf %71, %75 : vector<8x32xf32>
    %c0_32 = arith.constant 0 : index
    %c0_33 = arith.constant 0 : index
    %77 = vector.load %arg10[%c0_32, %c0_33] : memref<128x32xf32, #tpu.memory_space<vmem>>, vector<8x32xf32>
    tpu.vector_store %arg10[%c0_32, %c0_33], %76 {strides = array<i32>} : memref<128x32xf32, #tpu.memory_space<vmem>>, vector<8x32xf32>,
    %78 = arith.truncf %48 : vector<8x32xf32> to vector<8x32xbf16>
    %cst_34 = arith.constant dense<0.000000e+00> : vector<8x128xf32>
    %79 = tpu.matmul %78, %11, %cst_34 {dimension_numbers = #tpu.dot_dimension_numbers<[1], [0], [0], [1], [0, 0, 1, 1], [], []>} : vector<8x32xbf16>, vector<32x128xbf16>, vector<8x128xf32> -> vector<8x128xf32>
    %80 = arith.addf %19, %79 : vector<8x128xf32>
    %81 = math.tanh %80 : vector<8x128xf32>
    %82 = vector.extract_strided_slice %81 {offsets = [0, 0], sizes = [8, 32], strides = [1, 1]} : vector<8x128xf32> to vector<8x32xf32>
    %cst_35 = arith.constant 5.000000e-01 : f32
    %83 = vector.broadcast %cst_35 : f32 to vector<8x32xf32>
    %84 = arith.mulf %83, %82 : vector<8x32xf32>
    %cst_36 = arith.constant 5.000000e-01 : f32
    %85 = vector.broadcast %cst_36 : f32 to vector<8x32xf32>
    %86 = arith.addf %84, %85 : vector<8x32xf32>
    %87 = vector.extract_strided_slice %81 {offsets = [0, 32], sizes = [8, 32], strides = [1, 1]} : vector<8x128xf32> to vector<8x32xf32>
    %cst_37 = arith.constant 5.000000e-01 : f32
    %88 = vector.broadcast %cst_37 : f32 to vector<8x32xf32>
    %89 = arith.mulf %88, %87 : vector<8x32xf32>
    %cst_38 = arith.constant 5.000000e-01 : f32
    %90 = vector.broadcast %cst_38 : f32 to vector<8x32xf32>
    %91 = arith.addf %89, %90 : vector<8x32xf32>
    %92 = vector.extract_strided_slice %81 {offsets = [0, 64], sizes = [8, 32], strides = [1, 1]} : vector<8x128xf32> to vector<8x32xf32>
    %93 = vector.extract_strided_slice %81 {offsets = [0, 96], sizes = [8, 32], strides = [1, 1]} : vector<8x128xf32> to vector<8x32xf32>
    %cst_39 = arith.constant 5.000000e-01 : f32
    %94 = vector.broadcast %cst_39 : f32 to vector<8x32xf32>
    %95 = arith.mulf %94, %93 : vector<8x32xf32>
    %cst_40 = arith.constant 5.000000e-01 : f32
    %96 = vector.broadcast %cst_40 : f32 to vector<8x32xf32>
    %97 = arith.addf %95, %96 : vector<8x32xf32>
    %98 = arith.mulf %91, %46 : vector<8x32xf32>
    %99 = arith.mulf %86, %92 : vector<8x32xf32>
    %100 = arith.addf %98, %99 : vector<8x32xf32>
    %101 = math.tanh %100 : vector<8x32xf32>
    %102 = arith.mulf %97, %101 : vector<8x32xf32>
    %103 = arith.truncf %102 : vector<8x32xf32> to vector<8x32xbf16>
    %cst_41 = arith.constant dense<0.000000e+00> : vector<8x128xf32>
    %104 = tpu.matmul %103, %12, %cst_41 {dimension_numbers = #tpu.dot_dimension_numbers<[1], [0], [0], [1], [0, 0, 1, 1], [], []>} : vector<8x32xbf16>, vector<32x128xbf16>, vector<8x128xf32> -> vector<8x128xf32>
    %105 = arith.truncf %76 : vector<8x32xf32> to vector<8x32xbf16>
    %cst_42 = arith.constant dense<0.000000e+00> : vector<8x128xf32>
    %106 = tpu.matmul %105, %13, %cst_42 {dimension_numbers = #tpu.dot_dimension_numbers<[1], [0], [0], [1], [0, 0, 1, 1], [], []>} : vector<8x32xbf16>, vector<32x128xbf16>, vector<8x128xf32> -> vector<8x128xf32>
    %107 = arith.addf %106, %22 : vector<8x128xf32>
    %108 = arith.addf %104, %107 : vector<8x128xf32>
    %109 = math.tanh %108 : vector<8x128xf32>
    %110 = vector.extract_strided_slice %109 {offsets = [0, 0], sizes = [8, 32], strides = [1, 1]} : vector<8x128xf32> to vector<8x32xf32>
    %cst_43 = arith.constant 5.000000e-01 : f32
    %111 = vector.broadcast %cst_43 : f32 to vector<8x32xf32>
    %112 = arith.mulf %111, %110 : vector<8x32xf32>
    %cst_44 = arith.constant 5.000000e-01 : f32
    %113 = vector.broadcast %cst_44 : f32 to vector<8x32xf32>
    %114 = arith.addf %112, %113 : vector<8x32xf32>
    %115 = vector.extract_strided_slice %109 {offsets = [0, 32], sizes = [8, 32], strides = [1, 1]} : vector<8x128xf32> to vector<8x32xf32>
    %cst_45 = arith.constant 5.000000e-01 : f32
    %116 = vector.broadcast %cst_45 : f32 to vector<8x32xf32>
    %117 = arith.mulf %116, %115 : vector<8x32xf32>
    %cst_46 = arith.constant 5.000000e-01 : f32
    %118 = vector.broadcast %cst_46 : f32 to vector<8x32xf32>
    %119 = arith.addf %117, %118 : vector<8x32xf32>
    %120 = vector.extract_strided_slice %109 {offsets = [0, 64], sizes = [8, 32], strides = [1, 1]} : vector<8x128xf32> to vector<8x32xf32>
    %121 = vector.extract_strided_slice %109 {offsets = [0, 96], sizes = [8, 32], strides = [1, 1]} : vector<8x128xf32> to vector<8x32xf32>
    %cst_47 = arith.constant 5.000000e-01 : f32
    %122 = vector.broadcast %cst_47 : f32 to vector<8x32xf32>
    %123 = arith.mulf %122, %121 : vector<8x32xf32>
    %cst_48 = arith.constant 5.000000e-01 : f32
    %124 = vector.broadcast %cst_48 : f32 to vector<8x32xf32>
    %125 = arith.addf %123, %124 : vector<8x32xf32>
    %126 = arith.mulf %119, %74 : vector<8x32xf32>
    %127 = arith.mulf %114, %120 : vector<8x32xf32>
    %128 = arith.addf %126, %127 : vector<8x32xf32>
    %129 = math.tanh %128 : vector<8x32xf32>
    %130 = arith.mulf %125, %129 : vector<8x32xf32>
    %c8 = arith.constant 8 : index
    %c0_49 = arith.constant 0 : index
    %131 = vector.load %arg10[%c8, %c0_49] : memref<128x32xf32, #tpu.memory_space<vmem>>, vector<8x32xf32>
    tpu.vector_store %arg10[%c8, %c0_49], %130 {strides = array<i32>} : memref<128x32xf32, #tpu.memory_space<vmem>>, vector<8x32xf32>,
    %132 = arith.truncf %102 : vector<8x32xf32> to vector<8x32xbf16>
    %cst_50 = arith.constant dense<0.000000e+00> : vector<8x128xf32>
    %133 = tpu.matmul %132, %11, %cst_50 {dimension_numbers = #tpu.dot_dimension_numbers<[1], [0], [0], [1], [0, 0, 1, 1], [], []>} : vector<8x32xbf16>, vector<32x128xbf16>, vector<8x128xf32> -> vector<8x128xf32>
    %134 = arith.addf %19, %133 : vector<8x128xf32>
    %135 = math.tanh %134 : vector<8x128xf32>
    %136 = vector.extract_strided_slice %135 {offsets = [0, 0], sizes = [8, 32], strides = [1, 1]} : vector<8x128xf32> to vector<8x32xf32>
    %cst_51 = arith.constant 5.000000e-01 : f32
    %137 = vector.broadcast %cst_51 : f32 to vector<8x32xf32>
    %138 = arith.mulf %137, %136 : vector<8x32xf32>
    %cst_52 = arith.constant 5.000000e-01 : f32
    %139 = vector.broadcast %cst_52 : f32 to vector<8x32xf32>
    %140 = arith.addf %138, %139 : vector<8x32xf32>
    %141 = vector.extract_strided_slice %135 {offsets = [0, 32], sizes = [8, 32], strides = [1, 1]} : vector<8x128xf32> to vector<8x32xf32>
    %cst_53 = arith.constant 5.000000e-01 : f32
    %142 = vector.broadcast %cst_53 : f32 to vector<8x32xf32>
    %143 = arith.mulf %142, %141 : vector<8x32xf32>
    %cst_54 = arith.constant 5.000000e-01 : f32
    %144 = vector.broadcast %cst_54 : f32 to vector<8x32xf32>
    %145 = arith.addf %143, %144 : vector<8x32xf32>
    %146 = vector.extract_strided_slice %135 {offsets = [0, 64], sizes = [8, 32], strides = [1, 1]} : vector<8x128xf32> to vector<8x32xf32>
    %147 = vector.extract_strided_slice %135 {offsets = [0, 96], sizes = [8, 32], strides = [1, 1]} : vector<8x128xf32> to vector<8x32xf32>
    %cst_55 = arith.constant 5.000000e-01 : f32
    %148 = vector.broadcast %cst_55 : f32 to vector<8x32xf32>
    %149 = arith.mulf %148, %147 : vector<8x32xf32>
    %cst_56 = arith.constant 5.000000e-01 : f32
    %150 = vector.broadcast %cst_56 : f32 to vector<8x32xf32>
    %151 = arith.addf %149, %150 : vector<8x32xf32>
    %152 = arith.mulf %145, %100 : vector<8x32xf32>
    %153 = arith.mulf %140, %146 : vector<8x32xf32>
    %154 = arith.addf %152, %153 : vector<8x32xf32>
    %155 = math.tanh %154 : vector<8x32xf32>
    %156 = arith.mulf %151, %155 : vector<8x32xf32>
    %157 = arith.truncf %156 : vector<8x32xf32> to vector<8x32xbf16>
    %cst_57 = arith.constant dense<0.000000e+00> : vector<8x128xf32>
    %158 = tpu.matmul %157, %12, %cst_57 {dimension_numbers = #tpu.dot_dimension_numbers<[1], [0], [0], [1], [0, 0, 1, 1], [], []>} : vector<8x32xbf16>, vector<32x128xbf16>, vector<8x128xf32> -> vector<8x128xf32>
    %159 = arith.truncf %130 : vector<8x32xf32> to vector<8x32xbf16>
    %cst_58 = arith.constant dense<0.000000e+00> : vector<8x128xf32>
    %160 = tpu.matmul %159, %13, %cst_58 {dimension_numbers = #tpu.dot_dimension_numbers<[1], [0], [0], [1], [0, 0, 1, 1], [], []>} : vector<8x32xbf16>, vector<32x128xbf16>, vector<8x128xf32> -> vector<8x128xf32>
    %161 = arith.addf %160, %22 : vector<8x128xf32>
    %162 = arith.addf %158, %161 : vector<8x128xf32>
    %163 = math.tanh %162 : vector<8x128xf32>
    %164 = vector.extract_strided_slice %163 {offsets = [0, 0], sizes = [8, 32], strides = [1, 1]} : vector<8x128xf32> to vector<8x32xf32>
    %cst_59 = arith.constant 5.000000e-01 : f32
    %165 = vector.broadcast %cst_59 : f32 to vector<8x32xf32>
    %166 = arith.mulf %165, %164 : vector<8x32xf32>
    %cst_60 = arith.constant 5.000000e-01 : f32
    %167 = vector.broadcast %cst_60 : f32 to vector<8x32xf32>
    %168 = arith.addf %166, %167 : vector<8x32xf32>
    %169 = vector.extract_strided_slice %163 {offsets = [0, 32], sizes = [8, 32], strides = [1, 1]} : vector<8x128xf32> to vector<8x32xf32>
    %cst_61 = arith.constant 5.000000e-01 : f32
    %170 = vector.broadcast %cst_61 : f32 to vector<8x32xf32>
    %171 = arith.mulf %170, %169 : vector<8x32xf32>
    %cst_62 = arith.constant 5.000000e-01 : f32
    %172 = vector.broadcast %cst_62 : f32 to vector<8x32xf32>
    %173 = arith.addf %171, %172 : vector<8x32xf32>
    %174 = vector.extract_strided_slice %163 {offsets = [0, 64], sizes = [8, 32], strides = [1, 1]} : vector<8x128xf32> to vector<8x32xf32>
    %175 = vector.extract_strided_slice %163 {offsets = [0, 96], sizes = [8, 32], strides = [1, 1]} : vector<8x128xf32> to vector<8x32xf32>
    %cst_63 = arith.constant 5.000000e-01 : f32
    %176 = vector.broadcast %cst_63 : f32 to vector<8x32xf32>
    %177 = arith.mulf %176, %175 : vector<8x32xf32>
    %cst_64 = arith.constant 5.000000e-01 : f32
    %178 = vector.broadcast %cst_64 : f32 to vector<8x32xf32>
    %179 = arith.addf %177, %178 : vector<8x32xf32>
    %180 = arith.mulf %173, %128 : vector<8x32xf32>
    %181 = arith.mulf %168, %174 : vector<8x32xf32>
    %182 = arith.addf %180, %181 : vector<8x32xf32>
    %183 = math.tanh %182 : vector<8x32xf32>
    %184 = arith.mulf %179, %183 : vector<8x32xf32>
    %c16 = arith.constant 16 : index
    %c0_65 = arith.constant 0 : index
    %185 = vector.load %arg10[%c16, %c0_65] : memref<128x32xf32, #tpu.memory_space<vmem>>, vector<8x32xf32>
    tpu.vector_store %arg10[%c16, %c0_65], %184 {strides = array<i32>} : memref<128x32xf32, #tpu.memory_space<vmem>>, vector<8x32xf32>,
    %186 = arith.truncf %156 : vector<8x32xf32> to vector<8x32xbf16>
    %cst_66 = arith.constant dense<0.000000e+00> : vector<8x128xf32>
    %187 = tpu.matmul %186, %11, %cst_66 {dimension_numbers = #tpu.dot_dimension_numbers<[1], [0], [0], [1], [0, 0, 1, 1], [], []>} : vector<8x32xbf16>, vector<32x128xbf16>, vector<8x128xf32> -> vector<8x128xf32>
    %188 = arith.addf %19, %187 : vector<8x128xf32>
    %189 = math.tanh %188 : vector<8x128xf32>
    %190 = vector.extract_strided_slice %189 {offsets = [0, 0], sizes = [8, 32], strides = [1, 1]} : vector<8x128xf32> to vector<8x32xf32>
    %cst_67 = arith.constant 5.000000e-01 : f32
    %191 = vector.broadcast %cst_67 : f32 to vector<8x32xf32>
    %192 = arith.mulf %191, %190 : vector<8x32xf32>
    %cst_68 = arith.constant 5.000000e-01 : f32
    %193 = vector.broadcast %cst_68 : f32 to vector<8x32xf32>
    %194 = arith.addf %192, %193 : vector<8x32xf32>
    %195 = vector.extract_strided_slice %189 {offsets = [0, 32], sizes = [8, 32], strides = [1, 1]} : vector<8x128xf32> to vector<8x32xf32>
    %cst_69 = arith.constant 5.000000e-01 : f32
    %196 = vector.broadcast %cst_69 : f32 to vector<8x32xf32>
    %197 = arith.mulf %196, %195 : vector<8x32xf32>
    %cst_70 = arith.constant 5.000000e-01 : f32
    %198 = vector.broadcast %cst_70 : f32 to vector<8x32xf32>
    %199 = arith.addf %197, %198 : vector<8x32xf32>
    %200 = vector.extract_strided_slice %189 {offsets = [0, 64], sizes = [8, 32], strides = [1, 1]} : vector<8x128xf32> to vector<8x32xf32>
    %201 = vector.extract_strided_slice %189 {offsets = [0, 96], sizes = [8, 32], strides = [1, 1]} : vector<8x128xf32> to vector<8x32xf32>
    %cst_71 = arith.constant 5.000000e-01 : f32
    %202 = vector.broadcast %cst_71 : f32 to vector<8x32xf32>
    %203 = arith.mulf %202, %201 : vector<8x32xf32>
    %cst_72 = arith.constant 5.000000e-01 : f32
    %204 = vector.broadcast %cst_72 : f32 to vector<8x32xf32>
    %205 = arith.addf %203, %204 : vector<8x32xf32>
    %206 = arith.mulf %199, %154 : vector<8x32xf32>
    %207 = arith.mulf %194, %200 : vector<8x32xf32>
    %208 = arith.addf %206, %207 : vector<8x32xf32>
    %209 = math.tanh %208 : vector<8x32xf32>
    %210 = arith.mulf %205, %209 : vector<8x32xf32>
    %211 = arith.truncf %210 : vector<8x32xf32> to vector<8x32xbf16>
    %cst_73 = arith.constant dense<0.000000e+00> : vector<8x128xf32>
    %212 = tpu.matmul %211, %12, %cst_73 {dimension_numbers = #tpu.dot_dimension_numbers<[1], [0], [0], [1], [0, 0, 1, 1], [], []>} : vector<8x32xbf16>, vector<32x128xbf16>, vector<8x128xf32> -> vector<8x128xf32>
    %213 = arith.truncf %184 : vector<8x32xf32> to vector<8x32xbf16>
    %cst_74 = arith.constant dense<0.000000e+00> : vector<8x128xf32>
    %214 = tpu.matmul %213, %13, %cst_74 {dimension_numbers = #tpu.dot_dimension_numbers<[1], [0], [0], [1], [0, 0, 1, 1], [], []>} : vector<8x32xbf16>, vector<32x128xbf16>, vector<8x128xf32> -> vector<8x128xf32>
    %215 = arith.addf %214, %22 : vector<8x128xf32>
    %216 = arith.addf %212, %215 : vector<8x128xf32>
    %217 = math.tanh %216 : vector<8x128xf32>
    %218 = vector.extract_strided_slice %217 {offsets = [0, 0], sizes = [8, 32], strides = [1, 1]} : vector<8x128xf32> to vector<8x32xf32>
    %cst_75 = arith.constant 5.000000e-01 : f32
    %219 = vector.broadcast %cst_75 : f32 to vector<8x32xf32>
    %220 = arith.mulf %219, %218 : vector<8x32xf32>
    %cst_76 = arith.constant 5.000000e-01 : f32
    %221 = vector.broadcast %cst_76 : f32 to vector<8x32xf32>
    %222 = arith.addf %220, %221 : vector<8x32xf32>
    %223 = vector.extract_strided_slice %217 {offsets = [0, 32], sizes = [8, 32], strides = [1, 1]} : vector<8x128xf32> to vector<8x32xf32>
    %cst_77 = arith.constant 5.000000e-01 : f32
    %224 = vector.broadcast %cst_77 : f32 to vector<8x32xf32>
    %225 = arith.mulf %224, %223 : vector<8x32xf32>
    %cst_78 = arith.constant 5.000000e-01 : f32
    %226 = vector.broadcast %cst_78 : f32 to vector<8x32xf32>
    %227 = arith.addf %225, %226 : vector<8x32xf32>
    %228 = vector.extract_strided_slice %217 {offsets = [0, 64], sizes = [8, 32], strides = [1, 1]} : vector<8x128xf32> to vector<8x32xf32>
    %229 = vector.extract_strided_slice %217 {offsets = [0, 96], sizes = [8, 32], strides = [1, 1]} : vector<8x128xf32> to vector<8x32xf32>
    %cst_79 = arith.constant 5.000000e-01 : f32
    %230 = vector.broadcast %cst_79 : f32 to vector<8x32xf32>
    %231 = arith.mulf %230, %229 : vector<8x32xf32>
    %cst_80 = arith.constant 5.000000e-01 : f32
    %232 = vector.broadcast %cst_80 : f32 to vector<8x32xf32>
    %233 = arith.addf %231, %232 : vector<8x32xf32>
    %234 = arith.mulf %227, %182 : vector<8x32xf32>
    %235 = arith.mulf %222, %228 : vector<8x32xf32>
    %236 = arith.addf %234, %235 : vector<8x32xf32>
    %237 = math.tanh %236 : vector<8x32xf32>
    %238 = arith.mulf %233, %237 : vector<8x32xf32>
    %c24 = arith.constant 24 : index
    %c0_81 = arith.constant 0 : index
    %239 = vector.load %arg10[%c24, %c0_81] : memref<128x32xf32, #tpu.memory_space<vmem>>, vector<8x32xf32>
    tpu.vector_store %arg10[%c24, %c0_81], %238 {strides = array<i32>} : memref<128x32xf32, #tpu.memory_space<vmem>>, vector<8x32xf32>,
    %240 = arith.truncf %210 : vector<8x32xf32> to vector<8x32xbf16>
    %cst_82 = arith.constant dense<0.000000e+00> : vector<8x128xf32>
    %241 = tpu.matmul %240, %11, %cst_82 {dimension_numbers = #tpu.dot_dimension_numbers<[1], [0], [0], [1], [0, 0, 1, 1], [], []>} : vector<8x32xbf16>, vector<32x128xbf16>, vector<8x128xf32> -> vector<8x128xf32>
    %242 = arith.addf %19, %241 : vector<8x128xf32>
    %243 = math.tanh %242 : vector<8x128xf32>
    %244 = vector.extract_strided_slice %243 {offsets = [0, 0], sizes = [8, 32], strides = [1, 1]} : vector<8x128xf32> to vector<8x32xf32>
    %cst_83 = arith.constant 5.000000e-01 : f32
    %245 = vector.broadcast %cst_83 : f32 to vector<8x32xf32>
    %246 = arith.mulf %245, %244 : vector<8x32xf32>
    %cst_84 = arith.constant 5.000000e-01 : f32
    %247 = vector.broadcast %cst_84 : f32 to vector<8x32xf32>
    %248 = arith.addf %246, %247 : vector<8x32xf32>
    %249 = vector.extract_strided_slice %243 {offsets = [0, 32], sizes = [8, 32], strides = [1, 1]} : vector<8x128xf32> to vector<8x32xf32>
    %cst_85 = arith.constant 5.000000e-01 : f32
    %250 = vector.broadcast %cst_85 : f32 to vector<8x32xf32>
    %251 = arith.mulf %250, %249 : vector<8x32xf32>
    %cst_86 = arith.constant 5.000000e-01 : f32
    %252 = vector.broadcast %cst_86 : f32 to vector<8x32xf32>
    %253 = arith.addf %251, %252 : vector<8x32xf32>
    %254 = vector.extract_strided_slice %243 {offsets = [0, 64], sizes = [8, 32], strides = [1, 1]} : vector<8x128xf32> to vector<8x32xf32>
    %255 = vector.extract_strided_slice %243 {offsets = [0, 96], sizes = [8, 32], strides = [1, 1]} : vector<8x128xf32> to vector<8x32xf32>
    %cst_87 = arith.constant 5.000000e-01 : f32
    %256 = vector.broadcast %cst_87 : f32 to vector<8x32xf32>
    %257 = arith.mulf %256, %255 : vector<8x32xf32>
    %cst_88 = arith.constant 5.000000e-01 : f32
    %258 = vector.broadcast %cst_88 : f32 to vector<8x32xf32>
    %259 = arith.addf %257, %258 : vector<8x32xf32>
    %260 = arith.mulf %253, %208 : vector<8x32xf32>
    %261 = arith.mulf %248, %254 : vector<8x32xf32>
    %262 = arith.addf %260, %261 : vector<8x32xf32>
    %263 = math.tanh %262 : vector<8x32xf32>
    %264 = arith.mulf %259, %263 : vector<8x32xf32>
    %265 = arith.truncf %264 : vector<8x32xf32> to vector<8x32xbf16>
    %cst_89 = arith.constant dense<0.000000e+00> : vector<8x128xf32>
    %266 = tpu.matmul %265, %12, %cst_89 {dimension_numbers = #tpu.dot_dimension_numbers<[1], [0], [0], [1], [0, 0, 1, 1], [], []>} : vector<8x32xbf16>, vector<32x128xbf16>, vector<8x128xf32> -> vector<8x128xf32>
    %267 = arith.truncf %238 : vector<8x32xf32> to vector<8x32xbf16>
    %cst_90 = arith.constant dense<0.000000e+00> : vector<8x128xf32>
    %268 = tpu.matmul %267, %13, %cst_90 {dimension_numbers = #tpu.dot_dimension_numbers<[1], [0], [0], [1], [0, 0, 1, 1], [], []>} : vector<8x32xbf16>, vector<32x128xbf16>, vector<8x128xf32> -> vector<8x128xf32>
    %269 = arith.addf %268, %22 : vector<8x128xf32>
    %270 = arith.addf %266, %269 : vector<8x128xf32>
    %271 = math.tanh %270 : vector<8x128xf32>
    %272 = vector.extract_strided_slice %271 {offsets = [0, 0], sizes = [8, 32], strides = [1, 1]} : vector<8x128xf32> to vector<8x32xf32>
    %cst_91 = arith.constant 5.000000e-01 : f32
    %273 = vector.broadcast %cst_91 : f32 to vector<8x32xf32>
    %274 = arith.mulf %273, %272 : vector<8x32xf32>
    %cst_92 = arith.constant 5.000000e-01 : f32
    %275 = vector.broadcast %cst_92 : f32 to vector<8x32xf32>
    %276 = arith.addf %274, %275 : vector<8x32xf32>
    %277 = vector.extract_strided_slice %271 {offsets = [0, 32], sizes = [8, 32], strides = [1, 1]} : vector<8x128xf32> to vector<8x32xf32>
    %cst_93 = arith.constant 5.000000e-01 : f32
    %278 = vector.broadcast %cst_93 : f32 to vector<8x32xf32>
    %279 = arith.mulf %278, %277 : vector<8x32xf32>
    %cst_94 = arith.constant 5.000000e-01 : f32
    %280 = vector.broadcast %cst_94 : f32 to vector<8x32xf32>
    %281 = arith.addf %279, %280 : vector<8x32xf32>
    %282 = vector.extract_strided_slice %271 {offsets = [0, 64], sizes = [8, 32], strides = [1, 1]} : vector<8x128xf32> to vector<8x32xf32>
    %283 = vector.extract_strided_slice %271 {offsets = [0, 96], sizes = [8, 32], strides = [1, 1]} : vector<8x128xf32> to vector<8x32xf32>
    %cst_95 = arith.constant 5.000000e-01 : f32
    %284 = vector.broadcast %cst_95 : f32 to vector<8x32xf32>
    %285 = arith.mulf %284, %283 : vector<8x32xf32>
    %cst_96 = arith.constant 5.000000e-01 : f32
    %286 = vector.broadcast %cst_96 : f32 to vector<8x32xf32>
    %287 = arith.addf %285, %286 : vector<8x32xf32>
    %288 = arith.mulf %281, %236 : vector<8x32xf32>
    %289 = arith.mulf %276, %282 : vector<8x32xf32>
    %290 = arith.addf %288, %289 : vector<8x32xf32>
    %291 = math.tanh %290 : vector<8x32xf32>
    %292 = arith.mulf %287, %291 : vector<8x32xf32>
    %c32_97 = arith.constant 32 : index
    %c0_98 = arith.constant 0 : index
    %293 = vector.load %arg10[%c32_97, %c0_98] : memref<128x32xf32, #tpu.memory_space<vmem>>, vector<8x32xf32>
    tpu.vector_store %arg10[%c32_97, %c0_98], %292 {strides = array<i32>} : memref<128x32xf32, #tpu.memory_space<vmem>>, vector<8x32xf32>,
    %294 = arith.truncf %264 : vector<8x32xf32> to vector<8x32xbf16>
    %cst_99 = arith.constant dense<0.000000e+00> : vector<8x128xf32>
    %295 = tpu.matmul %294, %11, %cst_99 {dimension_numbers = #tpu.dot_dimension_numbers<[1], [0], [0], [1], [0, 0, 1, 1], [], []>} : vector<8x32xbf16>, vector<32x128xbf16>, vector<8x128xf32> -> vector<8x128xf32>
    %296 = arith.addf %19, %295 : vector<8x128xf32>
    %297 = math.tanh %296 : vector<8x128xf32>
    %298 = vector.extract_strided_slice %297 {offsets = [0, 0], sizes = [8, 32], strides = [1, 1]} : vector<8x128xf32> to vector<8x32xf32>
    %cst_100 = arith.constant 5.000000e-01 : f32
    %299 = vector.broadcast %cst_100 : f32 to vector<8x32xf32>
    %300 = arith.mulf %299, %298 : vector<8x32xf32>
    %cst_101 = arith.constant 5.000000e-01 : f32
    %301 = vector.broadcast %cst_101 : f32 to vector<8x32xf32>
    %302 = arith.addf %300, %301 : vector<8x32xf32>
    %303 = vector.extract_strided_slice %297 {offsets = [0, 32], sizes = [8, 32], strides = [1, 1]} : vector<8x128xf32> to vector<8x32xf32>
    %cst_102 = arith.constant 5.000000e-01 : f32
    %304 = vector.broadcast %cst_102 : f32 to vector<8x32xf32>
    %305 = arith.mulf %304, %303 : vector<8x32xf32>
    %cst_103 = arith.constant 5.000000e-01 : f32
    %306 = vector.broadcast %cst_103 : f32 to vector<8x32xf32>
    %307 = arith.addf %305, %306 : vector<8x32xf32>
    %308 = vector.extract_strided_slice %297 {offsets = [0, 64], sizes = [8, 32], strides = [1, 1]} : vector<8x128xf32> to vector<8x32xf32>
    %309 = vector.extract_strided_slice %297 {offsets = [0, 96], sizes = [8, 32], strides = [1, 1]} : vector<8x128xf32> to vector<8x32xf32>
    %cst_104 = arith.constant 5.000000e-01 : f32
    %310 = vector.broadcast %cst_104 : f32 to vector<8x32xf32>
    %311 = arith.mulf %310, %309 : vector<8x32xf32>
    %cst_105 = arith.constant 5.000000e-01 : f32
    %312 = vector.broadcast %cst_105 : f32 to vector<8x32xf32>
    %313 = arith.addf %311, %312 : vector<8x32xf32>
    %314 = arith.mulf %307, %262 : vector<8x32xf32>
    %315 = arith.mulf %302, %308 : vector<8x32xf32>
    %316 = arith.addf %314, %315 : vector<8x32xf32>
    %317 = math.tanh %316 : vector<8x32xf32>
    %318 = arith.mulf %313, %317 : vector<8x32xf32>
    %319 = arith.truncf %318 : vector<8x32xf32> to vector<8x32xbf16>
    %cst_106 = arith.constant dense<0.000000e+00> : vector<8x128xf32>
    %320 = tpu.matmul %319, %12, %cst_106 {dimension_numbers = #tpu.dot_dimension_numbers<[1], [0], [0], [1], [0, 0, 1, 1], [], []>} : vector<8x32xbf16>, vector<32x128xbf16>, vector<8x128xf32> -> vector<8x128xf32>
    %321 = arith.truncf %292 : vector<8x32xf32> to vector<8x32xbf16>
    %cst_107 = arith.constant dense<0.000000e+00> : vector<8x128xf32>
    %322 = tpu.matmul %321, %13, %cst_107 {dimension_numbers = #tpu.dot_dimension_numbers<[1], [0], [0], [1], [0, 0, 1, 1], [], []>} : vector<8x32xbf16>, vector<32x128xbf16>, vector<8x128xf32> -> vector<8x128xf32>
    %323 = arith.addf %322, %22 : vector<8x128xf32>
    %324 = arith.addf %320, %323 : vector<8x128xf32>
    %325 = math.tanh %324 : vector<8x128xf32>
    %326 = vector.extract_strided_slice %325 {offsets = [0, 0], sizes = [8, 32], strides = [1, 1]} : vector<8x128xf32> to vector<8x32xf32>
    %cst_108 = arith.constant 5.000000e-01 : f32
    %327 = vector.broadcast %cst_108 : f32 to vector<8x32xf32>
    %328 = arith.mulf %327, %326 : vector<8x32xf32>
    %cst_109 = arith.constant 5.000000e-01 : f32
    %329 = vector.broadcast %cst_109 : f32 to vector<8x32xf32>
    %330 = arith.addf %328, %329 : vector<8x32xf32>
    %331 = vector.extract_strided_slice %325 {offsets = [0, 32], sizes = [8, 32], strides = [1, 1]} : vector<8x128xf32> to vector<8x32xf32>
    %cst_110 = arith.constant 5.000000e-01 : f32
    %332 = vector.broadcast %cst_110 : f32 to vector<8x32xf32>
    %333 = arith.mulf %332, %331 : vector<8x32xf32>
    %cst_111 = arith.constant 5.000000e-01 : f32
    %334 = vector.broadcast %cst_111 : f32 to vector<8x32xf32>
    %335 = arith.addf %333, %334 : vector<8x32xf32>
    %336 = vector.extract_strided_slice %325 {offsets = [0, 64], sizes = [8, 32], strides = [1, 1]} : vector<8x128xf32> to vector<8x32xf32>
    %337 = vector.extract_strided_slice %325 {offsets = [0, 96], sizes = [8, 32], strides = [1, 1]} : vector<8x128xf32> to vector<8x32xf32>
    %cst_112 = arith.constant 5.000000e-01 : f32
    %338 = vector.broadcast %cst_112 : f32 to vector<8x32xf32>
    %339 = arith.mulf %338, %337 : vector<8x32xf32>
    %cst_113 = arith.constant 5.000000e-01 : f32
    %340 = vector.broadcast %cst_113 : f32 to vector<8x32xf32>
    %341 = arith.addf %339, %340 : vector<8x32xf32>
    %342 = arith.mulf %335, %290 : vector<8x32xf32>
    %343 = arith.mulf %330, %336 : vector<8x32xf32>
    %344 = arith.addf %342, %343 : vector<8x32xf32>
    %345 = math.tanh %344 : vector<8x32xf32>
    %346 = arith.mulf %341, %345 : vector<8x32xf32>
    %c40 = arith.constant 40 : index
    %c0_114 = arith.constant 0 : index
    %347 = vector.load %arg10[%c40, %c0_114] : memref<128x32xf32, #tpu.memory_space<vmem>>, vector<8x32xf32>
    tpu.vector_store %arg10[%c40, %c0_114], %346 {strides = array<i32>} : memref<128x32xf32, #tpu.memory_space<vmem>>, vector<8x32xf32>,
    %348 = arith.truncf %318 : vector<8x32xf32> to vector<8x32xbf16>
    %cst_115 = arith.constant dense<0.000000e+00> : vector<8x128xf32>
    %349 = tpu.matmul %348, %11, %cst_115 {dimension_numbers = #tpu.dot_dimension_numbers<[1], [0], [0], [1], [0, 0, 1, 1], [], []>} : vector<8x32xbf16>, vector<32x128xbf16>, vector<8x128xf32> -> vector<8x128xf32>
    %350 = arith.addf %19, %349 : vector<8x128xf32>
    %351 = math.tanh %350 : vector<8x128xf32>
    %352 = vector.extract_strided_slice %351 {offsets = [0, 0], sizes = [8, 32], strides = [1, 1]} : vector<8x128xf32> to vector<8x32xf32>
    %cst_116 = arith.constant 5.000000e-01 : f32
    %353 = vector.broadcast %cst_116 : f32 to vector<8x32xf32>
    %354 = arith.mulf %353, %352 : vector<8x32xf32>
    %cst_117 = arith.constant 5.000000e-01 : f32
    %355 = vector.broadcast %cst_117 : f32 to vector<8x32xf32>
    %356 = arith.addf %354, %355 : vector<8x32xf32>
    %357 = vector.extract_strided_slice %351 {offsets = [0, 32], sizes = [8, 32], strides = [1, 1]} : vector<8x128xf32> to vector<8x32xf32>
    %cst_118 = arith.constant 5.000000e-01 : f32
    %358 = vector.broadcast %cst_118 : f32 to vector<8x32xf32>
    %359 = arith.mulf %358, %357 : vector<8x32xf32>
    %cst_119 = arith.constant 5.000000e-01 : f32
    %360 = vector.broadcast %cst_119 : f32 to vector<8x32xf32>
    %361 = arith.addf %359, %360 : vector<8x32xf32>
    %362 = vector.extract_strided_slice %351 {offsets = [0, 64], sizes = [8, 32], strides = [1, 1]} : vector<8x128xf32> to vector<8x32xf32>
    %363 = vector.extract_strided_slice %351 {offsets = [0, 96], sizes = [8, 32], strides = [1, 1]} : vector<8x128xf32> to vector<8x32xf32>
    %cst_120 = arith.constant 5.000000e-01 : f32
    %364 = vector.broadcast %cst_120 : f32 to vector<8x32xf32>
    %365 = arith.mulf %364, %363 : vector<8x32xf32>
    %cst_121 = arith.constant 5.000000e-01 : f32
    %366 = vector.broadcast %cst_121 : f32 to vector<8x32xf32>
    %367 = arith.addf %365, %366 : vector<8x32xf32>
    %368 = arith.mulf %361, %316 : vector<8x32xf32>
    %369 = arith.mulf %356, %362 : vector<8x32xf32>
    %370 = arith.addf %368, %369 : vector<8x32xf32>
    %371 = math.tanh %370 : vector<8x32xf32>
    %372 = arith.mulf %367, %371 : vector<8x32xf32>
    %373 = arith.truncf %372 : vector<8x32xf32> to vector<8x32xbf16>
    %cst_122 = arith.constant dense<0.000000e+00> : vector<8x128xf32>
    %374 = tpu.matmul %373, %12, %cst_122 {dimension_numbers = #tpu.dot_dimension_numbers<[1], [0], [0], [1], [0, 0, 1, 1], [], []>} : vector<8x32xbf16>, vector<32x128xbf16>, vector<8x128xf32> -> vector<8x128xf32>
    %375 = arith.truncf %346 : vector<8x32xf32> to vector<8x32xbf16>
    %cst_123 = arith.constant dense<0.000000e+00> : vector<8x128xf32>
    %376 = tpu.matmul %375, %13, %cst_123 {dimension_numbers = #tpu.dot_dimension_numbers<[1], [0], [0], [1], [0, 0, 1, 1], [], []>} : vector<8x32xbf16>, vector<32x128xbf16>, vector<8x128xf32> -> vector<8x128xf32>
    %377 = arith.addf %376, %22 : vector<8x128xf32>
    %378 = arith.addf %374, %377 : vector<8x128xf32>
    %379 = math.tanh %378 : vector<8x128xf32>
    %380 = vector.extract_strided_slice %379 {offsets = [0, 0], sizes = [8, 32], strides = [1, 1]} : vector<8x128xf32> to vector<8x32xf32>
    %cst_124 = arith.constant 5.000000e-01 : f32
    %381 = vector.broadcast %cst_124 : f32 to vector<8x32xf32>
    %382 = arith.mulf %381, %380 : vector<8x32xf32>
    %cst_125 = arith.constant 5.000000e-01 : f32
    %383 = vector.broadcast %cst_125 : f32 to vector<8x32xf32>
    %384 = arith.addf %382, %383 : vector<8x32xf32>
    %385 = vector.extract_strided_slice %379 {offsets = [0, 32], sizes = [8, 32], strides = [1, 1]} : vector<8x128xf32> to vector<8x32xf32>
    %cst_126 = arith.constant 5.000000e-01 : f32
    %386 = vector.broadcast %cst_126 : f32 to vector<8x32xf32>
    %387 = arith.mulf %386, %385 : vector<8x32xf32>
    %cst_127 = arith.constant 5.000000e-01 : f32
    %388 = vector.broadcast %cst_127 : f32 to vector<8x32xf32>
    %389 = arith.addf %387, %388 : vector<8x32xf32>
    %390 = vector.extract_strided_slice %379 {offsets = [0, 64], sizes = [8, 32], strides = [1, 1]} : vector<8x128xf32> to vector<8x32xf32>
    %391 = vector.extract_strided_slice %379 {offsets = [0, 96], sizes = [8, 32], strides = [1, 1]} : vector<8x128xf32> to vector<8x32xf32>
    %cst_128 = arith.constant 5.000000e-01 : f32
    %392 = vector.broadcast %cst_128 : f32 to vector<8x32xf32>
    %393 = arith.mulf %392, %391 : vector<8x32xf32>
    %cst_129 = arith.constant 5.000000e-01 : f32
    %394 = vector.broadcast %cst_129 : f32 to vector<8x32xf32>
    %395 = arith.addf %393, %394 : vector<8x32xf32>
    %396 = arith.mulf %389, %344 : vector<8x32xf32>
    %397 = arith.mulf %384, %390 : vector<8x32xf32>
    %398 = arith.addf %396, %397 : vector<8x32xf32>
    %399 = math.tanh %398 : vector<8x32xf32>
    %400 = arith.mulf %395, %399 : vector<8x32xf32>
    %c48 = arith.constant 48 : index
    %c0_130 = arith.constant 0 : index
    %401 = vector.load %arg10[%c48, %c0_130] : memref<128x32xf32, #tpu.memory_space<vmem>>, vector<8x32xf32>
    tpu.vector_store %arg10[%c48, %c0_130], %400 {strides = array<i32>} : memref<128x32xf32, #tpu.memory_space<vmem>>, vector<8x32xf32>,
    %402 = arith.truncf %372 : vector<8x32xf32> to vector<8x32xbf16>
    %cst_131 = arith.constant dense<0.000000e+00> : vector<8x128xf32>
    %403 = tpu.matmul %402, %11, %cst_131 {dimension_numbers = #tpu.dot_dimension_numbers<[1], [0], [0], [1], [0, 0, 1, 1], [], []>} : vector<8x32xbf16>, vector<32x128xbf16>, vector<8x128xf32> -> vector<8x128xf32>
    %404 = arith.addf %19, %403 : vector<8x128xf32>
    %405 = math.tanh %404 : vector<8x128xf32>
    %406 = vector.extract_strided_slice %405 {offsets = [0, 0], sizes = [8, 32], strides = [1, 1]} : vector<8x128xf32> to vector<8x32xf32>
    %cst_132 = arith.constant 5.000000e-01 : f32
    %407 = vector.broadcast %cst_132 : f32 to vector<8x32xf32>
    %408 = arith.mulf %407, %406 : vector<8x32xf32>
    %cst_133 = arith.constant 5.000000e-01 : f32
    %409 = vector.broadcast %cst_133 : f32 to vector<8x32xf32>
    %410 = arith.addf %408, %409 : vector<8x32xf32>
    %411 = vector.extract_strided_slice %405 {offsets = [0, 32], sizes = [8, 32], strides = [1, 1]} : vector<8x128xf32> to vector<8x32xf32>
    %cst_134 = arith.constant 5.000000e-01 : f32
    %412 = vector.broadcast %cst_134 : f32 to vector<8x32xf32>
    %413 = arith.mulf %412, %411 : vector<8x32xf32>
    %cst_135 = arith.constant 5.000000e-01 : f32
    %414 = vector.broadcast %cst_135 : f32 to vector<8x32xf32>
    %415 = arith.addf %413, %414 : vector<8x32xf32>
    %416 = vector.extract_strided_slice %405 {offsets = [0, 64], sizes = [8, 32], strides = [1, 1]} : vector<8x128xf32> to vector<8x32xf32>
    %417 = vector.extract_strided_slice %405 {offsets = [0, 96], sizes = [8, 32], strides = [1, 1]} : vector<8x128xf32> to vector<8x32xf32>
    %cst_136 = arith.constant 5.000000e-01 : f32
    %418 = vector.broadcast %cst_136 : f32 to vector<8x32xf32>
    %419 = arith.mulf %418, %417 : vector<8x32xf32>
    %cst_137 = arith.constant 5.000000e-01 : f32
    %420 = vector.broadcast %cst_137 : f32 to vector<8x32xf32>
    %421 = arith.addf %419, %420 : vector<8x32xf32>
    %422 = arith.mulf %415, %370 : vector<8x32xf32>
    %423 = arith.mulf %410, %416 : vector<8x32xf32>
    %424 = arith.addf %422, %423 : vector<8x32xf32>
    %425 = math.tanh %424 : vector<8x32xf32>
    %426 = arith.mulf %421, %425 : vector<8x32xf32>
    %427 = arith.truncf %426 : vector<8x32xf32> to vector<8x32xbf16>
    %cst_138 = arith.constant dense<0.000000e+00> : vector<8x128xf32>
    %428 = tpu.matmul %427, %12, %cst_138 {dimension_numbers = #tpu.dot_dimension_numbers<[1], [0], [0], [1], [0, 0, 1, 1], [], []>} : vector<8x32xbf16>, vector<32x128xbf16>, vector<8x128xf32> -> vector<8x128xf32>
    %429 = arith.truncf %400 : vector<8x32xf32> to vector<8x32xbf16>
    %cst_139 = arith.constant dense<0.000000e+00> : vector<8x128xf32>
    %430 = tpu.matmul %429, %13, %cst_139 {dimension_numbers = #tpu.dot_dimension_numbers<[1], [0], [0], [1], [0, 0, 1, 1], [], []>} : vector<8x32xbf16>, vector<32x128xbf16>, vector<8x128xf32> -> vector<8x128xf32>
    %431 = arith.addf %430, %22 : vector<8x128xf32>
    %432 = arith.addf %428, %431 : vector<8x128xf32>
    %433 = math.tanh %432 : vector<8x128xf32>
    %434 = vector.extract_strided_slice %433 {offsets = [0, 0], sizes = [8, 32], strides = [1, 1]} : vector<8x128xf32> to vector<8x32xf32>
    %cst_140 = arith.constant 5.000000e-01 : f32
    %435 = vector.broadcast %cst_140 : f32 to vector<8x32xf32>
    %436 = arith.mulf %435, %434 : vector<8x32xf32>
    %cst_141 = arith.constant 5.000000e-01 : f32
    %437 = vector.broadcast %cst_141 : f32 to vector<8x32xf32>
    %438 = arith.addf %436, %437 : vector<8x32xf32>
    %439 = vector.extract_strided_slice %433 {offsets = [0, 32], sizes = [8, 32], strides = [1, 1]} : vector<8x128xf32> to vector<8x32xf32>
    %cst_142 = arith.constant 5.000000e-01 : f32
    %440 = vector.broadcast %cst_142 : f32 to vector<8x32xf32>
    %441 = arith.mulf %440, %439 : vector<8x32xf32>
    %cst_143 = arith.constant 5.000000e-01 : f32
    %442 = vector.broadcast %cst_143 : f32 to vector<8x32xf32>
    %443 = arith.addf %441, %442 : vector<8x32xf32>
    %444 = vector.extract_strided_slice %433 {offsets = [0, 64], sizes = [8, 32], strides = [1, 1]} : vector<8x128xf32> to vector<8x32xf32>
    %445 = vector.extract_strided_slice %433 {offsets = [0, 96], sizes = [8, 32], strides = [1, 1]} : vector<8x128xf32> to vector<8x32xf32>
    %cst_144 = arith.constant 5.000000e-01 : f32
    %446 = vector.broadcast %cst_144 : f32 to vector<8x32xf32>
    %447 = arith.mulf %446, %445 : vector<8x32xf32>
    %cst_145 = arith.constant 5.000000e-01 : f32
    %448 = vector.broadcast %cst_145 : f32 to vector<8x32xf32>
    %449 = arith.addf %447, %448 : vector<8x32xf32>
    %450 = arith.mulf %443, %398 : vector<8x32xf32>
    %451 = arith.mulf %438, %444 : vector<8x32xf32>
    %452 = arith.addf %450, %451 : vector<8x32xf32>
    %453 = math.tanh %452 : vector<8x32xf32>
    %454 = arith.mulf %449, %453 : vector<8x32xf32>
    %c56 = arith.constant 56 : index
    %c0_146 = arith.constant 0 : index
    %455 = vector.load %arg10[%c56, %c0_146] : memref<128x32xf32, #tpu.memory_space<vmem>>, vector<8x32xf32>
    tpu.vector_store %arg10[%c56, %c0_146], %454 {strides = array<i32>} : memref<128x32xf32, #tpu.memory_space<vmem>>, vector<8x32xf32>,
    %456 = arith.truncf %426 : vector<8x32xf32> to vector<8x32xbf16>
    %cst_147 = arith.constant dense<0.000000e+00> : vector<8x128xf32>
    %457 = tpu.matmul %456, %11, %cst_147 {dimension_numbers = #tpu.dot_dimension_numbers<[1], [0], [0], [1], [0, 0, 1, 1], [], []>} : vector<8x32xbf16>, vector<32x128xbf16>, vector<8x128xf32> -> vector<8x128xf32>
    %458 = arith.addf %19, %457 : vector<8x128xf32>
    %459 = math.tanh %458 : vector<8x128xf32>
    %460 = vector.extract_strided_slice %459 {offsets = [0, 0], sizes = [8, 32], strides = [1, 1]} : vector<8x128xf32> to vector<8x32xf32>
    %cst_148 = arith.constant 5.000000e-01 : f32
    %461 = vector.broadcast %cst_148 : f32 to vector<8x32xf32>
    %462 = arith.mulf %461, %460 : vector<8x32xf32>
    %cst_149 = arith.constant 5.000000e-01 : f32
    %463 = vector.broadcast %cst_149 : f32 to vector<8x32xf32>
    %464 = arith.addf %462, %463 : vector<8x32xf32>
    %465 = vector.extract_strided_slice %459 {offsets = [0, 32], sizes = [8, 32], strides = [1, 1]} : vector<8x128xf32> to vector<8x32xf32>
    %cst_150 = arith.constant 5.000000e-01 : f32
    %466 = vector.broadcast %cst_150 : f32 to vector<8x32xf32>
    %467 = arith.mulf %466, %465 : vector<8x32xf32>
    %cst_151 = arith.constant 5.000000e-01 : f32
    %468 = vector.broadcast %cst_151 : f32 to vector<8x32xf32>
    %469 = arith.addf %467, %468 : vector<8x32xf32>
    %470 = vector.extract_strided_slice %459 {offsets = [0, 64], sizes = [8, 32], strides = [1, 1]} : vector<8x128xf32> to vector<8x32xf32>
    %471 = vector.extract_strided_slice %459 {offsets = [0, 96], sizes = [8, 32], strides = [1, 1]} : vector<8x128xf32> to vector<8x32xf32>
    %cst_152 = arith.constant 5.000000e-01 : f32
    %472 = vector.broadcast %cst_152 : f32 to vector<8x32xf32>
    %473 = arith.mulf %472, %471 : vector<8x32xf32>
    %cst_153 = arith.constant 5.000000e-01 : f32
    %474 = vector.broadcast %cst_153 : f32 to vector<8x32xf32>
    %475 = arith.addf %473, %474 : vector<8x32xf32>
    %476 = arith.mulf %469, %424 : vector<8x32xf32>
    %477 = arith.mulf %464, %470 : vector<8x32xf32>
    %478 = arith.addf %476, %477 : vector<8x32xf32>
    %479 = math.tanh %478 : vector<8x32xf32>
    %480 = arith.mulf %475, %479 : vector<8x32xf32>
    %481 = arith.truncf %480 : vector<8x32xf32> to vector<8x32xbf16>
    %cst_154 = arith.constant dense<0.000000e+00> : vector<8x128xf32>
    %482 = tpu.matmul %481, %12, %cst_154 {dimension_numbers = #tpu.dot_dimension_numbers<[1], [0], [0], [1], [0, 0, 1, 1], [], []>} : vector<8x32xbf16>, vector<32x128xbf16>, vector<8x128xf32> -> vector<8x128xf32>
    %483 = arith.truncf %454 : vector<8x32xf32> to vector<8x32xbf16>
    %cst_155 = arith.constant dense<0.000000e+00> : vector<8x128xf32>
    %484 = tpu.matmul %483, %13, %cst_155 {dimension_numbers = #tpu.dot_dimension_numbers<[1], [0], [0], [1], [0, 0, 1, 1], [], []>} : vector<8x32xbf16>, vector<32x128xbf16>, vector<8x128xf32> -> vector<8x128xf32>
    %485 = arith.addf %484, %22 : vector<8x128xf32>
    %486 = arith.addf %482, %485 : vector<8x128xf32>
    %487 = math.tanh %486 : vector<8x128xf32>
    %488 = vector.extract_strided_slice %487 {offsets = [0, 0], sizes = [8, 32], strides = [1, 1]} : vector<8x128xf32> to vector<8x32xf32>
    %cst_156 = arith.constant 5.000000e-01 : f32
    %489 = vector.broadcast %cst_156 : f32 to vector<8x32xf32>
    %490 = arith.mulf %489, %488 : vector<8x32xf32>
    %cst_157 = arith.constant 5.000000e-01 : f32
    %491 = vector.broadcast %cst_157 : f32 to vector<8x32xf32>
    %492 = arith.addf %490, %491 : vector<8x32xf32>
    %493 = vector.extract_strided_slice %487 {offsets = [0, 32], sizes = [8, 32], strides = [1, 1]} : vector<8x128xf32> to vector<8x32xf32>
    %cst_158 = arith.constant 5.000000e-01 : f32
    %494 = vector.broadcast %cst_158 : f32 to vector<8x32xf32>
    %495 = arith.mulf %494, %493 : vector<8x32xf32>
    %cst_159 = arith.constant 5.000000e-01 : f32
    %496 = vector.broadcast %cst_159 : f32 to vector<8x32xf32>
    %497 = arith.addf %495, %496 : vector<8x32xf32>
    %498 = vector.extract_strided_slice %487 {offsets = [0, 64], sizes = [8, 32], strides = [1, 1]} : vector<8x128xf32> to vector<8x32xf32>
    %499 = vector.extract_strided_slice %487 {offsets = [0, 96], sizes = [8, 32], strides = [1, 1]} : vector<8x128xf32> to vector<8x32xf32>
    %cst_160 = arith.constant 5.000000e-01 : f32
    %500 = vector.broadcast %cst_160 : f32 to vector<8x32xf32>
    %501 = arith.mulf %500, %499 : vector<8x32xf32>
    %cst_161 = arith.constant 5.000000e-01 : f32
    %502 = vector.broadcast %cst_161 : f32 to vector<8x32xf32>
    %503 = arith.addf %501, %502 : vector<8x32xf32>
    %504 = arith.mulf %497, %452 : vector<8x32xf32>
    %505 = arith.mulf %492, %498 : vector<8x32xf32>
    %506 = arith.addf %504, %505 : vector<8x32xf32>
    %507 = math.tanh %506 : vector<8x32xf32>
    %508 = arith.mulf %503, %507 : vector<8x32xf32>
    %c64_162 = arith.constant 64 : index
    %c0_163 = arith.constant 0 : index
    %509 = vector.load %arg10[%c64_162, %c0_163] : memref<128x32xf32, #tpu.memory_space<vmem>>, vector<8x32xf32>
    tpu.vector_store %arg10[%c64_162, %c0_163], %508 {strides = array<i32>} : memref<128x32xf32, #tpu.memory_space<vmem>>, vector<8x32xf32>,
    %510 = arith.truncf %480 : vector<8x32xf32> to vector<8x32xbf16>
    %cst_164 = arith.constant dense<0.000000e+00> : vector<8x128xf32>
    %511 = tpu.matmul %510, %11, %cst_164 {dimension_numbers = #tpu.dot_dimension_numbers<[1], [0], [0], [1], [0, 0, 1, 1], [], []>} : vector<8x32xbf16>, vector<32x128xbf16>, vector<8x128xf32> -> vector<8x128xf32>
    %512 = arith.addf %19, %511 : vector<8x128xf32>
    %513 = math.tanh %512 : vector<8x128xf32>
    %514 = vector.extract_strided_slice %513 {offsets = [0, 0], sizes = [8, 32], strides = [1, 1]} : vector<8x128xf32> to vector<8x32xf32>
    %cst_165 = arith.constant 5.000000e-01 : f32
    %515 = vector.broadcast %cst_165 : f32 to vector<8x32xf32>
    %516 = arith.mulf %515, %514 : vector<8x32xf32>
    %cst_166 = arith.constant 5.000000e-01 : f32
    %517 = vector.broadcast %cst_166 : f32 to vector<8x32xf32>
    %518 = arith.addf %516, %517 : vector<8x32xf32>
    %519 = vector.extract_strided_slice %513 {offsets = [0, 32], sizes = [8, 32], strides = [1, 1]} : vector<8x128xf32> to vector<8x32xf32>
    %cst_167 = arith.constant 5.000000e-01 : f32
    %520 = vector.broadcast %cst_167 : f32 to vector<8x32xf32>
    %521 = arith.mulf %520, %519 : vector<8x32xf32>
    %cst_168 = arith.constant 5.000000e-01 : f32
    %522 = vector.broadcast %cst_168 : f32 to vector<8x32xf32>
    %523 = arith.addf %521, %522 : vector<8x32xf32>
    %524 = vector.extract_strided_slice %513 {offsets = [0, 64], sizes = [8, 32], strides = [1, 1]} : vector<8x128xf32> to vector<8x32xf32>
    %525 = vector.extract_strided_slice %513 {offsets = [0, 96], sizes = [8, 32], strides = [1, 1]} : vector<8x128xf32> to vector<8x32xf32>
    %cst_169 = arith.constant 5.000000e-01 : f32
    %526 = vector.broadcast %cst_169 : f32 to vector<8x32xf32>
    %527 = arith.mulf %526, %525 : vector<8x32xf32>
    %cst_170 = arith.constant 5.000000e-01 : f32
    %528 = vector.broadcast %cst_170 : f32 to vector<8x32xf32>
    %529 = arith.addf %527, %528 : vector<8x32xf32>
    %530 = arith.mulf %523, %478 : vector<8x32xf32>
    %531 = arith.mulf %518, %524 : vector<8x32xf32>
    %532 = arith.addf %530, %531 : vector<8x32xf32>
    %533 = math.tanh %532 : vector<8x32xf32>
    %534 = arith.mulf %529, %533 : vector<8x32xf32>
    %535 = arith.truncf %534 : vector<8x32xf32> to vector<8x32xbf16>
    %cst_171 = arith.constant dense<0.000000e+00> : vector<8x128xf32>
    %536 = tpu.matmul %535, %12, %cst_171 {dimension_numbers = #tpu.dot_dimension_numbers<[1], [0], [0], [1], [0, 0, 1, 1], [], []>} : vector<8x32xbf16>, vector<32x128xbf16>, vector<8x128xf32> -> vector<8x128xf32>
    %537 = arith.truncf %508 : vector<8x32xf32> to vector<8x32xbf16>
    %cst_172 = arith.constant dense<0.000000e+00> : vector<8x128xf32>
    %538 = tpu.matmul %537, %13, %cst_172 {dimension_numbers = #tpu.dot_dimension_numbers<[1], [0], [0], [1], [0, 0, 1, 1], [], []>} : vector<8x32xbf16>, vector<32x128xbf16>, vector<8x128xf32> -> vector<8x128xf32>
    %539 = arith.addf %538, %22 : vector<8x128xf32>
    %540 = arith.addf %536, %539 : vector<8x128xf32>
    %541 = math.tanh %540 : vector<8x128xf32>
    %542 = vector.extract_strided_slice %541 {offsets = [0, 0], sizes = [8, 32], strides = [1, 1]} : vector<8x128xf32> to vector<8x32xf32>
    %cst_173 = arith.constant 5.000000e-01 : f32
    %543 = vector.broadcast %cst_173 : f32 to vector<8x32xf32>
    %544 = arith.mulf %543, %542 : vector<8x32xf32>
    %cst_174 = arith.constant 5.000000e-01 : f32
    %545 = vector.broadcast %cst_174 : f32 to vector<8x32xf32>
    %546 = arith.addf %544, %545 : vector<8x32xf32>
    %547 = vector.extract_strided_slice %541 {offsets = [0, 32], sizes = [8, 32], strides = [1, 1]} : vector<8x128xf32> to vector<8x32xf32>
    %cst_175 = arith.constant 5.000000e-01 : f32
    %548 = vector.broadcast %cst_175 : f32 to vector<8x32xf32>
    %549 = arith.mulf %548, %547 : vector<8x32xf32>
    %cst_176 = arith.constant 5.000000e-01 : f32
    %550 = vector.broadcast %cst_176 : f32 to vector<8x32xf32>
    %551 = arith.addf %549, %550 : vector<8x32xf32>
    %552 = vector.extract_strided_slice %541 {offsets = [0, 64], sizes = [8, 32], strides = [1, 1]} : vector<8x128xf32> to vector<8x32xf32>
    %553 = vector.extract_strided_slice %541 {offsets = [0, 96], sizes = [8, 32], strides = [1, 1]} : vector<8x128xf32> to vector<8x32xf32>
    %cst_177 = arith.constant 5.000000e-01 : f32
    %554 = vector.broadcast %cst_177 : f32 to vector<8x32xf32>
    %555 = arith.mulf %554, %553 : vector<8x32xf32>
    %cst_178 = arith.constant 5.000000e-01 : f32
    %556 = vector.broadcast %cst_178 : f32 to vector<8x32xf32>
    %557 = arith.addf %555, %556 : vector<8x32xf32>
    %558 = arith.mulf %551, %506 : vector<8x32xf32>
    %559 = arith.mulf %546, %552 : vector<8x32xf32>
    %560 = arith.addf %558, %559 : vector<8x32xf32>
    %561 = math.tanh %560 : vector<8x32xf32>
    %562 = arith.mulf %557, %561 : vector<8x32xf32>
    %c72 = arith.constant 72 : index
    %c0_179 = arith.constant 0 : index
    %563 = vector.load %arg10[%c72, %c0_179] : memref<128x32xf32, #tpu.memory_space<vmem>>, vector<8x32xf32>
    tpu.vector_store %arg10[%c72, %c0_179], %562 {strides = array<i32>} : memref<128x32xf32, #tpu.memory_space<vmem>>, vector<8x32xf32>,
    %564 = arith.truncf %534 : vector<8x32xf32> to vector<8x32xbf16>
    %cst_180 = arith.constant dense<0.000000e+00> : vector<8x128xf32>
    %565 = tpu.matmul %564, %11, %cst_180 {dimension_numbers = #tpu.dot_dimension_numbers<[1], [0], [0], [1], [0, 0, 1, 1], [], []>} : vector<8x32xbf16>, vector<32x128xbf16>, vector<8x128xf32> -> vector<8x128xf32>
    %566 = arith.addf %19, %565 : vector<8x128xf32>
    %567 = math.tanh %566 : vector<8x128xf32>
    %568 = vector.extract_strided_slice %567 {offsets = [0, 0], sizes = [8, 32], strides = [1, 1]} : vector<8x128xf32> to vector<8x32xf32>
    %cst_181 = arith.constant 5.000000e-01 : f32
    %569 = vector.broadcast %cst_181 : f32 to vector<8x32xf32>
    %570 = arith.mulf %569, %568 : vector<8x32xf32>
    %cst_182 = arith.constant 5.000000e-01 : f32
    %571 = vector.broadcast %cst_182 : f32 to vector<8x32xf32>
    %572 = arith.addf %570, %571 : vector<8x32xf32>
    %573 = vector.extract_strided_slice %567 {offsets = [0, 32], sizes = [8, 32], strides = [1, 1]} : vector<8x128xf32> to vector<8x32xf32>
    %cst_183 = arith.constant 5.000000e-01 : f32
    %574 = vector.broadcast %cst_183 : f32 to vector<8x32xf32>
    %575 = arith.mulf %574, %573 : vector<8x32xf32>
    %cst_184 = arith.constant 5.000000e-01 : f32
    %576 = vector.broadcast %cst_184 : f32 to vector<8x32xf32>
    %577 = arith.addf %575, %576 : vector<8x32xf32>
    %578 = vector.extract_strided_slice %567 {offsets = [0, 64], sizes = [8, 32], strides = [1, 1]} : vector<8x128xf32> to vector<8x32xf32>
    %579 = vector.extract_strided_slice %567 {offsets = [0, 96], sizes = [8, 32], strides = [1, 1]} : vector<8x128xf32> to vector<8x32xf32>
    %cst_185 = arith.constant 5.000000e-01 : f32
    %580 = vector.broadcast %cst_185 : f32 to vector<8x32xf32>
    %581 = arith.mulf %580, %579 : vector<8x32xf32>
    %cst_186 = arith.constant 5.000000e-01 : f32
    %582 = vector.broadcast %cst_186 : f32 to vector<8x32xf32>
    %583 = arith.addf %581, %582 : vector<8x32xf32>
    %584 = arith.mulf %577, %532 : vector<8x32xf32>
    %585 = arith.mulf %572, %578 : vector<8x32xf32>
    %586 = arith.addf %584, %585 : vector<8x32xf32>
    %587 = math.tanh %586 : vector<8x32xf32>
    %588 = arith.mulf %583, %587 : vector<8x32xf32>
    %589 = arith.truncf %588 : vector<8x32xf32> to vector<8x32xbf16>
    %cst_187 = arith.constant dense<0.000000e+00> : vector<8x128xf32>
    %590 = tpu.matmul %589, %12, %cst_187 {dimension_numbers = #tpu.dot_dimension_numbers<[1], [0], [0], [1], [0, 0, 1, 1], [], []>} : vector<8x32xbf16>, vector<32x128xbf16>, vector<8x128xf32> -> vector<8x128xf32>
    %591 = arith.truncf %562 : vector<8x32xf32> to vector<8x32xbf16>
    %cst_188 = arith.constant dense<0.000000e+00> : vector<8x128xf32>
    %592 = tpu.matmul %591, %13, %cst_188 {dimension_numbers = #tpu.dot_dimension_numbers<[1], [0], [0], [1], [0, 0, 1, 1], [], []>} : vector<8x32xbf16>, vector<32x128xbf16>, vector<8x128xf32> -> vector<8x128xf32>
    %593 = arith.addf %592, %22 : vector<8x128xf32>
    %594 = arith.addf %590, %593 : vector<8x128xf32>
    %595 = math.tanh %594 : vector<8x128xf32>
    %596 = vector.extract_strided_slice %595 {offsets = [0, 0], sizes = [8, 32], strides = [1, 1]} : vector<8x128xf32> to vector<8x32xf32>
    %cst_189 = arith.constant 5.000000e-01 : f32
    %597 = vector.broadcast %cst_189 : f32 to vector<8x32xf32>
    %598 = arith.mulf %597, %596 : vector<8x32xf32>
    %cst_190 = arith.constant 5.000000e-01 : f32
    %599 = vector.broadcast %cst_190 : f32 to vector<8x32xf32>
    %600 = arith.addf %598, %599 : vector<8x32xf32>
    %601 = vector.extract_strided_slice %595 {offsets = [0, 32], sizes = [8, 32], strides = [1, 1]} : vector<8x128xf32> to vector<8x32xf32>
    %cst_191 = arith.constant 5.000000e-01 : f32
    %602 = vector.broadcast %cst_191 : f32 to vector<8x32xf32>
    %603 = arith.mulf %602, %601 : vector<8x32xf32>
    %cst_192 = arith.constant 5.000000e-01 : f32
    %604 = vector.broadcast %cst_192 : f32 to vector<8x32xf32>
    %605 = arith.addf %603, %604 : vector<8x32xf32>
    %606 = vector.extract_strided_slice %595 {offsets = [0, 64], sizes = [8, 32], strides = [1, 1]} : vector<8x128xf32> to vector<8x32xf32>
    %607 = vector.extract_strided_slice %595 {offsets = [0, 96], sizes = [8, 32], strides = [1, 1]} : vector<8x128xf32> to vector<8x32xf32>
    %cst_193 = arith.constant 5.000000e-01 : f32
    %608 = vector.broadcast %cst_193 : f32 to vector<8x32xf32>
    %609 = arith.mulf %608, %607 : vector<8x32xf32>
    %cst_194 = arith.constant 5.000000e-01 : f32
    %610 = vector.broadcast %cst_194 : f32 to vector<8x32xf32>
    %611 = arith.addf %609, %610 : vector<8x32xf32>
    %612 = arith.mulf %605, %560 : vector<8x32xf32>
    %613 = arith.mulf %600, %606 : vector<8x32xf32>
    %614 = arith.addf %612, %613 : vector<8x32xf32>
    %615 = math.tanh %614 : vector<8x32xf32>
    %616 = arith.mulf %611, %615 : vector<8x32xf32>
    %c80 = arith.constant 80 : index
    %c0_195 = arith.constant 0 : index
    %617 = vector.load %arg10[%c80, %c0_195] : memref<128x32xf32, #tpu.memory_space<vmem>>, vector<8x32xf32>
    tpu.vector_store %arg10[%c80, %c0_195], %616 {strides = array<i32>} : memref<128x32xf32, #tpu.memory_space<vmem>>, vector<8x32xf32>,
    %618 = arith.truncf %588 : vector<8x32xf32> to vector<8x32xbf16>
    %cst_196 = arith.constant dense<0.000000e+00> : vector<8x128xf32>
    %619 = tpu.matmul %618, %11, %cst_196 {dimension_numbers = #tpu.dot_dimension_numbers<[1], [0], [0], [1], [0, 0, 1, 1], [], []>} : vector<8x32xbf16>, vector<32x128xbf16>, vector<8x128xf32> -> vector<8x128xf32>
    %620 = arith.addf %19, %619 : vector<8x128xf32>
    %621 = math.tanh %620 : vector<8x128xf32>
    %622 = vector.extract_strided_slice %621 {offsets = [0, 0], sizes = [8, 32], strides = [1, 1]} : vector<8x128xf32> to vector<8x32xf32>
    %cst_197 = arith.constant 5.000000e-01 : f32
    %623 = vector.broadcast %cst_197 : f32 to vector<8x32xf32>
    %624 = arith.mulf %623, %622 : vector<8x32xf32>
    %cst_198 = arith.constant 5.000000e-01 : f32
    %625 = vector.broadcast %cst_198 : f32 to vector<8x32xf32>
    %626 = arith.addf %624, %625 : vector<8x32xf32>
    %627 = vector.extract_strided_slice %621 {offsets = [0, 32], sizes = [8, 32], strides = [1, 1]} : vector<8x128xf32> to vector<8x32xf32>
    %cst_199 = arith.constant 5.000000e-01 : f32
    %628 = vector.broadcast %cst_199 : f32 to vector<8x32xf32>
    %629 = arith.mulf %628, %627 : vector<8x32xf32>
    %cst_200 = arith.constant 5.000000e-01 : f32
    %630 = vector.broadcast %cst_200 : f32 to vector<8x32xf32>
    %631 = arith.addf %629, %630 : vector<8x32xf32>
    %632 = vector.extract_strided_slice %621 {offsets = [0, 64], sizes = [8, 32], strides = [1, 1]} : vector<8x128xf32> to vector<8x32xf32>
    %633 = vector.extract_strided_slice %621 {offsets = [0, 96], sizes = [8, 32], strides = [1, 1]} : vector<8x128xf32> to vector<8x32xf32>
    %cst_201 = arith.constant 5.000000e-01 : f32
    %634 = vector.broadcast %cst_201 : f32 to vector<8x32xf32>
    %635 = arith.mulf %634, %633 : vector<8x32xf32>
    %cst_202 = arith.constant 5.000000e-01 : f32
    %636 = vector.broadcast %cst_202 : f32 to vector<8x32xf32>
    %637 = arith.addf %635, %636 : vector<8x32xf32>
    %638 = arith.mulf %631, %586 : vector<8x32xf32>
    %639 = arith.mulf %626, %632 : vector<8x32xf32>
    %640 = arith.addf %638, %639 : vector<8x32xf32>
    %641 = math.tanh %640 : vector<8x32xf32>
    %642 = arith.mulf %637, %641 : vector<8x32xf32>
    %643 = arith.truncf %642 : vector<8x32xf32> to vector<8x32xbf16>
    %cst_203 = arith.constant dense<0.000000e+00> : vector<8x128xf32>
    %644 = tpu.matmul %643, %12, %cst_203 {dimension_numbers = #tpu.dot_dimension_numbers<[1], [0], [0], [1], [0, 0, 1, 1], [], []>} : vector<8x32xbf16>, vector<32x128xbf16>, vector<8x128xf32> -> vector<8x128xf32>
    %645 = arith.truncf %616 : vector<8x32xf32> to vector<8x32xbf16>
    %cst_204 = arith.constant dense<0.000000e+00> : vector<8x128xf32>
    %646 = tpu.matmul %645, %13, %cst_204 {dimension_numbers = #tpu.dot_dimension_numbers<[1], [0], [0], [1], [0, 0, 1, 1], [], []>} : vector<8x32xbf16>, vector<32x128xbf16>, vector<8x128xf32> -> vector<8x128xf32>
    %647 = arith.addf %646, %22 : vector<8x128xf32>
    %648 = arith.addf %644, %647 : vector<8x128xf32>
    %649 = math.tanh %648 : vector<8x128xf32>
    %650 = vector.extract_strided_slice %649 {offsets = [0, 0], sizes = [8, 32], strides = [1, 1]} : vector<8x128xf32> to vector<8x32xf32>
    %cst_205 = arith.constant 5.000000e-01 : f32
    %651 = vector.broadcast %cst_205 : f32 to vector<8x32xf32>
    %652 = arith.mulf %651, %650 : vector<8x32xf32>
    %cst_206 = arith.constant 5.000000e-01 : f32
    %653 = vector.broadcast %cst_206 : f32 to vector<8x32xf32>
    %654 = arith.addf %652, %653 : vector<8x32xf32>
    %655 = vector.extract_strided_slice %649 {offsets = [0, 32], sizes = [8, 32], strides = [1, 1]} : vector<8x128xf32> to vector<8x32xf32>
    %cst_207 = arith.constant 5.000000e-01 : f32
    %656 = vector.broadcast %cst_207 : f32 to vector<8x32xf32>
    %657 = arith.mulf %656, %655 : vector<8x32xf32>
    %cst_208 = arith.constant 5.000000e-01 : f32
    %658 = vector.broadcast %cst_208 : f32 to vector<8x32xf32>
    %659 = arith.addf %657, %658 : vector<8x32xf32>
    %660 = vector.extract_strided_slice %649 {offsets = [0, 64], sizes = [8, 32], strides = [1, 1]} : vector<8x128xf32> to vector<8x32xf32>
    %661 = vector.extract_strided_slice %649 {offsets = [0, 96], sizes = [8, 32], strides = [1, 1]} : vector<8x128xf32> to vector<8x32xf32>
    %cst_209 = arith.constant 5.000000e-01 : f32
    %662 = vector.broadcast %cst_209 : f32 to vector<8x32xf32>
    %663 = arith.mulf %662, %661 : vector<8x32xf32>
    %cst_210 = arith.constant 5.000000e-01 : f32
    %664 = vector.broadcast %cst_210 : f32 to vector<8x32xf32>
    %665 = arith.addf %663, %664 : vector<8x32xf32>
    %666 = arith.mulf %659, %614 : vector<8x32xf32>
    %667 = arith.mulf %654, %660 : vector<8x32xf32>
    %668 = arith.addf %666, %667 : vector<8x32xf32>
    %669 = math.tanh %668 : vector<8x32xf32>
    %670 = arith.mulf %665, %669 : vector<8x32xf32>
    %c88 = arith.constant 88 : index
    %c0_211 = arith.constant 0 : index
    %671 = vector.load %arg10[%c88, %c0_211] : memref<128x32xf32, #tpu.memory_space<vmem>>, vector<8x32xf32>
    tpu.vector_store %arg10[%c88, %c0_211], %670 {strides = array<i32>} : memref<128x32xf32, #tpu.memory_space<vmem>>, vector<8x32xf32>,
    %672 = arith.truncf %642 : vector<8x32xf32> to vector<8x32xbf16>
    %cst_212 = arith.constant dense<0.000000e+00> : vector<8x128xf32>
    %673 = tpu.matmul %672, %11, %cst_212 {dimension_numbers = #tpu.dot_dimension_numbers<[1], [0], [0], [1], [0, 0, 1, 1], [], []>} : vector<8x32xbf16>, vector<32x128xbf16>, vector<8x128xf32> -> vector<8x128xf32>
    %674 = arith.addf %19, %673 : vector<8x128xf32>
    %675 = math.tanh %674 : vector<8x128xf32>
    %676 = vector.extract_strided_slice %675 {offsets = [0, 0], sizes = [8, 32], strides = [1, 1]} : vector<8x128xf32> to vector<8x32xf32>
    %cst_213 = arith.constant 5.000000e-01 : f32
    %677 = vector.broadcast %cst_213 : f32 to vector<8x32xf32>
    %678 = arith.mulf %677, %676 : vector<8x32xf32>
    %cst_214 = arith.constant 5.000000e-01 : f32
    %679 = vector.broadcast %cst_214 : f32 to vector<8x32xf32>
    %680 = arith.addf %678, %679 : vector<8x32xf32>
    %681 = vector.extract_strided_slice %675 {offsets = [0, 32], sizes = [8, 32], strides = [1, 1]} : vector<8x128xf32> to vector<8x32xf32>
    %cst_215 = arith.constant 5.000000e-01 : f32
    %682 = vector.broadcast %cst_215 : f32 to vector<8x32xf32>
    %683 = arith.mulf %682, %681 : vector<8x32xf32>
    %cst_216 = arith.constant 5.000000e-01 : f32
    %684 = vector.broadcast %cst_216 : f32 to vector<8x32xf32>
    %685 = arith.addf %683, %684 : vector<8x32xf32>
    %686 = vector.extract_strided_slice %675 {offsets = [0, 64], sizes = [8, 32], strides = [1, 1]} : vector<8x128xf32> to vector<8x32xf32>
    %687 = vector.extract_strided_slice %675 {offsets = [0, 96], sizes = [8, 32], strides = [1, 1]} : vector<8x128xf32> to vector<8x32xf32>
    %cst_217 = arith.constant 5.000000e-01 : f32
    %688 = vector.broadcast %cst_217 : f32 to vector<8x32xf32>
    %689 = arith.mulf %688, %687 : vector<8x32xf32>
    %cst_218 = arith.constant 5.000000e-01 : f32
    %690 = vector.broadcast %cst_218 : f32 to vector<8x32xf32>
    %691 = arith.addf %689, %690 : vector<8x32xf32>
    %692 = arith.mulf %685, %640 : vector<8x32xf32>
    %693 = arith.mulf %680, %686 : vector<8x32xf32>
    %694 = arith.addf %692, %693 : vector<8x32xf32>
    %695 = math.tanh %694 : vector<8x32xf32>
    %696 = arith.mulf %691, %695 : vector<8x32xf32>
    %697 = arith.truncf %696 : vector<8x32xf32> to vector<8x32xbf16>
    %cst_219 = arith.constant dense<0.000000e+00> : vector<8x128xf32>
    %698 = tpu.matmul %697, %12, %cst_219 {dimension_numbers = #tpu.dot_dimension_numbers<[1], [0], [0], [1], [0, 0, 1, 1], [], []>} : vector<8x32xbf16>, vector<32x128xbf16>, vector<8x128xf32> -> vector<8x128xf32>
    %699 = arith.truncf %670 : vector<8x32xf32> to vector<8x32xbf16>
    %cst_220 = arith.constant dense<0.000000e+00> : vector<8x128xf32>
    %700 = tpu.matmul %699, %13, %cst_220 {dimension_numbers = #tpu.dot_dimension_numbers<[1], [0], [0], [1], [0, 0, 1, 1], [], []>} : vector<8x32xbf16>, vector<32x128xbf16>, vector<8x128xf32> -> vector<8x128xf32>
    %701 = arith.addf %700, %22 : vector<8x128xf32>
    %702 = arith.addf %698, %701 : vector<8x128xf32>
    %703 = math.tanh %702 : vector<8x128xf32>
    %704 = vector.extract_strided_slice %703 {offsets = [0, 0], sizes = [8, 32], strides = [1, 1]} : vector<8x128xf32> to vector<8x32xf32>
    %cst_221 = arith.constant 5.000000e-01 : f32
    %705 = vector.broadcast %cst_221 : f32 to vector<8x32xf32>
    %706 = arith.mulf %705, %704 : vector<8x32xf32>
    %cst_222 = arith.constant 5.000000e-01 : f32
    %707 = vector.broadcast %cst_222 : f32 to vector<8x32xf32>
    %708 = arith.addf %706, %707 : vector<8x32xf32>
    %709 = vector.extract_strided_slice %703 {offsets = [0, 32], sizes = [8, 32], strides = [1, 1]} : vector<8x128xf32> to vector<8x32xf32>
    %cst_223 = arith.constant 5.000000e-01 : f32
    %710 = vector.broadcast %cst_223 : f32 to vector<8x32xf32>
    %711 = arith.mulf %710, %709 : vector<8x32xf32>
    %cst_224 = arith.constant 5.000000e-01 : f32
    %712 = vector.broadcast %cst_224 : f32 to vector<8x32xf32>
    %713 = arith.addf %711, %712 : vector<8x32xf32>
    %714 = vector.extract_strided_slice %703 {offsets = [0, 64], sizes = [8, 32], strides = [1, 1]} : vector<8x128xf32> to vector<8x32xf32>
    %715 = vector.extract_strided_slice %703 {offsets = [0, 96], sizes = [8, 32], strides = [1, 1]} : vector<8x128xf32> to vector<8x32xf32>
    %cst_225 = arith.constant 5.000000e-01 : f32
    %716 = vector.broadcast %cst_225 : f32 to vector<8x32xf32>
    %717 = arith.mulf %716, %715 : vector<8x32xf32>
    %cst_226 = arith.constant 5.000000e-01 : f32
    %718 = vector.broadcast %cst_226 : f32 to vector<8x32xf32>
    %719 = arith.addf %717, %718 : vector<8x32xf32>
    %720 = arith.mulf %713, %668 : vector<8x32xf32>
    %721 = arith.mulf %708, %714 : vector<8x32xf32>
    %722 = arith.addf %720, %721 : vector<8x32xf32>
    %723 = math.tanh %722 : vector<8x32xf32>
    %724 = arith.mulf %719, %723 : vector<8x32xf32>
    %c96_227 = arith.constant 96 : index
    %c0_228 = arith.constant 0 : index
    %725 = vector.load %arg10[%c96_227, %c0_228] : memref<128x32xf32, #tpu.memory_space<vmem>>, vector<8x32xf32>
    tpu.vector_store %arg10[%c96_227, %c0_228], %724 {strides = array<i32>} : memref<128x32xf32, #tpu.memory_space<vmem>>, vector<8x32xf32>,
    %726 = arith.truncf %696 : vector<8x32xf32> to vector<8x32xbf16>
    %cst_229 = arith.constant dense<0.000000e+00> : vector<8x128xf32>
    %727 = tpu.matmul %726, %11, %cst_229 {dimension_numbers = #tpu.dot_dimension_numbers<[1], [0], [0], [1], [0, 0, 1, 1], [], []>} : vector<8x32xbf16>, vector<32x128xbf16>, vector<8x128xf32> -> vector<8x128xf32>
    %728 = arith.addf %19, %727 : vector<8x128xf32>
    %729 = math.tanh %728 : vector<8x128xf32>
    %730 = vector.extract_strided_slice %729 {offsets = [0, 0], sizes = [8, 32], strides = [1, 1]} : vector<8x128xf32> to vector<8x32xf32>
    %cst_230 = arith.constant 5.000000e-01 : f32
    %731 = vector.broadcast %cst_230 : f32 to vector<8x32xf32>
    %732 = arith.mulf %731, %730 : vector<8x32xf32>
    %cst_231 = arith.constant 5.000000e-01 : f32
    %733 = vector.broadcast %cst_231 : f32 to vector<8x32xf32>
    %734 = arith.addf %732, %733 : vector<8x32xf32>
    %735 = vector.extract_strided_slice %729 {offsets = [0, 32], sizes = [8, 32], strides = [1, 1]} : vector<8x128xf32> to vector<8x32xf32>
    %cst_232 = arith.constant 5.000000e-01 : f32
    %736 = vector.broadcast %cst_232 : f32 to vector<8x32xf32>
    %737 = arith.mulf %736, %735 : vector<8x32xf32>
    %cst_233 = arith.constant 5.000000e-01 : f32
    %738 = vector.broadcast %cst_233 : f32 to vector<8x32xf32>
    %739 = arith.addf %737, %738 : vector<8x32xf32>
    %740 = vector.extract_strided_slice %729 {offsets = [0, 64], sizes = [8, 32], strides = [1, 1]} : vector<8x128xf32> to vector<8x32xf32>
    %741 = vector.extract_strided_slice %729 {offsets = [0, 96], sizes = [8, 32], strides = [1, 1]} : vector<8x128xf32> to vector<8x32xf32>
    %cst_234 = arith.constant 5.000000e-01 : f32
    %742 = vector.broadcast %cst_234 : f32 to vector<8x32xf32>
    %743 = arith.mulf %742, %741 : vector<8x32xf32>
    %cst_235 = arith.constant 5.000000e-01 : f32
    %744 = vector.broadcast %cst_235 : f32 to vector<8x32xf32>
    %745 = arith.addf %743, %744 : vector<8x32xf32>
    %746 = arith.mulf %739, %694 : vector<8x32xf32>
    %747 = arith.mulf %734, %740 : vector<8x32xf32>
    %748 = arith.addf %746, %747 : vector<8x32xf32>
    %749 = math.tanh %748 : vector<8x32xf32>
    %750 = arith.mulf %745, %749 : vector<8x32xf32>
    %751 = arith.truncf %750 : vector<8x32xf32> to vector<8x32xbf16>
    %cst_236 = arith.constant dense<0.000000e+00> : vector<8x128xf32>
    %752 = tpu.matmul %751, %12, %cst_236 {dimension_numbers = #tpu.dot_dimension_numbers<[1], [0], [0], [1], [0, 0, 1, 1], [], []>} : vector<8x32xbf16>, vector<32x128xbf16>, vector<8x128xf32> -> vector<8x128xf32>
    %753 = arith.truncf %724 : vector<8x32xf32> to vector<8x32xbf16>
    %cst_237 = arith.constant dense<0.000000e+00> : vector<8x128xf32>
    %754 = tpu.matmul %753, %13, %cst_237 {dimension_numbers = #tpu.dot_dimension_numbers<[1], [0], [0], [1], [0, 0, 1, 1], [], []>} : vector<8x32xbf16>, vector<32x128xbf16>, vector<8x128xf32> -> vector<8x128xf32>
    %755 = arith.addf %754, %22 : vector<8x128xf32>
    %756 = arith.addf %752, %755 : vector<8x128xf32>
    %757 = math.tanh %756 : vector<8x128xf32>
    %758 = vector.extract_strided_slice %757 {offsets = [0, 0], sizes = [8, 32], strides = [1, 1]} : vector<8x128xf32> to vector<8x32xf32>
    %cst_238 = arith.constant 5.000000e-01 : f32
    %759 = vector.broadcast %cst_238 : f32 to vector<8x32xf32>
    %760 = arith.mulf %759, %758 : vector<8x32xf32>
    %cst_239 = arith.constant 5.000000e-01 : f32
    %761 = vector.broadcast %cst_239 : f32 to vector<8x32xf32>
    %762 = arith.addf %760, %761 : vector<8x32xf32>
    %763 = vector.extract_strided_slice %757 {offsets = [0, 32], sizes = [8, 32], strides = [1, 1]} : vector<8x128xf32> to vector<8x32xf32>
    %cst_240 = arith.constant 5.000000e-01 : f32
    %764 = vector.broadcast %cst_240 : f32 to vector<8x32xf32>
    %765 = arith.mulf %764, %763 : vector<8x32xf32>
    %cst_241 = arith.constant 5.000000e-01 : f32
    %766 = vector.broadcast %cst_241 : f32 to vector<8x32xf32>
    %767 = arith.addf %765, %766 : vector<8x32xf32>
    %768 = vector.extract_strided_slice %757 {offsets = [0, 64], sizes = [8, 32], strides = [1, 1]} : vector<8x128xf32> to vector<8x32xf32>
    %769 = vector.extract_strided_slice %757 {offsets = [0, 96], sizes = [8, 32], strides = [1, 1]} : vector<8x128xf32> to vector<8x32xf32>
    %cst_242 = arith.constant 5.000000e-01 : f32
    %770 = vector.broadcast %cst_242 : f32 to vector<8x32xf32>
    %771 = arith.mulf %770, %769 : vector<8x32xf32>
    %cst_243 = arith.constant 5.000000e-01 : f32
    %772 = vector.broadcast %cst_243 : f32 to vector<8x32xf32>
    %773 = arith.addf %771, %772 : vector<8x32xf32>
    %774 = arith.mulf %767, %722 : vector<8x32xf32>
    %775 = arith.mulf %762, %768 : vector<8x32xf32>
    %776 = arith.addf %774, %775 : vector<8x32xf32>
    %777 = math.tanh %776 : vector<8x32xf32>
    %778 = arith.mulf %773, %777 : vector<8x32xf32>
    %c104 = arith.constant 104 : index
    %c0_244 = arith.constant 0 : index
    %779 = vector.load %arg10[%c104, %c0_244] : memref<128x32xf32, #tpu.memory_space<vmem>>, vector<8x32xf32>
    tpu.vector_store %arg10[%c104, %c0_244], %778 {strides = array<i32>} : memref<128x32xf32, #tpu.memory_space<vmem>>, vector<8x32xf32>,
    %780 = arith.truncf %750 : vector<8x32xf32> to vector<8x32xbf16>
    %cst_245 = arith.constant dense<0.000000e+00> : vector<8x128xf32>
    %781 = tpu.matmul %780, %11, %cst_245 {dimension_numbers = #tpu.dot_dimension_numbers<[1], [0], [0], [1], [0, 0, 1, 1], [], []>} : vector<8x32xbf16>, vector<32x128xbf16>, vector<8x128xf32> -> vector<8x128xf32>
    %782 = arith.addf %19, %781 : vector<8x128xf32>
    %783 = math.tanh %782 : vector<8x128xf32>
    %784 = vector.extract_strided_slice %783 {offsets = [0, 0], sizes = [8, 32], strides = [1, 1]} : vector<8x128xf32> to vector<8x32xf32>
    %cst_246 = arith.constant 5.000000e-01 : f32
    %785 = vector.broadcast %cst_246 : f32 to vector<8x32xf32>
    %786 = arith.mulf %785, %784 : vector<8x32xf32>
    %cst_247 = arith.constant 5.000000e-01 : f32
    %787 = vector.broadcast %cst_247 : f32 to vector<8x32xf32>
    %788 = arith.addf %786, %787 : vector<8x32xf32>
    %789 = vector.extract_strided_slice %783 {offsets = [0, 32], sizes = [8, 32], strides = [1, 1]} : vector<8x128xf32> to vector<8x32xf32>
    %cst_248 = arith.constant 5.000000e-01 : f32
    %790 = vector.broadcast %cst_248 : f32 to vector<8x32xf32>
    %791 = arith.mulf %790, %789 : vector<8x32xf32>
    %cst_249 = arith.constant 5.000000e-01 : f32
    %792 = vector.broadcast %cst_249 : f32 to vector<8x32xf32>
    %793 = arith.addf %791, %792 : vector<8x32xf32>
    %794 = vector.extract_strided_slice %783 {offsets = [0, 64], sizes = [8, 32], strides = [1, 1]} : vector<8x128xf32> to vector<8x32xf32>
    %795 = vector.extract_strided_slice %783 {offsets = [0, 96], sizes = [8, 32], strides = [1, 1]} : vector<8x128xf32> to vector<8x32xf32>
    %cst_250 = arith.constant 5.000000e-01 : f32
    %796 = vector.broadcast %cst_250 : f32 to vector<8x32xf32>
    %797 = arith.mulf %796, %795 : vector<8x32xf32>
    %cst_251 = arith.constant 5.000000e-01 : f32
    %798 = vector.broadcast %cst_251 : f32 to vector<8x32xf32>
    %799 = arith.addf %797, %798 : vector<8x32xf32>
    %800 = arith.mulf %793, %748 : vector<8x32xf32>
    %801 = arith.mulf %788, %794 : vector<8x32xf32>
    %802 = arith.addf %800, %801 : vector<8x32xf32>
    %803 = math.tanh %802 : vector<8x32xf32>
    %804 = arith.mulf %799, %803 : vector<8x32xf32>
    %805 = arith.truncf %804 : vector<8x32xf32> to vector<8x32xbf16>
    %cst_252 = arith.constant dense<0.000000e+00> : vector<8x128xf32>
    %806 = tpu.matmul %805, %12, %cst_252 {dimension_numbers = #tpu.dot_dimension_numbers<[1], [0], [0], [1], [0, 0, 1, 1], [], []>} : vector<8x32xbf16>, vector<32x128xbf16>, vector<8x128xf32> -> vector<8x128xf32>
    %807 = arith.truncf %778 : vector<8x32xf32> to vector<8x32xbf16>
    %cst_253 = arith.constant dense<0.000000e+00> : vector<8x128xf32>
    %808 = tpu.matmul %807, %13, %cst_253 {dimension_numbers = #tpu.dot_dimension_numbers<[1], [0], [0], [1], [0, 0, 1, 1], [], []>} : vector<8x32xbf16>, vector<32x128xbf16>, vector<8x128xf32> -> vector<8x128xf32>
    %809 = arith.addf %808, %22 : vector<8x128xf32>
    %810 = arith.addf %806, %809 : vector<8x128xf32>
    %811 = math.tanh %810 : vector<8x128xf32>
    %812 = vector.extract_strided_slice %811 {offsets = [0, 0], sizes = [8, 32], strides = [1, 1]} : vector<8x128xf32> to vector<8x32xf32>
    %cst_254 = arith.constant 5.000000e-01 : f32
    %813 = vector.broadcast %cst_254 : f32 to vector<8x32xf32>
    %814 = arith.mulf %813, %812 : vector<8x32xf32>
    %cst_255 = arith.constant 5.000000e-01 : f32
    %815 = vector.broadcast %cst_255 : f32 to vector<8x32xf32>
    %816 = arith.addf %814, %815 : vector<8x32xf32>
    %817 = vector.extract_strided_slice %811 {offsets = [0, 32], sizes = [8, 32], strides = [1, 1]} : vector<8x128xf32> to vector<8x32xf32>
    %cst_256 = arith.constant 5.000000e-01 : f32
    %818 = vector.broadcast %cst_256 : f32 to vector<8x32xf32>
    %819 = arith.mulf %818, %817 : vector<8x32xf32>
    %cst_257 = arith.constant 5.000000e-01 : f32
    %820 = vector.broadcast %cst_257 : f32 to vector<8x32xf32>
    %821 = arith.addf %819, %820 : vector<8x32xf32>
    %822 = vector.extract_strided_slice %811 {offsets = [0, 64], sizes = [8, 32], strides = [1, 1]} : vector<8x128xf32> to vector<8x32xf32>
    %823 = vector.extract_strided_slice %811 {offsets = [0, 96], sizes = [8, 32], strides = [1, 1]} : vector<8x128xf32> to vector<8x32xf32>
    %cst_258 = arith.constant 5.000000e-01 : f32
    %824 = vector.broadcast %cst_258 : f32 to vector<8x32xf32>
    %825 = arith.mulf %824, %823 : vector<8x32xf32>
    %cst_259 = arith.constant 5.000000e-01 : f32
    %826 = vector.broadcast %cst_259 : f32 to vector<8x32xf32>
    %827 = arith.addf %825, %826 : vector<8x32xf32>
    %828 = arith.mulf %821, %776 : vector<8x32xf32>
    %829 = arith.mulf %816, %822 : vector<8x32xf32>
    %830 = arith.addf %828, %829 : vector<8x32xf32>
    %831 = math.tanh %830 : vector<8x32xf32>
    %832 = arith.mulf %827, %831 : vector<8x32xf32>
    %c112 = arith.constant 112 : index
    %c0_260 = arith.constant 0 : index
    %833 = vector.load %arg10[%c112, %c0_260] : memref<128x32xf32, #tpu.memory_space<vmem>>, vector<8x32xf32>
    tpu.vector_store %arg10[%c112, %c0_260], %832 {strides = array<i32>} : memref<128x32xf32, #tpu.memory_space<vmem>>, vector<8x32xf32>,
    %834 = arith.truncf %804 : vector<8x32xf32> to vector<8x32xbf16>
    %cst_261 = arith.constant dense<0.000000e+00> : vector<8x128xf32>
    %835 = tpu.matmul %834, %11, %cst_261 {dimension_numbers = #tpu.dot_dimension_numbers<[1], [0], [0], [1], [0, 0, 1, 1], [], []>} : vector<8x32xbf16>, vector<32x128xbf16>, vector<8x128xf32> -> vector<8x128xf32>
    %836 = arith.addf %19, %835 : vector<8x128xf32>
    %837 = math.tanh %836 : vector<8x128xf32>
    %838 = vector.extract_strided_slice %837 {offsets = [0, 0], sizes = [8, 32], strides = [1, 1]} : vector<8x128xf32> to vector<8x32xf32>
    %cst_262 = arith.constant 5.000000e-01 : f32
    %839 = vector.broadcast %cst_262 : f32 to vector<8x32xf32>
    %840 = arith.mulf %839, %838 : vector<8x32xf32>
    %cst_263 = arith.constant 5.000000e-01 : f32
    %841 = vector.broadcast %cst_263 : f32 to vector<8x32xf32>
    %842 = arith.addf %840, %841 : vector<8x32xf32>
    %843 = vector.extract_strided_slice %837 {offsets = [0, 32], sizes = [8, 32], strides = [1, 1]} : vector<8x128xf32> to vector<8x32xf32>
    %cst_264 = arith.constant 5.000000e-01 : f32
    %844 = vector.broadcast %cst_264 : f32 to vector<8x32xf32>
    %845 = arith.mulf %844, %843 : vector<8x32xf32>
    %cst_265 = arith.constant 5.000000e-01 : f32
    %846 = vector.broadcast %cst_265 : f32 to vector<8x32xf32>
    %847 = arith.addf %845, %846 : vector<8x32xf32>
    %848 = vector.extract_strided_slice %837 {offsets = [0, 64], sizes = [8, 32], strides = [1, 1]} : vector<8x128xf32> to vector<8x32xf32>
    %849 = vector.extract_strided_slice %837 {offsets = [0, 96], sizes = [8, 32], strides = [1, 1]} : vector<8x128xf32> to vector<8x32xf32>
    %cst_266 = arith.constant 5.000000e-01 : f32
    %850 = vector.broadcast %cst_266 : f32 to vector<8x32xf32>
    %851 = arith.mulf %850, %849 : vector<8x32xf32>
    %cst_267 = arith.constant 5.000000e-01 : f32
    %852 = vector.broadcast %cst_267 : f32 to vector<8x32xf32>
    %853 = arith.addf %851, %852 : vector<8x32xf32>
    %854 = arith.mulf %847, %802 : vector<8x32xf32>
    %855 = arith.mulf %842, %848 : vector<8x32xf32>
    %856 = arith.addf %854, %855 : vector<8x32xf32>
    %857 = math.tanh %856 : vector<8x32xf32>
    %858 = arith.mulf %853, %857 : vector<8x32xf32>
    %859 = arith.truncf %858 : vector<8x32xf32> to vector<8x32xbf16>
    %cst_268 = arith.constant dense<0.000000e+00> : vector<8x128xf32>
    %860 = tpu.matmul %859, %12, %cst_268 {dimension_numbers = #tpu.dot_dimension_numbers<[1], [0], [0], [1], [0, 0, 1, 1], [], []>} : vector<8x32xbf16>, vector<32x128xbf16>, vector<8x128xf32> -> vector<8x128xf32>
    %861 = arith.truncf %832 : vector<8x32xf32> to vector<8x32xbf16>
    %cst_269 = arith.constant dense<0.000000e+00> : vector<8x128xf32>
    %862 = tpu.matmul %861, %13, %cst_269 {dimension_numbers = #tpu.dot_dimension_numbers<[1], [0], [0], [1], [0, 0, 1, 1], [], []>} : vector<8x32xbf16>, vector<32x128xbf16>, vector<8x128xf32> -> vector<8x128xf32>
    %863 = arith.addf %862, %22 : vector<8x128xf32>
    %864 = arith.addf %860, %863 : vector<8x128xf32>
    %865 = math.tanh %864 : vector<8x128xf32>
    %866 = vector.extract_strided_slice %865 {offsets = [0, 0], sizes = [8, 32], strides = [1, 1]} : vector<8x128xf32> to vector<8x32xf32>
    %cst_270 = arith.constant 5.000000e-01 : f32
    %867 = vector.broadcast %cst_270 : f32 to vector<8x32xf32>
    %868 = arith.mulf %867, %866 : vector<8x32xf32>
    %cst_271 = arith.constant 5.000000e-01 : f32
    %869 = vector.broadcast %cst_271 : f32 to vector<8x32xf32>
    %870 = arith.addf %868, %869 : vector<8x32xf32>
    %871 = vector.extract_strided_slice %865 {offsets = [0, 32], sizes = [8, 32], strides = [1, 1]} : vector<8x128xf32> to vector<8x32xf32>
    %cst_272 = arith.constant 5.000000e-01 : f32
    %872 = vector.broadcast %cst_272 : f32 to vector<8x32xf32>
    %873 = arith.mulf %872, %871 : vector<8x32xf32>
    %cst_273 = arith.constant 5.000000e-01 : f32
    %874 = vector.broadcast %cst_273 : f32 to vector<8x32xf32>
    %875 = arith.addf %873, %874 : vector<8x32xf32>
    %876 = vector.extract_strided_slice %865 {offsets = [0, 64], sizes = [8, 32], strides = [1, 1]} : vector<8x128xf32> to vector<8x32xf32>
    %877 = vector.extract_strided_slice %865 {offsets = [0, 96], sizes = [8, 32], strides = [1, 1]} : vector<8x128xf32> to vector<8x32xf32>
    %cst_274 = arith.constant 5.000000e-01 : f32
    %878 = vector.broadcast %cst_274 : f32 to vector<8x32xf32>
    %879 = arith.mulf %878, %877 : vector<8x32xf32>
    %cst_275 = arith.constant 5.000000e-01 : f32
    %880 = vector.broadcast %cst_275 : f32 to vector<8x32xf32>
    %881 = arith.addf %879, %880 : vector<8x32xf32>
    %882 = arith.mulf %875, %830 : vector<8x32xf32>
    %883 = arith.mulf %870, %876 : vector<8x32xf32>
    %884 = arith.addf %882, %883 : vector<8x32xf32>
    %885 = math.tanh %884 : vector<8x32xf32>
    %886 = arith.mulf %881, %885 : vector<8x32xf32>
    %c120 = arith.constant 120 : index
    %c0_276 = arith.constant 0 : index
    %887 = vector.load %arg10[%c120, %c0_276] : memref<128x32xf32, #tpu.memory_space<vmem>>, vector<8x32xf32>
    tpu.vector_store %arg10[%c120, %c0_276], %886 {strides = array<i32>} : memref<128x32xf32, #tpu.memory_space<vmem>>, vector<8x32xf32>,
    %c0_277 = arith.constant 0 : index
    %c0_278 = arith.constant 0 : index
    %888 = vector.load %arg10[%c0_277, %c0_278] : memref<128x32xf32, #tpu.memory_space<vmem>>, vector<128x32xf32>
    %c0_279 = arith.constant 0 : index
    %c0_280 = arith.constant 0 : index
    %889 = vector.load %arg5[%c0_279, %c0_280] : memref<16x32xf32, #tpu.memory_space<vmem>>, vector<16x32xf32>
    %cst_281 = arith.constant dense<0.000000e+00> : vector<16x128xf32>
    %890 = tpu.matmul %889, %888, %cst_281 {dimension_numbers = #tpu.dot_dimension_numbers<[1], [1], [0], [0], [0, 0, 1, 0], [], []>} : vector<16x32xf32>, vector<128x32xf32>, vector<16x128xf32> -> vector<16x128xf32>
    %c0_282 = arith.constant 0 : index
    %c0_283 = arith.constant 0 : index
    %891 = vector.load %arg6[%c0_282, %c0_283] : memref<16x1xf32, #tpu.memory_space<vmem>>, vector<16x1xf32>
    %892 = vector.broadcast %891 : vector<16x1xf32> to vector<16x128xf32>
    %893 = arith.addf %890, %892 : vector<16x128xf32>
    %cst_284 = arith.constant 0.000000e+00 : f32
    %894 = vector.broadcast %cst_284 : f32 to vector<16x128xf32>
    %895 = arith.cmpf ogt, %893, %894 : vector<16x128xf32>
    %cst_285 = arith.constant 2.000000e-01 : f32
    %896 = vector.broadcast %cst_285 : f32 to vector<16x128xf32>
    %897 = arith.mulf %896, %893 : vector<16x128xf32>
    %898 = arith.select %895, %893, %897 : vector<16x128xi1>, vector<16x128xf32>
    %c0_286 = arith.constant 0 : index
    %c0_287 = arith.constant 0 : index
    %899 = vector.load %arg7[%c0_286, %c0_287] : memref<1x16xf32, #tpu.memory_space<vmem>>, vector<1x16xf32>
    %cst_288 = arith.constant dense<0.000000e+00> : vector<1x128xf32>
    %900 = tpu.matmul %899, %898, %cst_288 {dimension_numbers = #tpu.dot_dimension_numbers<[1], [0], [0], [1], [0, 0, 1, 1], [], []>} : vector<1x16xf32>, vector<16x128xf32>, vector<1x128xf32> -> vector<1x128xf32>
    %c0_289 = arith.constant 0 : index
    %c0_290 = arith.constant 0 : index
    %901 = vector.load %arg8[%c0_289, %c0_290] : memref<1x1xf32, #tpu.memory_space<vmem>>, vector<1x1xf32>
    %902 = vector.broadcast %901 : vector<1x1xf32> to vector<1x128xf32>
    %903 = arith.addf %900, %902 : vector<1x128xf32>
    %904 = math.tanh %903 : vector<1x128xf32>
    %c0_291 = arith.constant 0 : index
    %c0_292 = arith.constant 0 : index
    %905 = vector.load %arg9[%c0_291, %c0_292] : memref<1x128xf32, #tpu.memory_space<vmem>>, vector<1x128xf32>
    tpu.vector_store %arg9[%c0_291, %c0_292], %904 {strides = array<i32>} : memref<1x128xf32, #tpu.memory_space<vmem>>, vector<1x128xf32>,
    return
  }
}

</mosaic_0001>

<bundles_post_ra>
// kernel: tpu_custom_call.1
= control target key start
LH: loop header
LB: loop body
LE: loop exit
PB: predicated region body
PF: predicated region fallthrough
CT: control target
= control target key end

     0   :  { %s5210_s0 = inlined_call_operand.vmem [shape: f32[8,8], index: 0, kind: input, shape index: {}]   ;;  %s5211_s1 = inlined_call_operand.hbm [shape: f32[8,32], index: 1, kind: input, shape index: {}]   ;;  %s5212_s2 = inlined_call_operand.vmem [shape: f32[1,32], index: 2, kind: input, shape index: {}]   ;;  %s5213_s3 = inlined_call_operand.hbm [shape: bf16[128,128], index: 3, kind: input, shape index: {}]   ;;  %s5214_s4 = inlined_call_operand.vmem [shape: f32[2,128], index: 4, kind: input, shape index: {}]   ;;  %s5215_s5 = inlined_call_operand.vmem [shape: f32[16,32], index: 5, kind: input, shape index: {}]   ;;  %s5216_s6 = inlined_call_operand.vmem [shape: f32[16,1], index: 6, kind: input, shape index: {}]   ;;  %s5217_s7 = inlined_call_operand.vmem [shape: f32[1,16], index: 7, kind: input, shape index: {}]   ;;  %s5218_s8 = inlined_call_operand.<no memory space> [shape: f32[1,1], index: 8, kind: input, shape index: {}]   ;;  %s5219_s9 = inlined_call_operand.hbm [shape: f32[1,128], index: 9, kind: output, shape index: {}]  }
   0x1   :  { %v14_v0 = vstv %s5218_s8 }
   0x2   :  { %15 = vst [vmem:[#allocation3] sm:$0x1] %v14_v0 }
   0x3   :  { %16 = vsyncpa [#allocation5], 0 }
   0x4   :  { %17 = vsyncpa [#allocation8], 0 }
   0x5   :  { %18 = vsyncpa [#allocation6], 0  ;;  %s4320_s11 = smov [#allocation4]   ;;  %s4321_s13 = smov [#allocation7]  }
   0x6   :  { %s27_s12 = sshll.u32 %s4320_s11, 4  ;;  %s38_s14 = sshll.u32 %s4321_s13, 4  ;;  %s28_s12 = int_to_ptr.vmem [resolvable:$true] %s27_s12  ;;  %s39_s14 = int_to_ptr.vmem [resolvable:$true] %s38_s14 }
   0x7   :  { %s4262_s15 = scalar_lea.vmem %s28_s12, 128  ;;  %p4267_p1 = scmp.lt.s32.totalorder %s28_s12, %s28_s12 }
   0x8   :  { %p4263_p0 = scmp.ne.s32.totalorder %s28_s12, %s4262_s15  ;;  %p4268_p2 = scmp.lt.s32.totalorder %s4262_s15, %s4262_s15 }
   0xa   :  { %p4269_p3 = por %p4268_p2, %p4267_p1 }
   0xc   :  { %p4270_p4 = pnand %p4269_p3, %p4263_p0 }
   0xe   :  { %4273 = shalt.err (!%p4270_p4)
}
   0xf   :  { %30 = dma.hbm_to_vmem [thread:$0]  %s5211_s1, 128, %s28_s12, [#allocation5]  }
  0x10   :  { %s4282_s8 = scalar_lea.vmem %s39_s14, 1024  ;;  %p4287_p6 = scmp.lt.s32.totalorder %s39_s14, %s39_s14 }
  0x11   :  { %p4283_p5 = scmp.ne.s32.totalorder %s39_s14, %s4282_s8  ;;  %p4288_p7 = scmp.lt.s32.totalorder %s4282_s8, %s4282_s8 }
  0x13   :  { %p4289_p8 = por %p4288_p7, %p4287_p6 }
  0x15   :  { %p4290_p9 = pnand %p4289_p8, %p4283_p5 }
  0x17   :  { %4293 = shalt.err (!%p4290_p9)
}
  0x18   :  { %s4322_s18 = smov 64   ;;  %s4323_s19 = smov 4  }
  0x19   :  { %44 = dma.hbm_to_vmem [thread:$0]  %s5213_s3, 1024, %s39_s14, [#allocation8], %s4322_s18, %s4322_s18, %s4323_s19  }
  0x1a   :  { %4314 = dma.done.wait [#allocation5], 128  }
  0x1b   :  { %4315 = vsyncadd [#allocation5], 4294967168 }
  0x1c   :  { %4316 = dma.done.wait [#allocation8], 1024  }
  0x1d   :  { %4317 = vsyncadd [#allocation8], 4294966272  ;;  %v4324_v1 = vmov 0.0   ;;  %vm4325_vm0 = vmmov 0   ;;  %vm71_vm1 = vcmask 64512   ;;  %v63_v2 = vld [vmem:[#allocation4] sm:$0xff] }
  0x1e   :  { %3659 = vmatprep.subr.mxu0 %v4324_v1  ;;  %3661 = vmatprep.mubr.msk.f32.mxu0 %vm4325_vm0, %v4324_v1  ;;  %v62_v3 = vld [vmem:[%s5210_s0] sm:$0xff]  ;;  %v4109_v4 = vld [vmem:[#allocation7 + $0x8] sm:$0xff]   ;;  %v4110_v5 = vld [vmem:[#allocation7] sm:$0xff]   ;;  %v4326_v8 = vmov 0   ;;  %vm182_vm3 = vcmask 261120   ;;  %s4327_s24 = smov 32  }
  0x1f   :  { %3664 = vmatprep.subr.bf16.mxu1 %v4324_v1  ;;  %3668 = vmatprep.mubr.msk.bf16.mxu1 %vm4325_vm0, %v4324_v1  ;;  %v4404_v6 = vld [vmem:[#allocation7 + $0x18] sm:$0xff]   ;;  %v4408_v7 = vld [vmem:[#allocation7 + $0x10] sm:$0xff]   ;;  %v4442_v37 = vld [vmem:[#allocation7 + $0x28] sm:$0xff]   ;;  %vm3319_vm6 = vcmask 130048  }
  0x20   :  { %3660 = vmatpush3.msra.mxu0 %v63_v2  ;;  %3665 = vmatpush3.bf16.msra.mxu1 %v4109_v4  ;;  %v3411_v9 = vld [vmem:[%s5212_s2] ss:$0 sm:$0xff]  ;;  %v4435_v35 = vld [vmem:[#allocation7 + $0x38] sm:$0xff]   ;;  %v4447_v39 = vld [vmem:[#allocation7 + $0x20] sm:$0xff]  }
  0x21   :  { %3662 = vmatmul.mubr.msk.f32.vlgmr.msra.gmra.mxu0 %vm71_vm1, %v62_v3  ;;  %3720 = vmatprep.subr.bf16.mxu0 %v4324_v1  ;;  %v3413_v18 = vld [vmem:[%s5214_s4] ss:$0 sm:$0xff]  ;;  %v4472_v48 = vld [vmem:[%s5214_s4 + $0x1] ss:$0 sm:$0xff] }
  0x22   :  { %3724 = vmatprep.mubr.msk.bf16.mxu0 %vm4325_vm0, %v4324_v1  ;;  %3666 = vmatprep.subr.bf16.mxu1 %v4324_v1  ;;  %v4438_v36 = vld [vmem:[#allocation7 + $0x30] sm:$0xff]  }
  0x23   :  { %3721 = vmatpush3.bf16.msra.mxu0 %v4404_v6  ;;  %4107 = vset.pattern.permute.xlu1 %v4326_v8 }
  0x24   :  { %3667 = vmatpush3.bf16.msra.mxu1 %v4110_v5  ;;  %3722 = vmatprep.subr.bf16.mxu0 %v4324_v1 }
  0x25   :  { %3672 = vmatprep.subr.bf16.mxu1 %v4324_v1  ;;  %4108 = vset.pattern.permute.xlu0 %v4326_v8 }
  0x27   :  { %3723 = vmatpush3.bf16.msra.mxu0 %v4408_v7 }
  0x28   :  { %3736 = vmatprep.subr.bf16.mxu0 %v4324_v1 }
  0xe1   :  { %v141_v10 = vpop.f32.mrf.mxu0 }
  0xe2   :  { %v142_v11 = vadd.f32 %v3411_v9, %v141_v10 }
  0xe3   :  { %v3663_v12 = vpop.f32.mrf.mxu0 }
  0xe4   :  { %vm145_vm2 = vcmp.gt.f32.partialorder %v142_v11, 0.0  ;;  %v146_v13 = vmul.f32 0.2, %v142_v11 }
  0xe6   :  { %v147_v14 = vsel %vm145_vm2, %v142_v11, %v146_v13 }
  0xe7   :  { %v160_v15 = vpack.c.bf16 %v147_v14, %v147_v14 }
  0xe9   :  { %3669 = vmatmul.mubr.msk.bf16.vlgmr.msra.gmra.mxu1 %vm182_vm3, %v160_v15 }
  0xea   :  { %3673 = vmatpush3.bf16.msra.mxu1 %v4404_v6  ;;  %3676 = vmatprep.mubr.msk.bf16.mxu1 %vm4325_vm0, %v4324_v1 }
  0xeb   :  { %3674 = vmatprep.subr.bf16.mxu1 %v4324_v1 }
  0xee   :  { %3675 = vmatpush3.bf16.msra.mxu1 %v4408_v7 }
  0xef   :  { %3680 = vmatprep.subr.bf16.mxu1 %v4324_v1 }
  0xf1   :  { %3677 = vmatmul.mubr.bf16.vlgmr.msra.gmra.mxu1 %v4326_v8 }
  0xf2   :  { %3684 = vmatprep.mubr.msk.bf16.mxu1 %vm4325_vm0, %v4324_v1  ;;  %3681 = vmatpush3.bf16.msra.mxu1 %v4435_v35 }
  0xf3   :  { %3682 = vmatprep.subr.bf16.mxu1 %v4324_v1 }
  0xf6   :  { %3683 = vmatpush3.bf16.msra.mxu1 %v4438_v36 }
  0xf7   :  { %3688 = vmatprep.subr.bf16.mxu1 %v4324_v1 }
  0xf9   :  { %3685 = vmatmul.mubr.bf16.vlgmr.msra.gmra.mxu1 %v4326_v8 }
  0xfa   :  { %3689 = vmatpush3.bf16.msra.mxu1 %v4442_v37  ;;  %3692 = vmatprep.mubr.msk.bf16.mxu1 %vm4325_vm0, %v4324_v1 }
  0xfb   :  { %3690 = vmatprep.subr.bf16.mxu1 %v4324_v1 }
  0xfe   :  { %3691 = vmatpush3.bf16.msra.mxu1 %v4447_v39 }
  0xff   :  { %3696 = vmatprep.subr.bf16.mxu1 %v4324_v1 }
 0x1a9   :  { %v220_v16 = vpop.f32.mrf.mxu1 }
 0x1aa   :  { %v4427_v21 = vadd.f32 %v3413_v18, %v220_v16 }
 0x1ab   :  { %v3670_v17 = vpop.f32.mrf.mxu1 }
 0x1ad   :  { %v223_v19 = vpop.f32.mrf.mxu1 }
 0x1af   :  { %v3671_v20 = vpop.f32.mrf.mxu1 }
 0x1b1   :  { %v280_v22 = vpop.f32.mrf.mxu1 }
 0x1b2   :  { %v286_v23 = vadd.f32 %v280_v22, %v4427_v21 }
 0x1b3   :  { %v3678_v24 = vpop.f32.mrf.mxu1 }
 0x1b4   :  { %4117 = vtanh.f32 %v286_v23 }
 0x1b5   :  { %v283_v25 = vpop.f32.mrf.mxu1 }
 0x1b7   :  { %v3679_v26 = vpop.f32.mrf.mxu1 }
 0x1b9   :  { %v354_v43 = vpop.f32.mrf.mxu1 }
 0x1ba   :  { %v355_v49 = vadd.f32 %v4472_v48, %v354_v43 }
 0x1bb   :  { %v3686_v44 = vpop.f32.mrf.mxu1 }
 0x1bd   :  { %v357_v45 = vpop.f32.mrf.mxu1 }
 0x1bf   :  { %v3687_v46 = vpop.f32.mrf.mxu1 }
 0x1c1   :  { %v4118_v27 = vpop.eup %4117 }
 0x1c2   :  { %292 = vrot.lane.b32.xlu0 %v4118_v27, %s4322_s18  ;;  %v288_v28 = vmul.f32 0.5, %v4118_v27 }
 0x1c4   :  { %v289_v29 = vadd.f32 0.5, %v288_v28 }
 0x1c6   :  { %v290_v32 = vmul.f32 0.0, %v289_v29 }
 0x234   :  { %v293_v30 = vpop.permute.xlu0 %292 }
 0x235   :  { %v295_v31 = vmul.f32 %v293_v30, %v289_v29 }
 0x237   :  { %297 = vrot.lane.b32.xlu0 %v295_v31, %s4327_s24 }
 0x2a9   :  { %v298_v33 = vpop.permute.xlu0 %297 }
 0x2aa   :  { %v4432_v34 = vadd.f32 %v298_v33, %v290_v32 }
 0x2ac   :  { %4119 = vtanh.f32 %v4432_v34 }
 0x2b9   :  { %v4120_v38 = vpop.eup %4119 }
 0x2ba   :  { %303 = vrot.lane.b32.xlu1 %v4120_v38, %s4322_s18 }
 0x32c   :  { %v304_v40 = vpop.permute.xlu1 %303 }
 0x32d   :  { %v306_v41 = vmul.f32 %v304_v40, %v289_v29 }
 0x32f   :  { %v307_v42 = vpack.c.bf16 %v306_v41, %v306_v41 }
 0x331   :  { %361 = vrot.lane.b32.xlu1 %v307_v42, %s4327_s24 }
 0x3a3   :  { %v362_v47 = vpop.permute.xlu1 %361 }
 0x3a4   :  { %3693 = vmatmul.mubr.msk.bf16.vlgmr.msra.gmra.mxu1 %vm182_vm3, %v362_v47 }
 0x3a5   :  { %3697 = vmatpush3.bf16.msra.mxu1 %v4404_v6  ;;  %3700 = vmatprep.mubr.msk.bf16.mxu1 %vm4325_vm0, %v4324_v1 }
 0x3a6   :  { %3698 = vmatprep.subr.bf16.mxu1 %v4324_v1 }
 0x3a9   :  { %3699 = vmatpush3.bf16.msra.mxu1 %v4408_v7 }
 0x3aa   :  { %3704 = vmatprep.subr.bf16.mxu1 %v4324_v1 }
 0x3ac   :  { %3701 = vmatmul.mubr.msk.bf16.vlgmr.msra.gmra.mxu1 %vm182_vm3, %v362_v47 }
 0x3ad   :  { %3705 = vmatpush3.bf16.msra.mxu1 %v4435_v35  ;;  %3708 = vmatprep.mubr.msk.bf16.mxu1 %vm4325_vm0, %v4324_v1 }
 0x3ae   :  { %3706 = vmatprep.subr.bf16.mxu1 %v4324_v1 }
 0x3b1   :  { %3707 = vmatpush3.bf16.msra.mxu1 %v4438_v36 }
 0x3b2   :  { %3712 = vmatprep.subr.bf16.mxu1 %v4324_v1 }
 0x464   :  { %v412_v50 = vpop.f32.mrf.mxu1 }
 0x465   :  { %v413_v51 = vadd.f32 %v412_v50, %v355_v49 }
 0x466   :  { %v3694_v52 = vpop.f32.mrf.mxu1 }
 0x467   :  { %4121 = vtanh.f32 %v413_v51 }
 0x468   :  { %v415_v53 = vpop.f32.mrf.mxu1 }
 0x46a   :  { %v3695_v54 = vpop.f32.mrf.mxu1 }
 0x46c   :  { %v477_v55 = vpop.f32.mrf.mxu1 }
 0x46d   :  { %v483_v56 = vadd.f32 %v477_v55, %v4427_v21 }
 0x46e   :  { %v3702_v57 = vpop.f32.mrf.mxu1 }
 0x46f   :  { %4123 = vtanh.f32 %v483_v56 }
 0x470   :  { %v480_v58 = vpop.f32.mrf.mxu1 }
 0x472   :  { %v3703_v59 = vpop.f32.mrf.mxu1 }
 0x474   :  { %v4122_v60 = vpop.eup %4121 }
 0x475   :  { %423 = vrot.lane.b32.xlu0 %v4122_v60, %s4322_s18  ;;  %v419_v62 = vmul.f32 0.5, %v4122_v60 }
 0x477   :  { %v420_v63 = vadd.f32 0.5, %v419_v62 }
 0x479   :  { %v421_v9 = vmul.f32 0.0, %v420_v63 }
 0x47c   :  { %v4124_v61 = vpop.eup %4123 }
 0x47d   :  { %489 = vrot.lane.b32.xlu1 %v4124_v61, %s4322_s18  ;;  %v485_v3 = vmul.f32 0.5, %v4124_v61 }
 0x47f   :  { %v486_v4 = vadd.f32 0.5, %v485_v3 }
 0x481   :  { %v487_v12 = vmul.f32 %v486_v4, %v4432_v34 }
 0x4e7   :  { %v424_v0 = vpop.permute.xlu0 %423 }
 0x4e8   :  { %v426_v2 = vmul.f32 %v424_v0, %v420_v63 }
 0x4ea   :  { %428 = vrot.lane.b32.xlu0 %v426_v2, %s4327_s24 }
 0x4ef   :  { %v490_v5 = vpop.permute.xlu1 %489 }
 0x4f0   :  { %v492_v8 = vmul.f32 %v490_v5, %v486_v4 }
 0x4f2   :  { %494 = vrot.lane.b32.xlu1 %v492_v8, %s4327_s24 }
 0x55c   :  { %v429_v10 = vpop.permute.xlu0 %428 }
 0x55d   :  { %v4480_v11 = vadd.f32 %v429_v10, %v421_v9 }
 0x55f   :  { %4125 = vtanh.f32 %v4480_v11 }
 0x564   :  { %v495_v13 = vpop.permute.xlu1 %494 }
 0x565   :  { %v4484_v14 = vadd.f32 %v495_v13, %v487_v12 }
 0x567   :  { %4127 = vtanh.f32 %v4484_v14 }
 0x56c   :  { %v4126_v15 = vpop.eup %4125 }
 0x56d   :  { %434 = vrot.lane.b32.xlu0 %v4126_v15, %s4322_s18 }
 0x574   :  { %v4128_v16 = vpop.eup %4127 }
 0x575   :  { %500 = vrot.lane.b32.xlu1 %v4128_v16, %s4322_s18 }
 0x5df   :  { %v435_v17 = vpop.permute.xlu0 %434 }
 0x5e0   :  { %v4489_v18 = vmul.f32 %v435_v17, %v420_v63 }
 0x5e2   :  { %v505_v19 = vpack.c.bf16 %v4489_v18, %v4489_v18 }
 0x5e4   :  { %507 = vrot.lane.b32.xlu0 %v505_v19, %s4327_s24 }
 0x5e7   :  { %v501_v20 = vpop.permute.xlu1 %500 }
 0x5e8   :  { %v503_v22 = vmul.f32 %v501_v20, %v486_v4 }
 0x5ea   :  { %v504_v23 = vpack.c.bf16 %v503_v22, %v503_v22 }
 0x5ec   :  { %553 = vrot.lane.b32.xlu1 %v504_v23, %s4327_s24 }
 0x656   :  { %v508_v24 = vpop.permute.xlu0 %507 }
 0x657   :  { %3709 = vmatmul.mubr.msk.bf16.vlgmr.msra.gmra.mxu1 %vm182_vm3, %v508_v24 }
 0x658   :  { %3713 = vmatpush3.bf16.msra.mxu1 %v4442_v37  ;;  %3716 = vmatprep.mubr.msk.bf16.mxu1 %vm4325_vm0, %v4324_v1 }
 0x659   :  { %3714 = vmatprep.subr.bf16.mxu1 %v4324_v1 }
 0x65c   :  { %3715 = vmatpush3.bf16.msra.mxu1 %v4447_v39 }
 0x65d   :  { %3728 = vmatprep.subr.bf16.mxu1 %v4324_v1 }
 0x65e   :  { %v554_v25 = vpop.permute.xlu1 %553 }
 0x65f   :  { %3717 = vmatmul.mubr.msk.bf16.vlgmr.msra.gmra.mxu1 %vm182_vm3, %v554_v25  ;;  %3725 = vmatmul.mubr.msk.bf16.vlgmr.msra.gmra.mxu0 %vm182_vm3, %v554_v25 }
 0x660   :  { %3729 = vmatpush3.bf16.msra.mxu1 %v4435_v35  ;;  %3737 = vmatpush3.bf16.msra.mxu0 %v4442_v37 }
 0x661   :  { %3730 = vmatprep.subr.bf16.mxu1 %v4324_v1  ;;  %3738 = vmatprep.subr.bf16.mxu0 %v4324_v1 }
 0x662   :  { %3732 = vmatprep.mubr.msk.bf16.mxu1 %vm4325_vm0, %v4324_v1  ;;  %3740 = vmatprep.mubr.msk.bf16.mxu0 %vm4325_vm0, %v4324_v1 }
 0x664   :  { %3731 = vmatpush3.bf16.msra.mxu1 %v4438_v36  ;;  %3739 = vmatpush3.bf16.msra.mxu0 %v4447_v39 }
 0x665   :  { %3744 = vmatprep.subr.bf16.mxu1 %v4324_v1  ;;  %3752 = vmatprep.subr.bf16.mxu0 %v4324_v1 }
 0x717   :  { %v546_v26 = vpop.f32.mrf.mxu1 }
 0x718   :  { %v547_v30 = vadd.f32 %v4472_v48, %v546_v26 }
 0x719   :  { %v3710_v27 = vpop.f32.mrf.mxu1 }
 0x71b   :  { %v549_v28 = vpop.f32.mrf.mxu1 }
 0x71d   :  { %v3711_v29 = vpop.f32.mrf.mxu1 }
 0x71f   :  { %v592_v31 = vpop.f32.mrf.mxu1  ;;  %v657_v32 = vpop.f32.mrf.mxu0 }
 0x720   :  { %v593_v33 = vadd.f32 %v592_v31, %v547_v30  ;;  %v663_v34 = vadd.f32 %v657_v32, %v4427_v21 }
 0x721   :  { %v3718_v38 = vpop.f32.mrf.mxu1  ;;  %v3726_v40 = vpop.f32.mrf.mxu0 }
 0x722   :  { %4129 = vtanh.f32 %v593_v33 }
 0x723   :  { %4131 = vtanh.f32 %v663_v34  ;;  %v595_v41 = vpop.f32.mrf.mxu1  ;;  %v660_v42 = vpop.f32.mrf.mxu0 }
 0x725   :  { %v3719_v43 = vpop.f32.mrf.mxu1  ;;  %v3727_v44 = vpop.f32.mrf.mxu0 }
 0x72f   :  { %v4130_v45 = vpop.eup %4129 }
 0x730   :  { %v4132_v46 = vpop.eup %4131  ;;  %603 = vrot.lane.b32.xlu0 %v4130_v45, %s4322_s18  ;;  %v599_v47 = vmul.f32 0.5, %v4130_v45 }
 0x731   :  { %669 = vrot.lane.b32.xlu1 %v4132_v46, %s4322_s18  ;;  %v665_v49 = vmul.f32 0.5, %v4132_v46 }
 0x732   :  { %v600_v50 = vadd.f32 0.5, %v599_v47 }
 0x733   :  { %v666_v52 = vadd.f32 0.5, %v665_v49 }
 0x734   :  { %v601_v56 = vmul.f32 %v600_v50, %v4480_v11 }
 0x735   :  { %v667_v58 = vmul.f32 %v666_v52, %v4484_v14 }
 0x7a2   :  { %v604_v51 = vpop.permute.xlu0 %603 }
 0x7a3   :  { %v606_v53 = vmul.f32 %v604_v51, %v600_v50  ;;  %v670_v54 = vpop.permute.xlu1 %669 }
 0x7a4   :  { %v672_v55 = vmul.f32 %v670_v54, %v666_v52 }
 0x7a5   :  { %608 = vrot.lane.b32.xlu0 %v606_v53, %s4327_s24 }
 0x7a6   :  { %674 = vrot.lane.b32.xlu1 %v672_v55, %s4327_s24 }
 0x817   :  { %v609_v57 = vpop.permute.xlu0 %608 }
 0x818   :  { %v4524_v59 = vadd.f32 %v609_v57, %v601_v56  ;;  %v675_v60 = vpop.permute.xlu1 %674 }
 0x819   :  { %v4526_v61 = vadd.f32 %v675_v60, %v667_v58 }
 0x81a   :  { %4133 = vtanh.f32 %v4524_v59 }
 0x81b   :  { %4135 = vtanh.f32 %v4526_v61 }
 0x827   :  { %v4134_v62 = vpop.eup %4133 }
 0x828   :  { %v4136_v63 = vpop.eup %4135  ;;  %614 = vrot.lane.b32.xlu0 %v4134_v62, %s4322_s18 }
 0x829   :  { %680 = vrot.lane.b32.xlu1 %v4136_v63, %s4322_s18 }
 0x89a   :  { %v615_v0 = vpop.permute.xlu0 %614 }
 0x89b   :  { %v4532_v2 = vmul.f32 %v615_v0, %v600_v50  ;;  %v681_v3 = vpop.permute.xlu1 %680 }
 0x89c   :  { %v683_v4 = vmul.f32 %v681_v3, %v666_v52 }
 0x89d   :  { %v685_v5 = vpack.c.bf16 %v4532_v2, %v4532_v2 }
 0x89e   :  { %v684_v8 = vpack.c.bf16 %v683_v4, %v683_v4 }
 0x89f   :  { %687 = vrot.lane.b32.xlu0 %v685_v5, %s4327_s24 }
 0x8a0   :  { %733 = vrot.lane.b32.xlu1 %v684_v8, %s4327_s24 }
 0x911   :  { %v688_v9 = vpop.permute.xlu0 %687 }
 0x912   :  { %v734_v10 = vpop.permute.xlu1 %733  ;;  %3733 = vmatmul.mubr.msk.bf16.vlgmr.msra.gmra.mxu1 %vm182_vm3, %v688_v9 }
 0x913   :  { %3741 = vmatmul.mubr.msk.bf16.vlgmr.msra.gmra.mxu0 %vm182_vm3, %v734_v10  ;;  %3745 = vmatpush3.bf16.msra.mxu1 %v4404_v6 }
 0x914   :  { %3746 = vmatprep.subr.bf16.mxu1 %v4324_v1  ;;  %3748 = vmatprep.mubr.msk.bf16.mxu1 %vm4325_vm0, %v4324_v1 }
 0x915   :  { %3753 = vmatpush3.bf16.msra.mxu0 %v4435_v35  ;;  %3756 = vmatprep.mubr.msk.bf16.mxu0 %vm4325_vm0, %v4324_v1 }
 0x916   :  { %3754 = vmatprep.subr.bf16.mxu0 %v4324_v1 }
 0x917   :  { %3747 = vmatpush3.bf16.msra.mxu1 %v4408_v7 }
 0x918   :  { %3760 = vmatprep.subr.bf16.mxu1 %v4324_v1 }
 0x919   :  { %3755 = vmatpush3.bf16.msra.mxu0 %v4438_v36 }
 0x91a   :  { %3749 = vmatmul.mubr.msk.bf16.vlgmr.msra.gmra.mxu1 %vm182_vm3, %v734_v10  ;;  %3768 = vmatprep.subr.bf16.mxu0 %v4324_v1 }
 0x91b   :  { %3761 = vmatpush3.bf16.msra.mxu1 %v4442_v37  ;;  %3764 = vmatprep.mubr.msk.bf16.mxu1 %vm4325_vm0, %v4324_v1 }
 0x91c   :  { %3762 = vmatprep.subr.bf16.mxu1 %v4324_v1 }
 0x91f   :  { %3763 = vmatpush3.bf16.msra.mxu1 %v4447_v39 }
 0x920   :  { %3776 = vmatprep.subr.bf16.mxu1 %v4324_v1 }
 0x9d2   :  { %v726_v11 = vpop.f32.mrf.mxu1 }
 0x9d3   :  { %v727_v12 = vadd.f32 %v4472_v48, %v726_v11  ;;  %v772_v13 = vpop.f32.mrf.mxu0 }
 0x9d4   :  { %v3734_v14 = vpop.f32.mrf.mxu1 }
 0x9d5   :  { %v773_v15 = vadd.f32 %v772_v13, %v727_v12  ;;  %v3742_v16 = vpop.f32.mrf.mxu0 }
 0x9d6   :  { %v729_v17 = vpop.f32.mrf.mxu1 }
 0x9d7   :  { %4137 = vtanh.f32 %v773_v15  ;;  %v775_v19 = vpop.f32.mrf.mxu0 }
 0x9d8   :  { %v3735_v20 = vpop.f32.mrf.mxu1 }
 0x9d9   :  { %v3743_v22 = vpop.f32.mrf.mxu0 }
 0x9da   :  { %v837_v23 = vpop.f32.mrf.mxu1 }
 0x9db   :  { %v843_v24 = vadd.f32 %v837_v23, %v4427_v21 }
 0x9dc   :  { %v3750_v25 = vpop.f32.mrf.mxu1 }
 0x9dd   :  { %4139 = vtanh.f32 %v843_v24 }
 0x9de   :  { %v840_v26 = vpop.f32.mrf.mxu1 }
 0x9e0   :  { %v3751_v27 = vpop.f32.mrf.mxu1 }
 0x9e4   :  { %v4138_v28 = vpop.eup %4137 }
 0x9e5   :  { %783 = vrot.lane.b32.xlu0 %v4138_v28, %s4322_s18  ;;  %v779_v30 = vmul.f32 0.5, %v4138_v28 }
 0x9e7   :  { %v780_v31 = vadd.f32 0.5, %v779_v30 }
 0x9e9   :  { %v781_v42 = vmul.f32 %v780_v31, %v4524_v59 }
 0x9ea   :  { %v4140_v29 = vpop.eup %4139 }
 0x9eb   :  { %849 = vrot.lane.b32.xlu1 %v4140_v29, %s4322_s18  ;;  %v845_v34 = vmul.f32 0.5, %v4140_v29 }
 0x9ed   :  { %v846_v38 = vadd.f32 0.5, %v845_v34 }
 0x9ef   :  { %v847_v45 = vmul.f32 %v846_v38, %v4526_v61 }
 0xa57   :  { %v784_v32 = vpop.permute.xlu0 %783 }
 0xa58   :  { %v786_v33 = vmul.f32 %v784_v32, %v780_v31 }
 0xa5a   :  { %788 = vrot.lane.b32.xlu0 %v786_v33, %s4327_s24 }
 0xa5d   :  { %v850_v40 = vpop.permute.xlu1 %849 }
 0xa5e   :  { %v852_v41 = vmul.f32 %v850_v40, %v846_v38 }
 0xa60   :  { %854 = vrot.lane.b32.xlu1 %v852_v41, %s4327_s24 }
 0xacc   :  { %v789_v43 = vpop.permute.xlu0 %788 }
 0xacd   :  { %v4566_v44 = vadd.f32 %v789_v43, %v781_v42 }
 0xacf   :  { %4141 = vtanh.f32 %v4566_v44 }
 0xad2   :  { %v855_v46 = vpop.permute.xlu1 %854 }
 0xad3   :  { %v4570_v47 = vadd.f32 %v855_v46, %v847_v45 }
 0xad5   :  { %4143 = vtanh.f32 %v4570_v47 }
 0xadc   :  { %v4142_v49 = vpop.eup %4141 }
 0xadd   :  { %794 = vrot.lane.b32.xlu0 %v4142_v49, %s4322_s18 }
 0xae2   :  { %v4144_v50 = vpop.eup %4143 }
 0xae3   :  { %860 = vrot.lane.b32.xlu1 %v4144_v50, %s4322_s18 }
 0xb4f   :  { %v795_v51 = vpop.permute.xlu0 %794 }
 0xb50   :  { %v4575_v52 = vmul.f32 %v795_v51, %v780_v31 }
 0xb52   :  { %v865_v53 = vpack.c.bf16 %v4575_v52, %v4575_v52 }
 0xb54   :  { %867 = vrot.lane.b32.xlu0 %v865_v53, %s4327_s24 }
 0xb55   :  { %v861_v54 = vpop.permute.xlu1 %860 }
 0xb56   :  { %v863_v55 = vmul.f32 %v861_v54, %v846_v38 }
 0xb58   :  { %v864_v56 = vpack.c.bf16 %v863_v55, %v863_v55 }
 0xb5a   :  { %913 = vrot.lane.b32.xlu1 %v864_v56, %s4327_s24 }
 0xbc6   :  { %v868_v57 = vpop.permute.xlu0 %867 }
 0xbc7   :  { %3757 = vmatmul.mubr.msk.bf16.vlgmr.msra.gmra.mxu0 %vm182_vm3, %v868_v57 }
 0xbc8   :  { %3769 = vmatpush3.bf16.msra.mxu0 %v4404_v6  ;;  %3772 = vmatprep.mubr.msk.bf16.mxu0 %vm4325_vm0, %v4324_v1 }
 0xbc9   :  { %3770 = vmatprep.subr.bf16.mxu0 %v4324_v1 }
 0xbcc   :  { %v914_v58 = vpop.permute.xlu1 %913  ;;  %3771 = vmatpush3.bf16.msra.mxu0 %v4408_v7 }
 0xbcd   :  { %3765 = vmatmul.mubr.msk.bf16.vlgmr.msra.gmra.mxu1 %vm182_vm3, %v914_v58  ;;  %3784 = vmatprep.subr.bf16.mxu0 %v4324_v1 }
 0xbce   :  { %3777 = vmatpush3.bf16.msra.mxu1 %v4435_v35  ;;  %3780 = vmatprep.mubr.msk.bf16.mxu1 %vm4325_vm0, %v4324_v1 }
 0xbcf   :  { %3773 = vmatmul.mubr.msk.bf16.vlgmr.msra.gmra.mxu0 %vm182_vm3, %v914_v58  ;;  %3778 = vmatprep.subr.bf16.mxu1 %v4324_v1 }
 0xbd0   :  { %3785 = vmatpush3.bf16.msra.mxu0 %v4442_v37  ;;  %3788 = vmatprep.mubr.msk.bf16.mxu0 %vm4325_vm0, %v4324_v1 }
 0xbd1   :  { %3786 = vmatprep.subr.bf16.mxu0 %v4324_v1 }
 0xbd2   :  { %3779 = vmatpush3.bf16.msra.mxu1 %v4438_v36 }
 0xbd3   :  { %3792 = vmatprep.subr.bf16.mxu1 %v4324_v1 }
 0xbd4   :  { %3787 = vmatpush3.bf16.msra.mxu0 %v4447_v39 }
 0xbd5   :  { %3800 = vmatprep.subr.bf16.mxu0 %v4324_v1 }
 0xc87   :  { %v906_v59 = vpop.f32.mrf.mxu0 }
 0xc88   :  { %v907_v62 = vadd.f32 %v4472_v48, %v906_v59 }
 0xc89   :  { %v3758_v60 = vpop.f32.mrf.mxu0 }
 0xc8b   :  { %v909_v61 = vpop.f32.mrf.mxu0 }
 0xc8d   :  { %v3759_v63 = vpop.f32.mrf.mxu0  ;;  %v952_v0 = vpop.f32.mrf.mxu1 }
 0xc8e   :  { %v953_v3 = vadd.f32 %v952_v0, %v907_v62 }
 0xc8f   :  { %v3766_v4 = vpop.f32.mrf.mxu1  ;;  %v1017_v5 = vpop.f32.mrf.mxu0 }
 0xc90   :  { %4145 = vtanh.f32 %v953_v3  ;;  %v1023_v8 = vadd.f32 %v1017_v5, %v4427_v21 }
 0xc91   :  { %v955_v9 = vpop.f32.mrf.mxu1  ;;  %v3774_v10 = vpop.f32.mrf.mxu0 }
 0xc92   :  { %4147 = vtanh.f32 %v1023_v8 }
 0xc93   :  { %v3767_v11 = vpop.f32.mrf.mxu1  ;;  %v1020_v12 = vpop.f32.mrf.mxu0 }
 0xc95   :  { %v3775_v13 = vpop.f32.mrf.mxu0 }
 0xc9d   :  { %v4146_v14 = vpop.eup %4145 }
 0xc9e   :  { %963 = vrot.lane.b32.xlu0 %v4146_v14, %s4322_s18  ;;  %v959_v16 = vmul.f32 0.5, %v4146_v14 }
 0xc9f   :  { %v4148_v15 = vpop.eup %4147 }
 0xca0   :  { %1029 = vrot.lane.b32.xlu1 %v4148_v15, %s4322_s18  ;;  %v1025_v17 = vmul.f32 0.5, %v4148_v15  ;;  %v960_v19 = vadd.f32 0.5, %v959_v16 }
 0xca2   :  { %v1026_v23 = vadd.f32 0.5, %v1025_v17  ;;  %v961_v26 = vmul.f32 %v960_v19, %v4566_v44 }
 0xca4   :  { %v1027_v29 = vmul.f32 %v1026_v23, %v4570_v47 }
 0xd10   :  { %v964_v20 = vpop.permute.xlu0 %963 }
 0xd11   :  { %v966_v22 = vmul.f32 %v964_v20, %v960_v19 }
 0xd12   :  { %v1030_v24 = vpop.permute.xlu1 %1029 }
 0xd13   :  { %v1032_v25 = vmul.f32 %v1030_v24, %v1026_v23  ;;  %968 = vrot.lane.b32.xlu0 %v966_v22, %s4327_s24 }
 0xd15   :  { %1034 = vrot.lane.b32.xlu1 %v1032_v25, %s4327_s24 }
 0xd85   :  { %v969_v27 = vpop.permute.xlu0 %968 }
 0xd86   :  { %v4609_v28 = vadd.f32 %v969_v27, %v961_v26 }
 0xd87   :  { %v1035_v30 = vpop.permute.xlu1 %1034 }
 0xd88   :  { %4149 = vtanh.f32 %v4609_v28  ;;  %v4613_v31 = vadd.f32 %v1035_v30, %v1027_v29 }
 0xd8a   :  { %4151 = vtanh.f32 %v4613_v31 }
 0xd95   :  { %v4150_v32 = vpop.eup %4149 }
 0xd96   :  { %974 = vrot.lane.b32.xlu0 %v4150_v32, %s4322_s18 }
 0xd97   :  { %v4152_v33 = vpop.eup %4151 }
 0xd98   :  { %1040 = vrot.lane.b32.xlu1 %v4152_v33, %s4322_s18 }
 0xe08   :  { %v975_v34 = vpop.permute.xlu0 %974 }
 0xe09   :  { %v4618_v38 = vmul.f32 %v975_v34, %v960_v19 }
 0xe0a   :  { %v1041_v40 = vpop.permute.xlu1 %1040 }
 0xe0b   :  { %v1045_v41 = vpack.c.bf16 %v4618_v38, %v4618_v38  ;;  %v1043_v42 = vmul.f32 %v1041_v40, %v1026_v23 }
 0xe0d   :  { %v1044_v43 = vpack.c.bf16 %v1043_v42, %v1043_v42  ;;  %1047 = vrot.lane.b32.xlu0 %v1045_v41, %s4327_s24 }
 0xe0f   :  { %1093 = vrot.lane.b32.xlu1 %v1044_v43, %s4327_s24 }
 0xe7f   :  { %v1048_v44 = vpop.permute.xlu0 %1047 }
 0xe80   :  { %3781 = vmatmul.mubr.msk.bf16.vlgmr.msra.gmra.mxu1 %vm182_vm3, %v1048_v44 }
 0xe81   :  { %3793 = vmatpush3.bf16.msra.mxu1 %v4404_v6  ;;  %v1094_v45 = vpop.permute.xlu1 %1093  ;;  %3796 = vmatprep.mubr.msk.bf16.mxu1 %vm4325_vm0, %v4324_v1 }
 0xe82   :  { %3789 = vmatmul.mubr.msk.bf16.vlgmr.msra.gmra.mxu0 %vm182_vm3, %v1094_v45  ;;  %3794 = vmatprep.subr.bf16.mxu1 %v4324_v1 }
 0xe83   :  { %3801 = vmatpush3.bf16.msra.mxu0 %v4435_v35  ;;  %3804 = vmatprep.mubr.msk.bf16.mxu0 %vm4325_vm0, %v4324_v1 }
 0xe84   :  { %3802 = vmatprep.subr.bf16.mxu0 %v4324_v1 }
 0xe85   :  { %3795 = vmatpush3.bf16.msra.mxu1 %v4408_v7 }
 0xe86   :  { %3808 = vmatprep.subr.bf16.mxu1 %v4324_v1 }
 0xe87   :  { %3803 = vmatpush3.bf16.msra.mxu0 %v4438_v36 }
 0xe88   :  { %3797 = vmatmul.mubr.msk.bf16.vlgmr.msra.gmra.mxu1 %vm182_vm3, %v1094_v45  ;;  %3816 = vmatprep.subr.bf16.mxu0 %v4324_v1 }
 0xe89   :  { %3809 = vmatpush3.bf16.msra.mxu1 %v4442_v37  ;;  %3812 = vmatprep.mubr.msk.bf16.mxu1 %vm4325_vm0, %v4324_v1 }
 0xe8a   :  { %3810 = vmatprep.subr.bf16.mxu1 %v4324_v1 }
 0xe8d   :  { %3811 = vmatpush3.bf16.msra.mxu1 %v4447_v39 }
 0xe8e   :  { %3824 = vmatprep.subr.bf16.mxu1 %v4324_v1 }
 0xf40   :  { %v1086_v46 = vpop.f32.mrf.mxu1 }
 0xf41   :  { %v1087_v47 = vadd.f32 %v4472_v48, %v1086_v46 }
 0xf42   :  { %v3782_v49 = vpop.f32.mrf.mxu1  ;;  %v1132_v50 = vpop.f32.mrf.mxu0 }
 0xf43   :  { %v1133_v51 = vadd.f32 %v1132_v50, %v1087_v47 }
 0xf44   :  { %v1089_v53 = vpop.f32.mrf.mxu1  ;;  %v3790_v54 = vpop.f32.mrf.mxu0 }
 0xf45   :  { %4153 = vtanh.f32 %v1133_v51 }
 0xf46   :  { %v3783_v55 = vpop.f32.mrf.mxu1  ;;  %v1135_v56 = vpop.f32.mrf.mxu0 }
 0xf48   :  { %v3791_v57 = vpop.f32.mrf.mxu0  ;;  %v1197_v58 = vpop.f32.mrf.mxu1 }
 0xf49   :  { %v1203_v59 = vadd.f32 %v1197_v58, %v4427_v21 }
 0xf4a   :  { %v3798_v60 = vpop.f32.mrf.mxu1 }
 0xf4b   :  { %4155 = vtanh.f32 %v1203_v59 }
 0xf4c   :  { %v1200_v61 = vpop.f32.mrf.mxu1 }
 0xf4e   :  { %v3799_v62 = vpop.f32.mrf.mxu1 }
 0xf52   :  { %v4154_v63 = vpop.eup %4153 }
 0xf53   :  { %1143 = vrot.lane.b32.xlu0 %v4154_v63, %s4322_s18  ;;  %v1139_v3 = vmul.f32 0.5, %v4154_v63 }
 0xf55   :  { %v1140_v4 = vadd.f32 0.5, %v1139_v3 }
 0xf57   :  { %v1141_v13 = vmul.f32 %v1140_v4, %v4609_v28 }
 0xf58   :  { %v4156_v0 = vpop.eup %4155 }
 0xf59   :  { %1209 = vrot.lane.b32.xlu1 %v4156_v0, %s4322_s18  ;;  %v1205_v9 = vmul.f32 0.5, %v4156_v0 }
 0xf5b   :  { %v1206_v10 = vadd.f32 0.5, %v1205_v9 }
 0xf5d   :  { %v1207_v16 = vmul.f32 %v1206_v10, %v4613_v31 }
 0xfc5   :  { %v1144_v5 = vpop.permute.xlu0 %1143 }
 0xfc6   :  { %v1146_v8 = vmul.f32 %v1144_v5, %v1140_v4 }
 0xfc8   :  { %1148 = vrot.lane.b32.xlu0 %v1146_v8, %s4327_s24 }
 0xfcb   :  { %v1210_v11 = vpop.permute.xlu1 %1209 }
 0xfcc   :  { %v1212_v12 = vmul.f32 %v1210_v11, %v1206_v10 }
 0xfce   :  { %1214 = vrot.lane.b32.xlu1 %v1212_v12, %s4327_s24 }
0x103a   :  { %v1149_v14 = vpop.permute.xlu0 %1148 }
0x103b   :  { %v4652_v15 = vadd.f32 %v1149_v14, %v1141_v13 }
0x103d   :  { %4157 = vtanh.f32 %v4652_v15 }
0x1040   :  { %v1215_v17 = vpop.permute.xlu1 %1214 }
0x1041   :  { %v4656_v19 = vadd.f32 %v1215_v17, %v1207_v16 }
0x1043   :  { %4159 = vtanh.f32 %v4656_v19 }
0x104a   :  { %v4158_v20 = vpop.eup %4157 }
0x104b   :  { %1154 = vrot.lane.b32.xlu0 %v4158_v20, %s4322_s18 }
0x1050   :  { %v4160_v22 = vpop.eup %4159 }
0x1051   :  { %1220 = vrot.lane.b32.xlu1 %v4160_v22, %s4322_s18 }
0x10bd   :  { %v1155_v23 = vpop.permute.xlu0 %1154 }
0x10be   :  { %v4661_v24 = vmul.f32 %v1155_v23, %v1140_v4 }
0x10c0   :  { %v1225_v25 = vpack.c.bf16 %v4661_v24, %v4661_v24 }
0x10c2   :  { %1227 = vrot.lane.b32.xlu0 %v1225_v25, %s4327_s24 }
0x10c3   :  { %v1221_v26 = vpop.permute.xlu1 %1220 }
0x10c4   :  { %v1223_v27 = vmul.f32 %v1221_v26, %v1206_v10 }
0x10c6   :  { %v1224_v28 = vpack.c.bf16 %v1223_v27, %v1223_v27 }
0x10c8   :  { %1273 = vrot.lane.b32.xlu1 %v1224_v28, %s4327_s24 }
0x1134   :  { %v1228_v29 = vpop.permute.xlu0 %1227 }
0x1135   :  { %3805 = vmatmul.mubr.msk.bf16.vlgmr.msra.gmra.mxu0 %vm182_vm3, %v1228_v29 }
0x1136   :  { %3817 = vmatpush3.bf16.msra.mxu0 %v4404_v6  ;;  %3820 = vmatprep.mubr.msk.bf16.mxu0 %vm4325_vm0, %v4324_v1 }
0x1137   :  { %3818 = vmatprep.subr.bf16.mxu0 %v4324_v1 }
0x113a   :  { %v1274_v30 = vpop.permute.xlu1 %1273  ;;  %3819 = vmatpush3.bf16.msra.mxu0 %v4408_v7 }
0x113b   :  { %3813 = vmatmul.mubr.msk.bf16.vlgmr.msra.gmra.mxu1 %vm182_vm3, %v1274_v30  ;;  %3832 = vmatprep.subr.bf16.mxu0 %v4324_v1 }
0x113c   :  { %3825 = vmatpush3.bf16.msra.mxu1 %v4435_v35  ;;  %3828 = vmatprep.mubr.msk.bf16.mxu1 %vm4325_vm0, %v4324_v1 }
0x113d   :  { %3821 = vmatmul.mubr.msk.bf16.vlgmr.msra.gmra.mxu0 %vm182_vm3, %v1274_v30  ;;  %3826 = vmatprep.subr.bf16.mxu1 %v4324_v1 }
0x113e   :  { %3833 = vmatpush3.bf16.msra.mxu0 %v4442_v37  ;;  %3836 = vmatprep.mubr.msk.bf16.mxu0 %vm4325_vm0, %v4324_v1 }
0x113f   :  { %3834 = vmatprep.subr.bf16.mxu0 %v4324_v1 }
0x1140   :  { %3827 = vmatpush3.bf16.msra.mxu1 %v4438_v36 }
0x1141   :  { %3840 = vmatprep.subr.bf16.mxu1 %v4324_v1 }
0x1142   :  { %3835 = vmatpush3.bf16.msra.mxu0 %v4447_v39 }
0x1143   :  { %3848 = vmatprep.subr.bf16.mxu0 %v4324_v1 }
0x11f5   :  { %v1266_v31 = vpop.f32.mrf.mxu0 }
0x11f6   :  { %v1267_v34 = vadd.f32 %v4472_v48, %v1266_v31 }
0x11f7   :  { %v3806_v32 = vpop.f32.mrf.mxu0 }
0x11f9   :  { %v1269_v33 = vpop.f32.mrf.mxu0 }
0x11fb   :  { %v3807_v40 = vpop.f32.mrf.mxu0  ;;  %v1312_v41 = vpop.f32.mrf.mxu1 }
0x11fc   :  { %v1313_v42 = vadd.f32 %v1312_v41, %v1267_v34 }
0x11fd   :  { %v3814_v43 = vpop.f32.mrf.mxu1  ;;  %v1377_v44 = vpop.f32.mrf.mxu0 }
0x11fe   :  { %4161 = vtanh.f32 %v1313_v42  ;;  %v1383_v45 = vadd.f32 %v1377_v44, %v4427_v21 }
0x11ff   :  { %v1315_v46 = vpop.f32.mrf.mxu1  ;;  %v3822_v47 = vpop.f32.mrf.mxu0 }
0x1200   :  { %4163 = vtanh.f32 %v1383_v45 }
0x1201   :  { %v3815_v49 = vpop.f32.mrf.mxu1  ;;  %v1380_v50 = vpop.f32.mrf.mxu0 }
0x1203   :  { %v3823_v51 = vpop.f32.mrf.mxu0 }
0x120b   :  { %v4162_v53 = vpop.eup %4161 }
0x120c   :  { %1323 = vrot.lane.b32.xlu0 %v4162_v53, %s4322_s18  ;;  %v1319_v55 = vmul.f32 0.5, %v4162_v53 }
0x120d   :  { %v4164_v54 = vpop.eup %4163 }
0x120e   :  { %1389 = vrot.lane.b32.xlu1 %v4164_v54, %s4322_s18  ;;  %v1385_v56 = vmul.f32 0.5, %v4164_v54  ;;  %v1320_v57 = vadd.f32 0.5, %v1319_v55 }
0x1210   :  { %v1386_v60 = vadd.f32 0.5, %v1385_v56  ;;  %v1321_v63 = vmul.f32 %v1320_v57, %v4652_v15 }
0x1212   :  { %v1387_v4 = vmul.f32 %v1386_v60, %v4656_v19 }
0x127e   :  { %v1324_v58 = vpop.permute.xlu0 %1323 }
0x127f   :  { %v1326_v59 = vmul.f32 %v1324_v58, %v1320_v57 }
0x1280   :  { %v1390_v61 = vpop.permute.xlu1 %1389 }
0x1281   :  { %v1392_v62 = vmul.f32 %v1390_v61, %v1386_v60  ;;  %1328 = vrot.lane.b32.xlu0 %v1326_v59, %s4327_s24 }
0x1283   :  { %1394 = vrot.lane.b32.xlu1 %v1392_v62, %s4327_s24 }
0x12f3   :  { %v1329_v0 = vpop.permute.xlu0 %1328 }
0x12f4   :  { %v4695_v3 = vadd.f32 %v1329_v0, %v1321_v63  ;;  %v4754_v63 = vld [vmem:[#allocation7 + $0x18] sm:$0xff]  }
0x12f5   :  { %v1395_v5 = vpop.permute.xlu1 %1394 }
0x12f6   :  { %4165 = vtanh.f32 %v4695_v3  ;;  %v4699_v8 = vadd.f32 %v1395_v5, %v1387_v4  ;;  %v4765_v4 = vld [vmem:[#allocation7 + $0x38] sm:$0xff]   ;;  %v4772_v5 = vld [vmem:[#allocation7 + $0x28] sm:$0xff]  }
0x12f8   :  { %4167 = vtanh.f32 %v4699_v8 }
0x1303   :  { %v4166_v9 = vpop.eup %4165 }
0x1304   :  { %1334 = vrot.lane.b32.xlu0 %v4166_v9, %s4322_s18  ;;  %v4782_v9 = vld [vmem:[#allocation7 + $0x20] sm:$0xff]  }
0x1305   :  { %v4168_v10 = vpop.eup %4167 }
0x1306   :  { %1400 = vrot.lane.b32.xlu1 %v4168_v10, %s4322_s18 }
0x1376   :  { %v1335_v11 = vpop.permute.xlu0 %1334 }
0x1377   :  { %v4704_v12 = vmul.f32 %v1335_v11, %v1320_v57 }
0x1378   :  { %v1401_v13 = vpop.permute.xlu1 %1400 }
0x1379   :  { %v1405_v14 = vpack.c.bf16 %v4704_v12, %v4704_v12  ;;  %v1403_v15 = vmul.f32 %v1401_v13, %v1386_v60 }
0x137b   :  { %v1404_v16 = vpack.c.bf16 %v1403_v15, %v1403_v15  ;;  %1407 = vrot.lane.b32.xlu0 %v1405_v14, %s4327_s24 }
0x137d   :  { %1453 = vrot.lane.b32.xlu1 %v1404_v16, %s4327_s24 }
0x13ed   :  { %v1408_v17 = vpop.permute.xlu0 %1407 }
0x13ee   :  { %3829 = vmatmul.mubr.msk.bf16.vlgmr.msra.gmra.mxu1 %vm182_vm3, %v1408_v17 }
0x13ef   :  { %3841 = vmatpush3.bf16.msra.mxu1 %v4404_v6  ;;  %v1454_v19 = vpop.permute.xlu1 %1453  ;;  %3844 = vmatprep.mubr.msk.bf16.mxu1 %vm4325_vm0, %v4324_v1 }
0x13f0   :  { %3837 = vmatmul.mubr.msk.bf16.vlgmr.msra.gmra.mxu0 %vm182_vm3, %v1454_v19  ;;  %3842 = vmatprep.subr.bf16.mxu1 %v4324_v1 }
0x13f1   :  { %3849 = vmatpush3.bf16.msra.mxu0 %v4435_v35  ;;  %3852 = vmatprep.mubr.msk.bf16.mxu0 %vm4325_vm0, %v4324_v1 }
0x13f2   :  { %3850 = vmatprep.subr.bf16.mxu0 %v4324_v1 }
0x13f3   :  { %3843 = vmatpush3.bf16.msra.mxu1 %v4408_v7 }
0x13f4   :  { %3856 = vmatprep.subr.bf16.mxu1 %v4324_v1 }
0x13f5   :  { %3851 = vmatpush3.bf16.msra.mxu0 %v4438_v36 }
0x13f6   :  { %3845 = vmatmul.mubr.msk.bf16.vlgmr.msra.gmra.mxu1 %vm182_vm3, %v1454_v19  ;;  %3864 = vmatprep.subr.bf16.mxu0 %v4324_v1 }
0x13f7   :  { %3857 = vmatpush3.bf16.msra.mxu1 %v4442_v37  ;;  %3860 = vmatprep.mubr.msk.bf16.mxu1 %vm4325_vm0, %v4324_v1 }
0x13f8   :  { %3858 = vmatprep.subr.bf16.mxu1 %v4324_v1 }
0x13fb   :  { %3859 = vmatpush3.bf16.msra.mxu1 %v4447_v39 }
0x13fc   :  { %3872 = vmatprep.subr.bf16.mxu1 %v4324_v1 }
0x14ae   :  { %v1446_v6 = vpop.f32.mrf.mxu1 }
0x14af   :  { %v1447_v7 = vadd.f32 %v4472_v48, %v1446_v6 }
0x14b0   :  { %v3830_v35 = vpop.f32.mrf.mxu1  ;;  %v1492_v36 = vpop.f32.mrf.mxu0 }
0x14b1   :  { %v1493_v20 = vadd.f32 %v1492_v36, %v1447_v7 }
0x14b2   :  { %v1449_v22 = vpop.f32.mrf.mxu1  ;;  %v3838_v23 = vpop.f32.mrf.mxu0 }
0x14b3   :  { %4169 = vtanh.f32 %v1493_v20 }
0x14b4   :  { %v3831_v25 = vpop.f32.mrf.mxu1  ;;  %v1495_v37 = vpop.f32.mrf.mxu0 }
0x14b6   :  { %v3839_v26 = vpop.f32.mrf.mxu0  ;;  %v1557_v27 = vpop.f32.mrf.mxu1 }
0x14b7   :  { %v1563_v28 = vadd.f32 %v1557_v27, %v4427_v21 }
0x14b8   :  { %v3846_v29 = vpop.f32.mrf.mxu1 }
0x14b9   :  { %4171 = vtanh.f32 %v1563_v28 }
0x14ba   :  { %v1560_v39 = vpop.f32.mrf.mxu1 }
0x14bc   :  { %v3847_v30 = vpop.f32.mrf.mxu1 }
0x14c0   :  { %v4170_v31 = vpop.eup %4169 }
0x14c1   :  { %1503 = vrot.lane.b32.xlu0 %v4170_v31, %s4322_s18  ;;  %v1499_v33 = vmul.f32 0.5, %v4170_v31 }
0x14c3   :  { %v1500_v34 = vadd.f32 0.5, %v1499_v33 }
0x14c5   :  { %v1501_v46 = vmul.f32 %v1500_v34, %v4695_v3  ;;  %v4760_v3 = vld [vmem:[#allocation7 + $0x10] sm:$0xff]  }
0x14c6   :  { %v4172_v32 = vpop.eup %4171 }
0x14c7   :  { %1569 = vrot.lane.b32.xlu1 %v4172_v32, %s4322_s18  ;;  %v1565_v42 = vmul.f32 0.5, %v4172_v32 }
0x14c9   :  { %v1566_v43 = vadd.f32 0.5, %v1565_v42 }
0x14cb   :  { %v1567_v50 = vmul.f32 %v1566_v43, %v4699_v8  ;;  %v4778_v8 = vld [vmem:[#allocation7 + $0x30] sm:$0xff]  }
0x1533   :  { %v1504_v40 = vpop.permute.xlu0 %1503 }
0x1534   :  { %v1506_v41 = vmul.f32 %v1504_v40, %v1500_v34 }
0x1536   :  { %1508 = vrot.lane.b32.xlu0 %v1506_v41, %s4327_s24 }
0x1539   :  { %v1570_v44 = vpop.permute.xlu1 %1569 }
0x153a   :  { %v1572_v45 = vmul.f32 %v1570_v44, %v1566_v43 }
0x153c   :  { %1574 = vrot.lane.b32.xlu1 %v1572_v45, %s4327_s24 }
0x15a8   :  { %v1509_v47 = vpop.permute.xlu0 %1508 }
0x15a9   :  { %v4738_v49 = vadd.f32 %v1509_v47, %v1501_v46 }
0x15ab   :  { %4173 = vtanh.f32 %v4738_v49 }
0x15ae   :  { %v1575_v51 = vpop.permute.xlu1 %1574 }
0x15af   :  { %v4742_v53 = vadd.f32 %v1575_v51, %v1567_v50 }
0x15b1   :  { %4175 = vtanh.f32 %v4742_v53 }
0x15b8   :  { %v4174_v54 = vpop.eup %4173 }
0x15b9   :  { %1514 = vrot.lane.b32.xlu0 %v4174_v54, %s4322_s18 }
0x15be   :  { %v4176_v55 = vpop.eup %4175 }
0x15bf   :  { %1580 = vrot.lane.b32.xlu1 %v4176_v55, %s4322_s18 }
0x162b   :  { %v1515_v56 = vpop.permute.xlu0 %1514 }
0x162c   :  { %v4747_v57 = vmul.f32 %v1515_v56, %v1500_v34  ;;  %v4832_v56 = vld [vmem:[%s5214_s4 + $0x1] ss:$0 sm:$0xff] }
0x162e   :  { %v1585_v58 = vpack.c.bf16 %v4747_v57, %v4747_v57 }
0x1630   :  { %1587 = vrot.lane.b32.xlu0 %v1585_v58, %s4327_s24 }
0x1631   :  { %v1581_v59 = vpop.permute.xlu1 %1580 }
0x1632   :  { %v1583_v60 = vmul.f32 %v1581_v59, %v1566_v43 }
0x1634   :  { %v1584_v61 = vpack.c.bf16 %v1583_v60, %v1583_v60 }
0x1636   :  { %1633 = vrot.lane.b32.xlu1 %v1584_v61, %s4327_s24 }
0x16a2   :  { %v1588_v62 = vpop.permute.xlu0 %1587 }
0x16a3   :  { %3853 = vmatmul.mubr.msk.bf16.vlgmr.msra.gmra.mxu0 %vm182_vm3, %v1588_v62 }
0x16a4   :  { %3865 = vmatpush3.bf16.msra.mxu0 %v4754_v63  ;;  %3868 = vmatprep.mubr.msk.bf16.mxu0 %vm4325_vm0, %v4324_v1 }
0x16a5   :  { %3866 = vmatprep.subr.bf16.mxu0 %v4324_v1 }
0x16a8   :  { %v1634_v0 = vpop.permute.xlu1 %1633  ;;  %3867 = vmatpush3.bf16.msra.mxu0 %v4760_v3 }
0x16a9   :  { %3861 = vmatmul.mubr.msk.bf16.vlgmr.msra.gmra.mxu1 %vm182_vm3, %v1634_v0  ;;  %3880 = vmatprep.subr.bf16.mxu0 %v4324_v1 }
0x16aa   :  { %3873 = vmatpush3.bf16.msra.mxu1 %v4765_v4  ;;  %3876 = vmatprep.mubr.msk.bf16.mxu1 %vm4325_vm0, %v4324_v1 }
0x16ab   :  { %3869 = vmatmul.mubr.msk.bf16.vlgmr.msra.gmra.mxu0 %vm182_vm3, %v1634_v0  ;;  %3874 = vmatprep.subr.bf16.mxu1 %v4324_v1 }
0x16ac   :  { %3881 = vmatpush3.bf16.msra.mxu0 %v4772_v5  ;;  %3884 = vmatprep.mubr.msk.bf16.mxu0 %vm4325_vm0, %v4324_v1 }
0x16ad   :  { %3882 = vmatprep.subr.bf16.mxu0 %v4324_v1 }
0x16ae   :  { %3875 = vmatpush3.bf16.msra.mxu1 %v4778_v8 }
0x16af   :  { %3888 = vmatprep.subr.bf16.mxu1 %v4324_v1 }
0x16b0   :  { %3883 = vmatpush3.bf16.msra.mxu0 %v4782_v9 }
0x16b1   :  { %3896 = vmatprep.subr.bf16.mxu0 %v4324_v1 }
0x1763   :  { %v1626_v10 = vpop.f32.mrf.mxu0 }
0x1764   :  { %v1627_v14 = vadd.f32 %v4472_v48, %v1626_v10 }
0x1765   :  { %v3854_v11 = vpop.f32.mrf.mxu0 }
0x1767   :  { %v1629_v13 = vpop.f32.mrf.mxu0 }
0x1769   :  { %v3855_v15 = vpop.f32.mrf.mxu0  ;;  %v1672_v16 = vpop.f32.mrf.mxu1 }
0x176a   :  { %v1673_v17 = vadd.f32 %v1672_v16, %v1627_v14 }
0x176b   :  { %v3862_v19 = vpop.f32.mrf.mxu1  ;;  %v1737_v6 = vpop.f32.mrf.mxu0 }
0x176c   :  { %4177 = vtanh.f32 %v1673_v17  ;;  %v1743_v7 = vadd.f32 %v1737_v6, %v4427_v21 }
0x176d   :  { %v1675_v35 = vpop.f32.mrf.mxu1  ;;  %v3870_v36 = vpop.f32.mrf.mxu0 }
0x176e   :  { %4179 = vtanh.f32 %v1743_v7 }
0x176f   :  { %v3863_v20 = vpop.f32.mrf.mxu1  ;;  %v1740_v22 = vpop.f32.mrf.mxu0 }
0x1771   :  { %v3871_v23 = vpop.f32.mrf.mxu0 }
0x1779   :  { %v4178_v25 = vpop.eup %4177 }
0x177a   :  { %1683 = vrot.lane.b32.xlu0 %v4178_v25, %s4322_s18  ;;  %v1679_v48 = vmul.f32 0.5, %v4178_v25 }
0x177b   :  { %v4180_v37 = vpop.eup %4179 }
0x177c   :  { %1749 = vrot.lane.b32.xlu1 %v4180_v37, %s4322_s18  ;;  %v1745_v26 = vmul.f32 0.5, %v4180_v37  ;;  %v1680_v27 = vadd.f32 0.5, %v1679_v48 }
0x177e   :  { %v1746_v39 = vadd.f32 0.5, %v1745_v26  ;;  %v1681_v32 = vmul.f32 %v1680_v27, %v4738_v49 }
0x1780   :  { %v1747_v40 = vmul.f32 %v1746_v39, %v4742_v53 }
0x17ec   :  { %v1684_v28 = vpop.permute.xlu0 %1683 }
0x17ed   :  { %v1686_v29 = vmul.f32 %v1684_v28, %v1680_v27 }
0x17ee   :  { %v1750_v30 = vpop.permute.xlu1 %1749 }
0x17ef   :  { %v1752_v31 = vmul.f32 %v1750_v30, %v1746_v39  ;;  %1688 = vrot.lane.b32.xlu0 %v1686_v29, %s4327_s24 }
0x17f1   :  { %1754 = vrot.lane.b32.xlu1 %v1752_v31, %s4327_s24 }
0x1861   :  { %v1689_v33 = vpop.permute.xlu0 %1688 }
0x1862   :  { %v4793_v34 = vadd.f32 %v1689_v33, %v1681_v32 }
0x1863   :  { %v1755_v41 = vpop.permute.xlu1 %1754 }
0x1864   :  { %4181 = vtanh.f32 %v4793_v34  ;;  %v4797_v42 = vadd.f32 %v1755_v41, %v1747_v40 }
0x1866   :  { %4183 = vtanh.f32 %v4797_v42 }
0x1871   :  { %v4182_v43 = vpop.eup %4181 }
0x1872   :  { %1694 = vrot.lane.b32.xlu0 %v4182_v43, %s4322_s18 }
0x1873   :  { %v4184_v44 = vpop.eup %4183 }
0x1874   :  { %1760 = vrot.lane.b32.xlu1 %v4184_v44, %s4322_s18 }
0x18e4   :  { %v1695_v45 = vpop.permute.xlu0 %1694 }
0x18e5   :  { %v4802_v46 = vmul.f32 %v1695_v45, %v1680_v27 }
0x18e6   :  { %v1761_v47 = vpop.permute.xlu1 %1760 }
0x18e7   :  { %v1765_v49 = vpack.c.bf16 %v4802_v46, %v4802_v46  ;;  %v1763_v50 = vmul.f32 %v1761_v47, %v1746_v39 }
0x18e9   :  { %v1764_v51 = vpack.c.bf16 %v1763_v50, %v1763_v50  ;;  %1767 = vrot.lane.b32.xlu0 %v1765_v49, %s4327_s24 }
0x18eb   :  { %1813 = vrot.lane.b32.xlu1 %v1764_v51, %s4327_s24 }
0x195b   :  { %v1768_v53 = vpop.permute.xlu0 %1767 }
0x195c   :  { %3877 = vmatmul.mubr.msk.bf16.vlgmr.msra.gmra.mxu1 %vm182_vm3, %v1768_v53 }
0x195d   :  { %3889 = vmatpush3.bf16.msra.mxu1 %v4754_v63  ;;  %v1814_v54 = vpop.permute.xlu1 %1813  ;;  %3892 = vmatprep.mubr.msk.bf16.mxu1 %vm4325_vm0, %v4324_v1 }
0x195e   :  { %3885 = vmatmul.mubr.msk.bf16.vlgmr.msra.gmra.mxu0 %vm182_vm3, %v1814_v54  ;;  %3890 = vmatprep.subr.bf16.mxu1 %v4324_v1 }
0x195f   :  { %3897 = vmatpush3.bf16.msra.mxu0 %v4765_v4  ;;  %3900 = vmatprep.mubr.msk.bf16.mxu0 %vm4325_vm0, %v4324_v1 }
0x1960   :  { %3898 = vmatprep.subr.bf16.mxu0 %v4324_v1 }
0x1961   :  { %3891 = vmatpush3.bf16.msra.mxu1 %v4760_v3 }
0x1962   :  { %3904 = vmatprep.subr.bf16.mxu1 %v4324_v1 }
0x1963   :  { %3899 = vmatpush3.bf16.msra.mxu0 %v4778_v8 }
0x1964   :  { %3893 = vmatmul.mubr.msk.bf16.vlgmr.msra.gmra.mxu1 %vm182_vm3, %v1814_v54  ;;  %3912 = vmatprep.subr.bf16.mxu0 %v4324_v1 }
0x1965   :  { %3905 = vmatpush3.bf16.msra.mxu1 %v4772_v5  ;;  %3908 = vmatprep.mubr.msk.bf16.mxu1 %vm4325_vm0, %v4324_v1 }
0x1966   :  { %3906 = vmatprep.subr.bf16.mxu1 %v4324_v1 }
0x1969   :  { %3907 = vmatpush3.bf16.msra.mxu1 %v4782_v9 }
0x196a   :  { %3920 = vmatprep.subr.bf16.mxu1 %v4324_v1 }
0x1a1c   :  { %v1806_v55 = vpop.f32.mrf.mxu1 }
0x1a1d   :  { %v1807_v58 = vadd.f32 %v4832_v56, %v1806_v55 }
0x1a1e   :  { %v3878_v59 = vpop.f32.mrf.mxu1  ;;  %v1852_v60 = vpop.f32.mrf.mxu0 }
0x1a1f   :  { %v1853_v61 = vadd.f32 %v1852_v60, %v1807_v58 }
0x1a20   :  { %v1809_v62 = vpop.f32.mrf.mxu1  ;;  %v3886_v0 = vpop.f32.mrf.mxu0 }
0x1a21   :  { %4185 = vtanh.f32 %v1853_v61 }
0x1a22   :  { %v3879_v10 = vpop.f32.mrf.mxu1  ;;  %v1855_v11 = vpop.f32.mrf.mxu0 }
0x1a24   :  { %v3887_v13 = vpop.f32.mrf.mxu0  ;;  %v1917_v14 = vpop.f32.mrf.mxu1 }
0x1a25   :  { %v1923_v15 = vadd.f32 %v1917_v14, %v4427_v21 }
0x1a26   :  { %v3894_v16 = vpop.f32.mrf.mxu1 }
0x1a27   :  { %4187 = vtanh.f32 %v1923_v15 }
0x1a28   :  { %v1920_v17 = vpop.f32.mrf.mxu1 }
0x1a2a   :  { %v3895_v19 = vpop.f32.mrf.mxu1 }
0x1a2e   :  { %v4186_v6 = vpop.eup %4185 }
0x1a2f   :  { %1863 = vrot.lane.b32.xlu0 %v4186_v6, %s4322_s18  ;;  %v1859_v35 = vmul.f32 0.5, %v4186_v6 }
0x1a31   :  { %v1860_v36 = vadd.f32 0.5, %v1859_v35 }
0x1a33   :  { %v1861_v26 = vmul.f32 %v1860_v36, %v4793_v34 }
0x1a34   :  { %v4188_v7 = vpop.eup %4187 }
0x1a35   :  { %1929 = vrot.lane.b32.xlu1 %v4188_v7, %s4322_s18  ;;  %v1925_v23 = vmul.f32 0.5, %v4188_v7 }
0x1a37   :  { %v1926_v25 = vadd.f32 0.5, %v1925_v23 }
0x1a39   :  { %v1927_v29 = vmul.f32 %v1926_v25, %v4797_v42 }
0x1aa1   :  { %v1864_v20 = vpop.permute.xlu0 %1863 }
0x1aa2   :  { %v1866_v22 = vmul.f32 %v1864_v20, %v1860_v36 }
0x1aa4   :  { %1868 = vrot.lane.b32.xlu0 %v1866_v22, %s4327_s24 }
0x1aa7   :  { %v1930_v37 = vpop.permute.xlu1 %1929 }
0x1aa8   :  { %v1932_v48 = vmul.f32 %v1930_v37, %v1926_v25 }
0x1aaa   :  { %1934 = vrot.lane.b32.xlu1 %v1932_v48, %s4327_s24 }
0x1b16   :  { %v1869_v27 = vpop.permute.xlu0 %1868 }
0x1b17   :  { %v4841_v28 = vadd.f32 %v1869_v27, %v1861_v26 }
0x1b19   :  { %4189 = vtanh.f32 %v4841_v28 }
0x1b1c   :  { %v1935_v39 = vpop.permute.xlu1 %1934 }
0x1b1d   :  { %v4845_v30 = vadd.f32 %v1935_v39, %v1927_v29 }
0x1b1f   :  { %4191 = vtanh.f32 %v4845_v30 }
0x1b26   :  { %v4190_v31 = vpop.eup %4189 }
0x1b27   :  { %1874 = vrot.lane.b32.xlu0 %v4190_v31, %s4322_s18 }
0x1b2c   :  { %v4192_v32 = vpop.eup %4191 }
0x1b2d   :  { %1940 = vrot.lane.b32.xlu1 %v4192_v32, %s4322_s18 }
0x1b99   :  { %v1875_v33 = vpop.permute.xlu0 %1874 }
0x1b9a   :  { %v4850_v34 = vmul.f32 %v1875_v33, %v1860_v36 }
0x1b9c   :  { %v1945_v40 = vpack.c.bf16 %v4850_v34, %v4850_v34 }
0x1b9e   :  { %1947 = vrot.lane.b32.xlu0 %v1945_v40, %s4327_s24 }
0x1b9f   :  { %v1941_v41 = vpop.permute.xlu1 %1940 }
0x1ba0   :  { %v1943_v42 = vmul.f32 %v1941_v41, %v1926_v25 }
0x1ba2   :  { %v1944_v43 = vpack.c.bf16 %v1943_v42, %v1943_v42 }
0x1ba4   :  { %1993 = vrot.lane.b32.xlu1 %v1944_v43, %s4327_s24 }
0x1c10   :  { %v1948_v44 = vpop.permute.xlu0 %1947 }
0x1c11   :  { %3901 = vmatmul.mubr.msk.bf16.vlgmr.msra.gmra.mxu0 %vm182_vm3, %v1948_v44 }
0x1c12   :  { %3913 = vmatpush3.bf16.msra.mxu0 %v4754_v63  ;;  %3916 = vmatprep.mubr.msk.bf16.mxu0 %vm4325_vm0, %v4324_v1 }
0x1c13   :  { %3914 = vmatprep.subr.bf16.mxu0 %v4324_v1 }
0x1c16   :  { %v1994_v45 = vpop.permute.xlu1 %1993  ;;  %3915 = vmatpush3.bf16.msra.mxu0 %v4760_v3 }
0x1c17   :  { %3909 = vmatmul.mubr.msk.bf16.vlgmr.msra.gmra.mxu1 %vm182_vm3, %v1994_v45  ;;  %3928 = vmatprep.subr.bf16.mxu0 %v4324_v1 }
0x1c18   :  { %3921 = vmatpush3.bf16.msra.mxu1 %v4765_v4  ;;  %3924 = vmatprep.mubr.msk.bf16.mxu1 %vm4325_vm0, %v4324_v1 }
0x1c19   :  { %3917 = vmatmul.mubr.msk.bf16.vlgmr.msra.gmra.mxu0 %vm182_vm3, %v1994_v45  ;;  %3922 = vmatprep.subr.bf16.mxu1 %v4324_v1 }
0x1c1a   :  { %3929 = vmatpush3.bf16.msra.mxu0 %v4772_v5  ;;  %3932 = vmatprep.mubr.msk.bf16.mxu0 %vm4325_vm0, %v4324_v1 }
0x1c1b   :  { %3930 = vmatprep.subr.bf16.mxu0 %v4324_v1 }
0x1c1c   :  { %3923 = vmatpush3.bf16.msra.mxu1 %v4778_v8 }
0x1c1d   :  { %3936 = vmatprep.subr.bf16.mxu1 %v4324_v1 }
0x1c1e   :  { %3931 = vmatpush3.bf16.msra.mxu0 %v4782_v9 }
0x1c1f   :  { %3944 = vmatprep.subr.bf16.mxu0 %v4324_v1 }
0x1cd1   :  { %v1986_v47 = vpop.f32.mrf.mxu0 }
0x1cd2   :  { %v1987_v51 = vadd.f32 %v4832_v56, %v1986_v47 }
0x1cd3   :  { %v3902_v49 = vpop.f32.mrf.mxu0 }
0x1cd5   :  { %v1989_v50 = vpop.f32.mrf.mxu0 }
0x1cd7   :  { %v3903_v53 = vpop.f32.mrf.mxu0  ;;  %v2032_v54 = vpop.f32.mrf.mxu1 }
0x1cd8   :  { %v2033_v55 = vadd.f32 %v2032_v54, %v1987_v51 }
0x1cd9   :  { %v3910_v58 = vpop.f32.mrf.mxu1  ;;  %v2097_v59 = vpop.f32.mrf.mxu0 }
0x1cda   :  { %4193 = vtanh.f32 %v2033_v55  ;;  %v2103_v60 = vadd.f32 %v2097_v59, %v4427_v21 }
0x1cdb   :  { %v2035_v61 = vpop.f32.mrf.mxu1  ;;  %v3918_v62 = vpop.f32.mrf.mxu0 }
0x1cdc   :  { %4195 = vtanh.f32 %v2103_v60 }
0x1cdd   :  { %v3911_v0 = vpop.f32.mrf.mxu1  ;;  %v2100_v10 = vpop.f32.mrf.mxu0 }
0x1cdf   :  { %v3919_v11 = vpop.f32.mrf.mxu0 }
0x1ce7   :  { %v4194_v13 = vpop.eup %4193 }
0x1ce8   :  { %2043 = vrot.lane.b32.xlu0 %v4194_v13, %s4322_s18  ;;  %v2039_v15 = vmul.f32 0.5, %v4194_v13 }
0x1ce9   :  { %v4196_v14 = vpop.eup %4195 }
0x1cea   :  { %2109 = vrot.lane.b32.xlu1 %v4196_v14, %s4322_s18  ;;  %v2105_v16 = vmul.f32 0.5, %v4196_v14  ;;  %v2040_v17 = vadd.f32 0.5, %v2039_v15 }
0x1cec   :  { %v2106_v7 = vadd.f32 0.5, %v2105_v16  ;;  %v2041_v20 = vmul.f32 %v2040_v17, %v4841_v28 }
0x1cee   :  { %v2107_v25 = vmul.f32 %v2106_v7, %v4845_v30 }
0x1d5a   :  { %v2044_v19 = vpop.permute.xlu0 %2043 }
0x1d5b   :  { %v2046_v6 = vmul.f32 %v2044_v19, %v2040_v17 }
0x1d5c   :  { %v2110_v35 = vpop.permute.xlu1 %2109 }
0x1d5d   :  { %v2112_v36 = vmul.f32 %v2110_v35, %v2106_v7  ;;  %2048 = vrot.lane.b32.xlu0 %v2046_v6, %s4327_s24 }
0x1d5f   :  { %2114 = vrot.lane.b32.xlu1 %v2112_v36, %s4327_s24 }
0x1dcf   :  { %v2049_v22 = vpop.permute.xlu0 %2048 }
0x1dd0   :  { %v4884_v23 = vadd.f32 %v2049_v22, %v2041_v20 }
0x1dd1   :  { %v2115_v37 = vpop.permute.xlu1 %2114 }
0x1dd2   :  { %4197 = vtanh.f32 %v4884_v23  ;;  %v4888_v48 = vadd.f32 %v2115_v37, %v2107_v25 }
0x1dd4   :  { %4199 = vtanh.f32 %v4888_v48 }
0x1ddf   :  { %v4198_v26 = vpop.eup %4197 }
0x1de0   :  { %2054 = vrot.lane.b32.xlu0 %v4198_v26, %s4322_s18 }
0x1de1   :  { %v4200_v27 = vpop.eup %4199 }
0x1de2   :  { %2120 = vrot.lane.b32.xlu1 %v4200_v27, %s4322_s18 }
0x1e52   :  { %v2055_v29 = vpop.permute.xlu0 %2054 }
0x1e53   :  { %v4893_v28 = vmul.f32 %v2055_v29, %v2040_v17 }
0x1e54   :  { %v2121_v39 = vpop.permute.xlu1 %2120 }
0x1e55   :  { %v2125_v30 = vpack.c.bf16 %v4893_v28, %v4893_v28  ;;  %v2123_v31 = vmul.f32 %v2121_v39, %v2106_v7 }
0x1e57   :  { %v2124_v32 = vpack.c.bf16 %v2123_v31, %v2123_v31  ;;  %2127 = vrot.lane.b32.xlu0 %v2125_v30, %s4327_s24 }
0x1e59   :  { %2173 = vrot.lane.b32.xlu1 %v2124_v32, %s4327_s24 }
0x1ec9   :  { %v2128_v33 = vpop.permute.xlu0 %2127 }
0x1eca   :  { %3925 = vmatmul.mubr.msk.bf16.vlgmr.msra.gmra.mxu1 %vm182_vm3, %v2128_v33 }
0x1ecb   :  { %3937 = vmatpush3.bf16.msra.mxu1 %v4754_v63  ;;  %v2174_v40 = vpop.permute.xlu1 %2173  ;;  %3940 = vmatprep.mubr.msk.bf16.mxu1 %vm4325_vm0, %v4324_v1 }
0x1ecc   :  { %3933 = vmatmul.mubr.msk.bf16.vlgmr.msra.gmra.mxu0 %vm182_vm3, %v2174_v40  ;;  %3938 = vmatprep.subr.bf16.mxu1 %v4324_v1 }
0x1ecd   :  { %3945 = vmatpush3.bf16.msra.mxu0 %v4765_v4  ;;  %3948 = vmatprep.mubr.msk.bf16.mxu0 %vm4325_vm0, %v4324_v1 }
0x1ece   :  { %3946 = vmatprep.subr.bf16.mxu0 %v4324_v1 }
0x1ecf   :  { %3939 = vmatpush3.bf16.msra.mxu1 %v4760_v3 }
0x1ed0   :  { %3952 = vmatprep.subr.bf16.mxu1 %v4324_v1 }
0x1ed1   :  { %3947 = vmatpush3.bf16.msra.mxu0 %v4778_v8 }
0x1ed2   :  { %3941 = vmatmul.mubr.msk.bf16.vlgmr.msra.gmra.mxu1 %vm182_vm3, %v2174_v40  ;;  %3960 = vmatprep.subr.bf16.mxu0 %v4324_v1 }
0x1ed3   :  { %3953 = vmatpush3.bf16.msra.mxu1 %v4772_v5  ;;  %3956 = vmatprep.mubr.msk.bf16.mxu1 %vm4325_vm0, %v4324_v1 }
0x1ed4   :  { %3954 = vmatprep.subr.bf16.mxu1 %v4324_v1 }
0x1ed7   :  { %3955 = vmatpush3.bf16.msra.mxu1 %v4782_v9 }
0x1ed8   :  { %3968 = vmatprep.subr.bf16.mxu1 %v4324_v1 }
0x1f8a   :  { %v2166_v41 = vpop.f32.mrf.mxu1 }
0x1f8b   :  { %v2167_v42 = vadd.f32 %v4832_v56, %v2166_v41 }
0x1f8c   :  { %v3926_v43 = vpop.f32.mrf.mxu1  ;;  %v2212_v44 = vpop.f32.mrf.mxu0 }
0x1f8d   :  { %v2213_v45 = vadd.f32 %v2212_v44, %v2167_v42 }
0x1f8e   :  { %v2169_v47 = vpop.f32.mrf.mxu1  ;;  %v3934_v49 = vpop.f32.mrf.mxu0 }
0x1f8f   :  { %4201 = vtanh.f32 %v2213_v45 }
0x1f90   :  { %v3927_v50 = vpop.f32.mrf.mxu1  ;;  %v2215_v51 = vpop.f32.mrf.mxu0 }
0x1f92   :  { %v3935_v53 = vpop.f32.mrf.mxu0  ;;  %v2277_v54 = vpop.f32.mrf.mxu1 }
0x1f93   :  { %v2283_v55 = vadd.f32 %v2277_v54, %v4427_v21 }
0x1f94   :  { %v3942_v58 = vpop.f32.mrf.mxu1 }
0x1f95   :  { %4203 = vtanh.f32 %v2283_v55 }
0x1f96   :  { %v2280_v59 = vpop.f32.mrf.mxu1 }
0x1f98   :  { %v3943_v60 = vpop.f32.mrf.mxu1 }
0x1f9c   :  { %v4202_v61 = vpop.eup %4201 }
0x1f9d   :  { %2223 = vrot.lane.b32.xlu0 %v4202_v61, %s4322_s18  ;;  %v2219_v0 = vmul.f32 0.5, %v4202_v61 }
0x1f9f   :  { %v2220_v10 = vadd.f32 0.5, %v2219_v0 }
0x1fa1   :  { %v2221_v19 = vmul.f32 %v2220_v10, %v4884_v23 }
0x1fa2   :  { %v4204_v62 = vpop.eup %4203 }
0x1fa3   :  { %2289 = vrot.lane.b32.xlu1 %v4204_v62, %s4322_s18  ;;  %v2285_v14 = vmul.f32 0.5, %v4204_v62 }
0x1fa5   :  { %v2286_v15 = vadd.f32 0.5, %v2285_v14 }
0x1fa7   :  { %v2287_v35 = vmul.f32 %v2286_v15, %v4888_v48 }
0x200f   :  { %v2224_v11 = vpop.permute.xlu0 %2223 }
0x2010   :  { %v2226_v13 = vmul.f32 %v2224_v11, %v2220_v10 }
0x2012   :  { %2228 = vrot.lane.b32.xlu0 %v2226_v13, %s4327_s24 }
0x2015   :  { %v2290_v16 = vpop.permute.xlu1 %2289 }
0x2016   :  { %v2292_v17 = vmul.f32 %v2290_v16, %v2286_v15 }
0x2018   :  { %2294 = vrot.lane.b32.xlu1 %v2292_v17, %s4327_s24 }
0x2084   :  { %v2229_v6 = vpop.permute.xlu0 %2228 }
0x2085   :  { %v4927_v7 = vadd.f32 %v2229_v6, %v2221_v19 }
0x2087   :  { %4205 = vtanh.f32 %v4927_v7 }
0x208a   :  { %v2295_v36 = vpop.permute.xlu1 %2294 }
0x208b   :  { %v4931_v20 = vadd.f32 %v2295_v36, %v2287_v35 }
0x208d   :  { %4207 = vtanh.f32 %v4931_v20 }
0x2094   :  { %v4206_v22 = vpop.eup %4205 }
0x2095   :  { %2234 = vrot.lane.b32.xlu0 %v4206_v22, %s4322_s18 }
0x209a   :  { %v4208_v25 = vpop.eup %4207 }
0x209b   :  { %2300 = vrot.lane.b32.xlu1 %v4208_v25, %s4322_s18 }
0x2107   :  { %v2235_v37 = vpop.permute.xlu0 %2234 }
0x2108   :  { %v4936_v23 = vmul.f32 %v2235_v37, %v2220_v10 }
0x210a   :  { %v2305_v26 = vpack.c.bf16 %v4936_v23, %v4936_v23 }
0x210c   :  { %2307 = vrot.lane.b32.xlu0 %v2305_v26, %s4327_s24 }
0x210d   :  { %v2301_v48 = vpop.permute.xlu1 %2300 }
0x210e   :  { %v2303_v27 = vmul.f32 %v2301_v48, %v2286_v15 }
0x2110   :  { %v2304_v29 = vpack.c.bf16 %v2303_v27, %v2303_v27 }
0x2112   :  { %2353 = vrot.lane.b32.xlu1 %v2304_v29, %s4327_s24 }
0x217e   :  { %v2308_v39 = vpop.permute.xlu0 %2307 }
0x217f   :  { %3949 = vmatmul.mubr.msk.bf16.vlgmr.msra.gmra.mxu0 %vm182_vm3, %v2308_v39 }
0x2180   :  { %3961 = vmatpush3.bf16.msra.mxu0 %v4754_v63  ;;  %3964 = vmatprep.mubr.msk.bf16.mxu0 %vm4325_vm0, %v4324_v1 }
0x2181   :  { %3962 = vmatprep.subr.bf16.mxu0 %v4324_v1 }
0x2184   :  { %v2354_v30 = vpop.permute.xlu1 %2353  ;;  %3963 = vmatpush3.bf16.msra.mxu0 %v4760_v3 }
0x2185   :  { %3957 = vmatmul.mubr.msk.bf16.vlgmr.msra.gmra.mxu1 %vm182_vm3, %v2354_v30  ;;  %3976 = vmatprep.subr.bf16.mxu0 %v4324_v1 }
0x2186   :  { %3969 = vmatpush3.bf16.msra.mxu1 %v4765_v4  ;;  %3972 = vmatprep.mubr.msk.bf16.mxu1 %vm4325_vm0, %v4324_v1 }
0x2187   :  { %3965 = vmatmul.mubr.msk.bf16.vlgmr.msra.gmra.mxu0 %vm182_vm3, %v2354_v30  ;;  %3970 = vmatprep.subr.bf16.mxu1 %v4324_v1 }
0x2188   :  { %3977 = vmatpush3.bf16.msra.mxu0 %v4772_v5  ;;  %3980 = vmatprep.mubr.msk.bf16.mxu0 %vm4325_vm0, %v4324_v1 }
0x2189   :  { %3978 = vmatprep.subr.bf16.mxu0 %v4324_v1 }
0x218a   :  { %3971 = vmatpush3.bf16.msra.mxu1 %v4778_v8 }
0x218b   :  { %3984 = vmatprep.subr.bf16.mxu1 %v4324_v1 }
0x218c   :  { %3979 = vmatpush3.bf16.msra.mxu0 %v4782_v9 }
0x218d   :  { %3992 = vmatprep.subr.bf16.mxu0 %v4324_v1 }
0x223f   :  { %v2346_v31 = vpop.f32.mrf.mxu0 }
0x2240   :  { %v2347_v40 = vadd.f32 %v4832_v56, %v2346_v31 }
0x2241   :  { %v3950_v32 = vpop.f32.mrf.mxu0 }
0x2243   :  { %v2349_v33 = vpop.f32.mrf.mxu0 }
0x2245   :  { %v3951_v41 = vpop.f32.mrf.mxu0  ;;  %v2392_v42 = vpop.f32.mrf.mxu1 }
0x2246   :  { %v2393_v43 = vadd.f32 %v2392_v42, %v2347_v40 }
0x2247   :  { %v3958_v44 = vpop.f32.mrf.mxu1  ;;  %v2457_v45 = vpop.f32.mrf.mxu0 }
0x2248   :  { %4209 = vtanh.f32 %v2393_v43  ;;  %v2463_v47 = vadd.f32 %v2457_v45, %v4427_v21 }
0x2249   :  { %v2395_v49 = vpop.f32.mrf.mxu1  ;;  %v3966_v50 = vpop.f32.mrf.mxu0 }
0x224a   :  { %4211 = vtanh.f32 %v2463_v47 }
0x224b   :  { %v3959_v51 = vpop.f32.mrf.mxu1  ;;  %v2460_v53 = vpop.f32.mrf.mxu0 }
0x224d   :  { %v3967_v54 = vpop.f32.mrf.mxu0 }
0x2255   :  { %v4210_v55 = vpop.eup %4209 }
0x2256   :  { %2403 = vrot.lane.b32.xlu0 %v4210_v55, %s4322_s18  ;;  %v2399_v59 = vmul.f32 0.5, %v4210_v55 }
0x2257   :  { %v4212_v58 = vpop.eup %4211 }
0x2258   :  { %2469 = vrot.lane.b32.xlu1 %v4212_v58, %s4322_s18  ;;  %v2465_v60 = vmul.f32 0.5, %v4212_v58  ;;  %v2400_v61 = vadd.f32 0.5, %v2399_v59 }
0x225a   :  { %v2466_v10 = vadd.f32 0.5, %v2465_v60  ;;  %v2401_v14 = vmul.f32 %v2400_v61, %v4927_v7 }
0x225c   :  { %v2467_v17 = vmul.f32 %v2466_v10, %v4931_v20 }
0x22c8   :  { %v2404_v62 = vpop.permute.xlu0 %2403 }
0x22c9   :  { %v2406_v0 = vmul.f32 %v2404_v62, %v2400_v61 }
0x22ca   :  { %v2470_v11 = vpop.permute.xlu1 %2469 }
0x22cb   :  { %v2472_v13 = vmul.f32 %v2470_v11, %v2466_v10  ;;  %2408 = vrot.lane.b32.xlu0 %v2406_v0, %s4327_s24 }
0x22cd   :  { %2474 = vrot.lane.b32.xlu1 %v2472_v13, %s4327_s24 }
0x233d   :  { %v2409_v15 = vpop.permute.xlu0 %2408 }
0x233e   :  { %v4970_v16 = vadd.f32 %v2409_v15, %v2401_v14 }
0x233f   :  { %v2475_v19 = vpop.permute.xlu1 %2474 }
0x2340   :  { %4213 = vtanh.f32 %v4970_v16  ;;  %v4974_v6 = vadd.f32 %v2475_v19, %v2467_v17 }
0x2342   :  { %4215 = vtanh.f32 %v4974_v6 }
0x234d   :  { %v4214_v35 = vpop.eup %4213 }
0x234e   :  { %2414 = vrot.lane.b32.xlu0 %v4214_v35, %s4322_s18 }
0x234f   :  { %v4216_v36 = vpop.eup %4215 }
0x2350   :  { %2480 = vrot.lane.b32.xlu1 %v4216_v36, %s4322_s18 }
0x23c0   :  { %v2415_v22 = vpop.permute.xlu0 %2414 }
0x23c1   :  { %v4979_v7 = vmul.f32 %v2415_v22, %v2400_v61 }
0x23c2   :  { %v2481_v25 = vpop.permute.xlu1 %2480 }
0x23c3   :  { %v2485_v20 = vpack.c.bf16 %v4979_v7, %v4979_v7  ;;  %v2483_v37 = vmul.f32 %v2481_v25, %v2466_v10 }
0x23c5   :  { %v2484_v26 = vpack.c.bf16 %v2483_v37, %v2483_v37  ;;  %2487 = vrot.lane.b32.xlu0 %v2485_v20, %s4327_s24 }
0x23c7   :  { %2533 = vrot.lane.b32.xlu1 %v2484_v26, %s4327_s24 }
0x2437   :  { %v2488_v48 = vpop.permute.xlu0 %2487 }
0x2438   :  { %3973 = vmatmul.mubr.msk.bf16.vlgmr.msra.gmra.mxu1 %vm182_vm3, %v2488_v48 }
0x2439   :  { %3985 = vmatpush3.bf16.msra.mxu1 %v4754_v63  ;;  %v2534_v27 = vpop.permute.xlu1 %2533  ;;  %3988 = vmatprep.mubr.msk.bf16.mxu1 %vm4325_vm0, %v4324_v1 }
0x243a   :  { %3981 = vmatmul.mubr.msk.bf16.vlgmr.msra.gmra.mxu0 %vm182_vm3, %v2534_v27  ;;  %3986 = vmatprep.subr.bf16.mxu1 %v4324_v1 }
0x243b   :  { %3993 = vmatpush3.bf16.msra.mxu0 %v4765_v4  ;;  %3996 = vmatprep.mubr.msk.bf16.mxu0 %vm4325_vm0, %v4324_v1 }
0x243c   :  { %3994 = vmatprep.subr.bf16.mxu0 %v4324_v1 }
0x243d   :  { %3987 = vmatpush3.bf16.msra.mxu1 %v4760_v3 }
0x243e   :  { %4000 = vmatprep.subr.bf16.mxu1 %v4324_v1 }
0x243f   :  { %3995 = vmatpush3.bf16.msra.mxu0 %v4778_v8 }
0x2440   :  { %3989 = vmatmul.mubr.msk.bf16.vlgmr.msra.gmra.mxu1 %vm182_vm3, %v2534_v27  ;;  %4008 = vmatprep.subr.bf16.mxu0 %v4324_v1 }
0x2441   :  { %4001 = vmatpush3.bf16.msra.mxu1 %v4772_v5  ;;  %4004 = vmatprep.mubr.msk.bf16.mxu1 %vm4325_vm0, %v4324_v1 }
0x2442   :  { %4002 = vmatprep.subr.bf16.mxu1 %v4324_v1 }
0x2445   :  { %4003 = vmatpush3.bf16.msra.mxu1 %v4782_v9 }
0x2446   :  { %4016 = vmatprep.subr.bf16.mxu1 %v4324_v1 }
0x24f8   :  { %v2526_v29 = vpop.f32.mrf.mxu1 }
0x24f9   :  { %v2527_v39 = vadd.f32 %v4832_v56, %v2526_v29 }
0x24fa   :  { %v3974_v30 = vpop.f32.mrf.mxu1  ;;  %v2572_v31 = vpop.f32.mrf.mxu0 }
0x24fb   :  { %v2573_v32 = vadd.f32 %v2572_v31, %v2527_v39 }
0x24fc   :  { %v2529_v33 = vpop.f32.mrf.mxu1  ;;  %v3982_v40 = vpop.f32.mrf.mxu0 }
0x24fd   :  { %4217 = vtanh.f32 %v2573_v32 }
0x24fe   :  { %v3975_v41 = vpop.f32.mrf.mxu1  ;;  %v2575_v42 = vpop.f32.mrf.mxu0 }
0x2500   :  { %v3983_v43 = vpop.f32.mrf.mxu0  ;;  %v2637_v44 = vpop.f32.mrf.mxu1 }
0x2501   :  { %v2643_v45 = vadd.f32 %v2637_v44, %v4427_v21 }
0x2502   :  { %v3990_v47 = vpop.f32.mrf.mxu1 }
0x2503   :  { %4219 = vtanh.f32 %v2643_v45 }
0x2504   :  { %v2640_v49 = vpop.f32.mrf.mxu1 }
0x2506   :  { %v3991_v50 = vpop.f32.mrf.mxu1 }
0x250a   :  { %v4218_v51 = vpop.eup %4217 }
0x250b   :  { %2583 = vrot.lane.b32.xlu0 %v4218_v51, %s4322_s18  ;;  %v2579_v54 = vmul.f32 0.5, %v4218_v51 }
0x250d   :  { %v2580_v55 = vadd.f32 0.5, %v2579_v54 }
0x250f   :  { %v2581_v10 = vmul.f32 %v2580_v55, %v4970_v16 }
0x2510   :  { %v4220_v53 = vpop.eup %4219 }
0x2511   :  { %2649 = vrot.lane.b32.xlu1 %v4220_v53, %s4322_s18  ;;  %v2645_v60 = vmul.f32 0.5, %v4220_v53 }
0x2513   :  { %v2646_v61 = vadd.f32 0.5, %v2645_v60 }
0x2515   :  { %v2647_v14 = vmul.f32 %v2646_v61, %v4974_v6 }
0x257d   :  { %v2584_v58 = vpop.permute.xlu0 %2583 }
0x257e   :  { %v2586_v59 = vmul.f32 %v2584_v58, %v2580_v55 }
0x2580   :  { %2588 = vrot.lane.b32.xlu0 %v2586_v59, %s4327_s24 }
0x2583   :  { %v2650_v62 = vpop.permute.xlu1 %2649 }
0x2584   :  { %v2652_v0 = vmul.f32 %v2650_v62, %v2646_v61 }
0x2586   :  { %2654 = vrot.lane.b32.xlu1 %v2652_v0, %s4327_s24 }
0x25f2   :  { %v2589_v11 = vpop.permute.xlu0 %2588 }
0x25f3   :  { %v5013_v13 = vadd.f32 %v2589_v11, %v2581_v10 }
0x25f5   :  { %4221 = vtanh.f32 %v5013_v13 }
0x25f8   :  { %v2655_v15 = vpop.permute.xlu1 %2654 }
0x25f9   :  { %v5017_v17 = vadd.f32 %v2655_v15, %v2647_v14 }
0x25fb   :  { %4223 = vtanh.f32 %v5017_v17 }
0x2602   :  { %v4222_v19 = vpop.eup %4221 }
0x2603   :  { %2594 = vrot.lane.b32.xlu0 %v4222_v19, %s4322_s18 }
0x2608   :  { %v4224_v35 = vpop.eup %4223 }
0x2609   :  { %2660 = vrot.lane.b32.xlu1 %v4224_v35, %s4322_s18 }
0x2675   :  { %v2595_v36 = vpop.permute.xlu0 %2594 }
0x2676   :  { %v5022_v16 = vmul.f32 %v2595_v36, %v2580_v55 }
0x2678   :  { %v2665_v22 = vpack.c.bf16 %v5022_v16, %v5022_v16 }
0x267a   :  { %2667 = vrot.lane.b32.xlu0 %v2665_v22, %s4327_s24 }
0x267b   :  { %v2661_v6 = vpop.permute.xlu1 %2660 }
0x267c   :  { %v2663_v25 = vmul.f32 %v2661_v6, %v2646_v61 }
0x267e   :  { %v2664_v20 = vpack.c.bf16 %v2663_v25, %v2663_v25 }
0x2680   :  { %2713 = vrot.lane.b32.xlu1 %v2664_v20, %s4327_s24 }
0x26ec   :  { %v2668_v37 = vpop.permute.xlu0 %2667 }
0x26ed   :  { %3997 = vmatmul.mubr.msk.bf16.vlgmr.msra.gmra.mxu0 %vm182_vm3, %v2668_v37 }
0x26ee   :  { %4009 = vmatpush3.bf16.msra.mxu0 %v4754_v63  ;;  %4012 = vmatprep.mubr.msk.bf16.mxu0 %vm4325_vm0, %v4324_v1 }
0x26ef   :  { %4010 = vmatprep.subr.bf16.mxu0 %v4324_v1 }
0x26f2   :  { %v2714_v26 = vpop.permute.xlu1 %2713  ;;  %4011 = vmatpush3.bf16.msra.mxu0 %v4760_v3 }
0x26f3   :  { %4005 = vmatmul.mubr.msk.bf16.vlgmr.msra.gmra.mxu1 %vm182_vm3, %v2714_v26  ;;  %4024 = vmatprep.subr.bf16.mxu0 %v4324_v1 }
0x26f4   :  { %4017 = vmatpush3.bf16.msra.mxu1 %v4765_v4  ;;  %4020 = vmatprep.mubr.msk.bf16.mxu1 %vm4325_vm0, %v4324_v1 }
0x26f5   :  { %4013 = vmatmul.mubr.msk.bf16.vlgmr.msra.gmra.mxu0 %vm182_vm3, %v2714_v26  ;;  %4018 = vmatprep.subr.bf16.mxu1 %v4324_v1 }
0x26f6   :  { %4025 = vmatpush3.bf16.msra.mxu0 %v4772_v5  ;;  %4028 = vmatprep.mubr.msk.bf16.mxu0 %vm4325_vm0, %v4324_v1 }
0x26f7   :  { %4026 = vmatprep.subr.bf16.mxu0 %v4324_v1 }
0x26f8   :  { %4019 = vmatpush3.bf16.msra.mxu1 %v4778_v8 }
0x26f9   :  { %4032 = vmatprep.subr.bf16.mxu1 %v4324_v1 }
0x26fa   :  { %4027 = vmatpush3.bf16.msra.mxu0 %v4782_v9 }
0x26fb   :  { %4040 = vmatprep.subr.bf16.mxu0 %v4324_v1 }
0x27ad   :  { %v2706_v48 = vpop.f32.mrf.mxu0 }
0x27ae   :  { %v2707_v39 = vadd.f32 %v4832_v56, %v2706_v48 }
0x27af   :  { %v3998_v27 = vpop.f32.mrf.mxu0 }
0x27b1   :  { %v2709_v29 = vpop.f32.mrf.mxu0 }
0x27b3   :  { %v3999_v30 = vpop.f32.mrf.mxu0  ;;  %v2752_v31 = vpop.f32.mrf.mxu1 }
0x27b4   :  { %v2753_v32 = vadd.f32 %v2752_v31, %v2707_v39 }
0x27b5   :  { %v4006_v33 = vpop.f32.mrf.mxu1  ;;  %v2817_v40 = vpop.f32.mrf.mxu0 }
0x27b6   :  { %4225 = vtanh.f32 %v2753_v32  ;;  %v2823_v41 = vadd.f32 %v2817_v40, %v4427_v21 }
0x27b7   :  { %v2755_v42 = vpop.f32.mrf.mxu1  ;;  %v4014_v43 = vpop.f32.mrf.mxu0 }
0x27b8   :  { %4227 = vtanh.f32 %v2823_v41 }
0x27b9   :  { %v4007_v44 = vpop.f32.mrf.mxu1  ;;  %v2820_v45 = vpop.f32.mrf.mxu0 }
0x27bb   :  { %v4015_v47 = vpop.f32.mrf.mxu0 }
0x27c3   :  { %v4226_v49 = vpop.eup %4225 }
0x27c4   :  { %2763 = vrot.lane.b32.xlu0 %v4226_v49, %s4322_s18  ;;  %v2759_v51 = vmul.f32 0.5, %v4226_v49 }
0x27c5   :  { %v4228_v50 = vpop.eup %4227 }
0x27c6   :  { %2829 = vrot.lane.b32.xlu1 %v4228_v50, %s4322_s18  ;;  %v2825_v53 = vmul.f32 0.5, %v4228_v50  ;;  %v2760_v54 = vadd.f32 0.5, %v2759_v51 }
0x27c8   :  { %v2826_v59 = vadd.f32 0.5, %v2825_v53  ;;  %v2761_v62 = vmul.f32 %v2760_v54, %v5013_v13 }
0x27ca   :  { %v2827_v11 = vmul.f32 %v2826_v59, %v5017_v17 }
0x2836   :  { %v2764_v55 = vpop.permute.xlu0 %2763 }
0x2837   :  { %v2766_v58 = vmul.f32 %v2764_v55, %v2760_v54 }
0x2838   :  { %v2830_v60 = vpop.permute.xlu1 %2829 }
0x2839   :  { %v2832_v61 = vmul.f32 %v2830_v60, %v2826_v59  ;;  %2768 = vrot.lane.b32.xlu0 %v2766_v58, %s4327_s24 }
0x283b   :  { %2834 = vrot.lane.b32.xlu1 %v2832_v61, %s4327_s24 }
0x28ab   :  { %v2769_v0 = vpop.permute.xlu0 %2768 }
0x28ac   :  { %v5056_v10 = vadd.f32 %v2769_v0, %v2761_v62 }
0x28ad   :  { %v2835_v14 = vpop.permute.xlu1 %2834 }
0x28ae   :  { %4229 = vtanh.f32 %v5056_v10  ;;  %v5060_v15 = vadd.f32 %v2835_v14, %v2827_v11 }
0x28b0   :  { %4231 = vtanh.f32 %v5060_v15 }
0x28bb   :  { %v4230_v19 = vpop.eup %4229 }
0x28bc   :  { %2774 = vrot.lane.b32.xlu0 %v4230_v19, %s4322_s18 }
0x28bd   :  { %v4232_v35 = vpop.eup %4231 }
0x28be   :  { %2840 = vrot.lane.b32.xlu1 %v4232_v35, %s4322_s18 }
0x292e   :  { %v2775_v36 = vpop.permute.xlu0 %2774 }
0x292f   :  { %v5065_v13 = vmul.f32 %v2775_v36, %v2760_v54 }
0x2930   :  { %v2841_v22 = vpop.permute.xlu1 %2840 }
0x2931   :  { %v2845_v17 = vpack.c.bf16 %v5065_v13, %v5065_v13  ;;  %v2843_v6 = vmul.f32 %v2841_v22, %v2826_v59 }
0x2933   :  { %v2844_v25 = vpack.c.bf16 %v2843_v6, %v2843_v6  ;;  %2847 = vrot.lane.b32.xlu0 %v2845_v17, %s4327_s24 }
0x2935   :  { %2893 = vrot.lane.b32.xlu1 %v2844_v25, %s4327_s24 }
0x29a5   :  { %v2848_v20 = vpop.permute.xlu0 %2847 }
0x29a6   :  { %4021 = vmatmul.mubr.msk.bf16.vlgmr.msra.gmra.mxu1 %vm182_vm3, %v2848_v20 }
0x29a7   :  { %4033 = vmatpush3.bf16.msra.mxu1 %v4754_v63  ;;  %v2894_v37 = vpop.permute.xlu1 %2893  ;;  %4036 = vmatprep.mubr.msk.bf16.mxu1 %vm4325_vm0, %v4324_v1 }
0x29a8   :  { %4029 = vmatmul.mubr.msk.bf16.vlgmr.msra.gmra.mxu0 %vm182_vm3, %v2894_v37  ;;  %4034 = vmatprep.subr.bf16.mxu1 %v4324_v1 }
0x29a9   :  { %4041 = vmatpush3.bf16.msra.mxu0 %v4765_v4  ;;  %4044 = vmatprep.mubr.msk.bf16.mxu0 %vm4325_vm0, %v4324_v1 }
0x29aa   :  { %4042 = vmatprep.subr.bf16.mxu0 %v4324_v1 }
0x29ab   :  { %4035 = vmatpush3.bf16.msra.mxu1 %v4760_v3 }
0x29ac   :  { %4048 = vmatprep.subr.bf16.mxu1 %v4324_v1 }
0x29ad   :  { %4043 = vmatpush3.bf16.msra.mxu0 %v4778_v8 }
0x29ae   :  { %4037 = vmatmul.mubr.msk.bf16.vlgmr.msra.gmra.mxu1 %vm182_vm3, %v2894_v37 }
0x29af   :  { %4049 = vmatpush3.bf16.msra.mxu1 %v4772_v5  ;;  %4052 = vmatprep.mubr.msk.bf16.mxu1 %vm4325_vm0, %v4324_v1 }
0x29b0   :  { %4050 = vmatprep.subr.bf16.mxu1 %v4324_v1 }
0x29b3   :  { %4051 = vmatpush3.bf16.msra.mxu1 %v4782_v9 }
0x29b4   :  { %4091 = vmatprep.subr.mxu1 %v4324_v1 }
0x2a66   :  { %v2886_v63 = vpop.f32.mrf.mxu1 }
0x2a67   :  { %v2887_v3 = vadd.f32 %v4832_v56, %v2886_v63 }
0x2a68   :  { %v4022_v4 = vpop.f32.mrf.mxu1  ;;  %v2932_v26 = vpop.f32.mrf.mxu0 }
0x2a69   :  { %v2933_v48 = vadd.f32 %v2932_v26, %v2887_v3 }
0x2a6a   :  { %v2889_v8 = vpop.f32.mrf.mxu1  ;;  %v4030_v27 = vpop.f32.mrf.mxu0 }
0x2a6b   :  { %4233 = vtanh.f32 %v2933_v48 }
0x2a6c   :  { %v4023_v29 = vpop.f32.mrf.mxu1  ;;  %v2935_v5 = vpop.f32.mrf.mxu0 }
0x2a6e   :  { %v4031_v39 = vpop.f32.mrf.mxu0  ;;  %v2997_v30 = vpop.f32.mrf.mxu1 }
0x2a6f   :  { %v3003_v31 = vadd.f32 %v2997_v30, %v4427_v21 }
0x2a70   :  { %v4038_v32 = vpop.f32.mrf.mxu1 }
0x2a71   :  { %4235 = vtanh.f32 %v3003_v31 }
0x2a72   :  { %v3000_v9 = vpop.f32.mrf.mxu1 }
0x2a74   :  { %v4039_v33 = vpop.f32.mrf.mxu1 }
0x2a78   :  { %v4234_v40 = vpop.eup %4233 }
0x2a79   :  { %2943 = vrot.lane.b32.xlu0 %v4234_v40, %s4322_s18  ;;  %v2939_v42 = vmul.f32 0.5, %v4234_v40 }
0x2a7b   :  { %v2940_v43 = vadd.f32 0.5, %v2939_v42 }
0x2a7d   :  { %v2941_v51 = vmul.f32 %v2940_v43, %v5056_v10 }
0x2a7e   :  { %v4236_v41 = vpop.eup %4235 }
0x2a7f   :  { %3009 = vrot.lane.b32.xlu1 %v4236_v41, %s4322_s18  ;;  %v3005_v47 = vmul.f32 0.5, %v4236_v41 }
0x2a81   :  { %v3006_v49 = vadd.f32 0.5, %v3005_v47 }
0x2a83   :  { %v3007_v55 = vmul.f32 %v3006_v49, %v5060_v15 }
0x2aeb   :  { %v2944_v44 = vpop.permute.xlu0 %2943 }
0x2aec   :  { %v2946_v45 = vmul.f32 %v2944_v44, %v2940_v43 }
0x2aee   :  { %2948 = vrot.lane.b32.xlu0 %v2946_v45, %s4327_s24 }
0x2af1   :  { %v3010_v50 = vpop.permute.xlu1 %3009 }
0x2af2   :  { %v3012_v21 = vmul.f32 %v3010_v50, %v3006_v49 }
0x2af4   :  { %3014 = vrot.lane.b32.xlu1 %v3012_v21, %s4327_s24 }
0x2b60   :  { %v2949_v53 = vpop.permute.xlu0 %2948 }
0x2b61   :  { %v2951_v54 = vadd.f32 %v2949_v53, %v2941_v51 }
0x2b63   :  { %4237 = vtanh.f32 %v2951_v54 }
0x2b66   :  { %v3015_v58 = vpop.permute.xlu1 %3014 }
0x2b67   :  { %v3017_v59 = vadd.f32 %v3015_v58, %v3007_v55 }
0x2b69   :  { %4239 = vtanh.f32 %v3017_v59 }
0x2b70   :  { %v4238_v60 = vpop.eup %4237 }
0x2b71   :  { %2954 = vrot.lane.b32.xlu0 %v4238_v60, %s4322_s18 }
0x2b76   :  { %v4240_v61 = vpop.eup %4239 }
0x2b77   :  { %3020 = vrot.lane.b32.xlu1 %v4240_v61, %s4322_s18 }
0x2be3   :  { %v2955_v62 = vpop.permute.xlu0 %2954 }
0x2be4   :  { %v2957_v0 = vmul.f32 %v2955_v62, %v2940_v43 }
0x2be6   :  { %v3025_v11 = vpack.c.bf16 %v2957_v0, %v2957_v0 }
0x2be8   :  { %3027 = vrot.lane.b32.xlu0 %v3025_v11, %s4327_s24  ;;  %v3160_v11 = vld [vmem:[%s5215_s5 + $0x8] sm:$0xff] }
0x2be9   :  { %v3021_v10 = vpop.permute.xlu1 %3020 }
0x2bea   :  { %v3023_v14 = vmul.f32 %v3021_v10, %v3006_v49 }
0x2bec   :  { %v3024_v19 = vpack.c.bf16 %v3023_v14, %v3023_v14 }
0x2bee   :  { %3073 = vrot.lane.b32.xlu1 %v3024_v19, %s4327_s24 }
0x2c5a   :  { %v3028_v15 = vpop.permute.xlu0 %3027 }
0x2c5b   :  { %4045 = vmatmul.mubr.msk.bf16.vlgmr.msra.gmra.mxu0 %vm182_vm3, %v3028_v15 }
0x2c60   :  { %v3074_v35 = vpop.permute.xlu1 %3073 }
0x2c61   :  { %4053 = vmatmul.mubr.msk.bf16.vlgmr.msra.gmra.mxu1 %vm182_vm3, %v3074_v35 }
0x2c62   :  { %4095 = vmatprep.mubr.msk.f32.mxu1 %vm4325_vm0, %v4324_v1 }
0x2d1b   :  { %v3066_v36 = vpop.f32.mrf.mxu0 }
0x2d1c   :  { %v3067_v6 = vadd.f32 %v4832_v56, %v3066_v36 }
0x2d1d   :  { %v4046_v22 = vpop.f32.mrf.mxu0 }
0x2d1f   :  { %v3069_v17 = vpop.f32.mrf.mxu0 }
0x2d21   :  { %v4047_v25 = vpop.f32.mrf.mxu0  ;;  %v3112_v20 = vpop.f32.mrf.mxu1 }
0x2d22   :  { %v3113_v37 = vadd.f32 %v3112_v20, %v3067_v6  ;;  %v3308_v25 = vld [vmem:[%s5217_s7] sm:$0x1] }
0x2d23   :  { %v4054_v63 = vpop.f32.mrf.mxu1 }
0x2d24   :  { %4241 = vtanh.f32 %v3113_v37  ;;  %v3315_v37 = vlaneseq }
0x2d25   :  { %v3115_v3 = vpop.f32.mrf.mxu1 }
0x2d26   :  { %v3316_v63 = vshrl.u32 %v3315_v37, 7 }
0x2d27   :  { %v4055_v4 = vpop.f32.mrf.mxu1 }
0x2d28   :  { %v3317_v3 = vsub.s32 0, %v3316_v63 }
0x2d31   :  { %v4242_v26 = vpop.eup %4241 }
0x2d32   :  { %3123 = vrot.lane.b32.xlu0 %v4242_v26, %s4322_s18  ;;  %v3119_v48 = vmul.f32 0.5, %v4242_v26 }
0x2d34   :  { %v3120_v8 = vadd.f32 0.5, %v3119_v48 }
0x2d36   :  { %v3121_v5 = vmul.f32 %v3120_v8, %v2951_v54 }
0x2da4   :  { %v3124_v27 = vpop.permute.xlu0 %3123 }
0x2da5   :  { %v3126_v29 = vmul.f32 %v3124_v27, %v3120_v8 }
0x2da7   :  { %3128 = vrot.lane.b32.xlu1 %v3126_v29, %s4327_s24 }
0x2e19   :  { %v3129_v39 = vpop.permute.xlu1 %3128 }
0x2e1a   :  { %v3131_v30 = vadd.f32 %v3129_v39, %v3121_v5 }
0x2e1c   :  { %4243 = vtanh.f32 %v3131_v30 }
0x2e29   :  { %v4244_v56 = vpop.eup %4243 }
0x2e2a   :  { %3134 = vrot.lane.b32.xlu0 %v4244_v56, %s4322_s18 }
0x2e2e   :  { %2959 = vrot.lane.b32.xlu0 %v2957_v0, %s4327_s24 }
0x2e32   :  { %2599 = vrot.lane.b32.xlu0 %v5022_v16, %s4327_s24 }
0x2e36   :  { %2239 = vrot.lane.b32.xlu0 %v4936_v23, %s4327_s24 }
0x2e3a   :  { %1879 = vrot.lane.b32.xlu0 %v4850_v34, %s4327_s24 }
0x2e3e   :  { %1519 = vrot.lane.b32.xlu0 %v4747_v57, %s4327_s24 }
0x2e42   :  { %1159 = vrot.lane.b32.xlu0 %v4661_v24, %s4327_s24 }
0x2e46   :  { %799 = vrot.lane.b32.xlu0 %v4575_v52, %s4327_s24 }
0x2e4a   :  { %439 = vrot.lane.b32.xlu0 %v4489_v18, %s4327_s24 }
0x2e9c   :  { %v3135_v31 = vpop.permute.xlu0 %3134 }
0x2e9d   :  { %v3137_v16 = vmul.f32 %v3135_v31, %v3120_v8 }
0x2e9f   :  { %3139 = vrot.lane.b32.xlu1 %v3137_v16, %s4327_s24 }
0x2ea0   :  { %v2960_v23 = vpop.permute.xlu0 %2959 }
0x2ea1   :  { %2962 = vst.msk [vmem:[#allocation2 + $0x70] sm:$0xff] %vm182_vm3, %v2960_v23 }
0x2ea3   :  { %2779 = vrot.lane.b32.xlu1 %v5065_v13, %s4327_s24 }
0x2ea4   :  { %v2600_v57 = vpop.permute.xlu0 %2599 }
0x2ea5   :  { %2602 = vst.msk [vmem:[#allocation2 + $0x60] sm:$0xff] %vm182_vm3, %v2600_v57 }
0x2ea7   :  { %2419 = vrot.lane.b32.xlu1 %v4979_v7, %s4327_s24 }
0x2ea8   :  { %v2240_v52 = vpop.permute.xlu0 %2239  ;;  %v3157_v40 = vld [vmem:[#allocation2 + $0x70] sm:$0xff] }
0x2ea9   :  { %2242 = vst.msk [vmem:[#allocation2 + $0x50] sm:$0xff] %vm182_vm3, %v2240_v52 }
0x2eab   :  { %2059 = vrot.lane.b32.xlu1 %v4893_v28, %s4327_s24 }
0x2eac   :  { %v1880_v18 = vpop.permute.xlu0 %1879  ;;  %v3155_v44 = vld [vmem:[#allocation2 + $0x60] sm:$0xff] }
0x2ead   :  { %1882 = vst.msk [vmem:[#allocation2 + $0x40] sm:$0xff] %vm182_vm3, %v1880_v18 }
0x2eaf   :  { %1699 = vrot.lane.b32.xlu1 %v4802_v46, %s4327_s24  ;;  %v3159_v46 = vld [vmem:[%s5215_s5] sm:$0xff]  ;;  %s4328_s5 = smov [#allocation9]  }
0x2eb0   :  { %v1520_v24 = vpop.permute.xlu0 %1519  ;;  %4088 = vmatprep.mubr.msk.f32.mxu0 %vm182_vm3, %v3159_v46  ;;  %v3153_v50 = vld [vmem:[#allocation2 + $0x50] sm:$0xff]  ;;  %s3401_s16 = sshll.u32 %s4328_s5, 4  ;;  %s3402_s16 = int_to_ptr.vmem [resolvable:$true] %s3401_s16 }
0x2eb1   :  { %1522 = vst.msk [vmem:[#allocation2 + $0x30] sm:$0xff] %vm182_vm3, %v1520_v24  ;;  %s4294_s7 = scalar_lea.vmem %s3402_s16, 16  ;;  %s4298_s17 = scalar_lea.vmem %s3402_s16, 32 }
0x2eb2   :  { %p4295_p10 = scmp.ne.s32.totalorder %s3402_s16, %s4294_s7  ;;  %p4299_p11 = scmp.lt.s32.totalorder %s3402_s16, %s3402_s16 }
0x2eb3   :  { %1339 = vrot.lane.b32.xlu1 %v4704_v12, %s4327_s24  ;;  %v3162_v12 = vld [vmem:[%s5216_s6 + $0x8] sm:$0xff]  ;;  %p4300_p12 = scmp.lt.s32.totalorder %s4298_s17, %s4294_s7 }
0x2eb4   :  { %v1160_v34 = vpop.permute.xlu0 %1159  ;;  %v3151_v53 = vld [vmem:[#allocation2 + $0x40] sm:$0xff] }
0x2eb5   :  { %1162 = vst.msk [vmem:[#allocation2 + $0x20] sm:$0xff] %vm182_vm3, %v1160_v34  ;;  %p4301_p13 = por %p4300_p12, %p4299_p11 }
0x2eb7   :  { %979 = vrot.lane.b32.xlu1 %v4618_v38, %s4327_s24  ;;  %v3161_v38 = vld [vmem:[%s5216_s6] sm:$0xff]  ;;  %p4302_p0 = pnand %p4301_p13, %p4295_p10 }
0x2eb8   :  { %v800_v7 = vpop.permute.xlu0 %799  ;;  %3165 = vperm.xlu0 %4108, %v3161_v38   ;;  %v3149_v55 = vld [vmem:[#allocation2 + $0x30] sm:$0xff] }
0x2eb9   :  { %802 = vst.msk [vmem:[#allocation2 + $0x10] sm:$0xff] %vm182_vm3, %v800_v7 }
0x2ebb   :  { %619 = vrot.lane.b32.xlu1 %v4532_v2, %s4327_s24  ;;  %v3309_v2 = vld [vmem:[#allocation3] sm:$0x1] }
0x2ebc   :  { %v440_v28 = vpop.permute.xlu0 %439  ;;  %v3147_v59 = vld [vmem:[#allocation2 + $0x20] sm:$0xff] }
0x2ebd   :  { %442 = vst.msk [vmem:[#allocation2] sm:$0xff] %vm182_vm3, %v440_v28 }
0x2ebf   :  { %3170 = vperm.xlu1 %4107, %v3162_v12  }
0x2ec0   :  { %v3145_v61 = vld [vmem:[#allocation2 + $0x10] sm:$0xff] }
0x2ec3   :  { %3312 = vperm.xlu1 %4107, %v3309_v2  }
0x2ec4   :  { %v3143_v0 = vld [vmem:[#allocation2] sm:$0xff] }
0x2f11   :  { %v3140_v13 = vpop.permute.xlu1 %3139 }
0x2f12   :  { %3142 = vst.msk [vmem:[#allocation2 + $0x78] sm:$0xff] %vm182_vm3, %v3140_v13 }
0x2f15   :  { %v2780_v32 = vpop.permute.xlu1 %2779 }
0x2f16   :  { %2782 = vst.msk [vmem:[#allocation2 + $0x68] sm:$0xff] %vm182_vm3, %v2780_v32 }
0x2f19   :  { %v2420_v9 = vpop.permute.xlu1 %2419  ;;  %v3158_v33 = vld [vmem:[#allocation2 + $0x78] sm:$0xff] }
0x2f1a   :  { %2422 = vst.msk [vmem:[#allocation2 + $0x58] sm:$0xff] %vm182_vm3, %v2420_v9  ;;  %4056 = vmatprep.subr.msk.mxu0 %vm182_vm3, %v3158_v33 }
0x2f1b   :  { %4057 = vmatpush3.xpose.msk.msra.mxu0 %vm182_vm3, %v3158_v33 }
0x2f1c   :  { %4058 = vmatprep.subr.msk.mxu0 %vm182_vm3, %v3157_v40 }
0x2f1d   :  { %v2060_v41 = vpop.permute.xlu1 %2059  ;;  %v3156_v42 = vld [vmem:[#allocation2 + $0x68] sm:$0xff] }
0x2f1e   :  { %2062 = vst.msk [vmem:[#allocation2 + $0x48] sm:$0xff] %vm182_vm3, %v2060_v41 }
0x2f1f   :  { %4059 = vmatpush3.xpose.msk.msra.mxu0 %vm182_vm3, %v3157_v40 }
0x2f20   :  { %4060 = vmatprep.subr.msk.mxu0 %vm182_vm3, %v3156_v42 }
0x2f21   :  { %v1700_v43 = vpop.permute.xlu1 %1699  ;;  %v3154_v47 = vld [vmem:[#allocation2 + $0x58] sm:$0xff] }
0x2f22   :  { %1702 = vst.msk [vmem:[#allocation2 + $0x38] sm:$0xff] %vm182_vm3, %v1700_v43 }
0x2f23   :  { %4061 = vmatpush3.xpose.msk.msra.mxu0 %vm182_vm3, %v3156_v42 }
0x2f24   :  { %4062 = vmatprep.subr.msk.mxu0 %vm182_vm3, %v3155_v44 }
0x2f25   :  { %v1340_v45 = vpop.permute.xlu1 %1339  ;;  %v3152_v51 = vld [vmem:[#allocation2 + $0x48] sm:$0xff] }
0x2f26   :  { %1342 = vst.msk [vmem:[#allocation2 + $0x28] sm:$0xff] %vm182_vm3, %v1340_v45 }
0x2f27   :  { %4063 = vmatpush3.xpose.msk.msra.mxu0 %vm182_vm3, %v3155_v44 }
0x2f28   :  { %4064 = vmatprep.subr.msk.mxu0 %vm182_vm3, %v3154_v47 }
0x2f29   :  { %v980_v49 = vpop.permute.xlu1 %979  ;;  %v3150_v54 = vld [vmem:[#allocation2 + $0x38] sm:$0xff] }
0x2f2a   :  { %982 = vst.msk [vmem:[#allocation2 + $0x18] sm:$0xff] %vm182_vm3, %v980_v49 }
0x2f2b   :  { %4065 = vmatpush3.xpose.msk.msra.mxu0 %vm182_vm3, %v3154_v47 }
0x2f2c   :  { %4066 = vmatprep.subr.msk.mxu0 %vm182_vm3, %v3153_v50 }
0x2f2d   :  { %v620_v21 = vpop.permute.xlu1 %619  ;;  %v3148_v58 = vld [vmem:[#allocation2 + $0x28] sm:$0xff] }
0x2f2e   :  { %622 = vst.msk [vmem:[#allocation2 + $0x8] sm:$0xff] %vm182_vm3, %v620_v21 }
0x2f2f   :  { %4067 = vmatpush3.xpose.msk.msra.mxu0 %vm182_vm3, %v3153_v50 }
0x2f30   :  { %4068 = vmatprep.subr.msk.mxu0 %vm182_vm3, %v3152_v51 }
0x2f31   :  { %v3146_v60 = vld [vmem:[#allocation2 + $0x18] sm:$0xff] }
0x2f33   :  { %4069 = vmatpush3.xpose.msk.msra.mxu0 %vm182_vm3, %v3152_v51  ;;  %v3166_v19 = vpop.permute.xlu0 %3165 }
0x2f34   :  { %4070 = vmatprep.subr.msk.mxu0 %vm182_vm3, %v3151_v53 }
0x2f35   :  { %v3144_v62 = vld [vmem:[#allocation2 + $0x8] sm:$0xff] }
0x2f37   :  { %4071 = vmatpush3.xpose.msk.msra.mxu0 %vm182_vm3, %v3151_v53 }
0x2f38   :  { %4072 = vmatprep.subr.msk.mxu0 %vm182_vm3, %v3150_v54 }
0x2f3a   :  { %v3171_v10 = vpop.permute.xlu1 %3170 }
0x2f3b   :  { %4073 = vmatpush3.xpose.msk.msra.mxu0 %vm182_vm3, %v3150_v54 }
0x2f3c   :  { %4074 = vmatprep.subr.msk.mxu0 %vm182_vm3, %v3149_v55 }
0x2f3e   :  { %v3313_v4 = vpop.permute.xlu1 %3312 }
0x2f3f   :  { %4075 = vmatpush3.xpose.msk.msra.mxu0 %vm182_vm3, %v3149_v55  ;;  %v3318_v26 = vrot.slane %v3313_v4, %v3317_v3 }
0x2f40   :  { %4076 = vmatprep.subr.msk.mxu0 %vm182_vm3, %v3148_v58 }
0x2f43   :  { %4077 = vmatpush3.xpose.msk.msra.mxu0 %vm182_vm3, %v3148_v58 }
0x2f44   :  { %4078 = vmatprep.subr.msk.mxu0 %vm182_vm3, %v3147_v59 }
0x2f47   :  { %4079 = vmatpush3.xpose.msk.msra.mxu0 %vm182_vm3, %v3147_v59 }
0x2f48   :  { %4080 = vmatprep.subr.msk.mxu0 %vm182_vm3, %v3146_v60 }
0x2f4b   :  { %4081 = vmatpush3.xpose.msk.msra.mxu0 %vm182_vm3, %v3146_v60 }
0x2f4c   :  { %4082 = vmatprep.subr.msk.mxu0 %vm182_vm3, %v3145_v61 }
0x2f4f   :  { %4083 = vmatpush3.xpose.msk.msra.mxu0 %vm182_vm3, %v3145_v61 }
0x2f50   :  { %4084 = vmatprep.subr.msk.mxu0 %vm182_vm3, %v3144_v62 }
0x2f53   :  { %4085 = vmatpush3.xpose.msk.msra.mxu0 %vm182_vm3, %v3144_v62 }
0x2f54   :  { %4086 = vmatprep.subr.msk.mxu0 %vm182_vm3, %v3143_v0 }
0x2f57   :  { %4087 = vmatpush3.xpose.msk.msra.mxu0 %vm182_vm3, %v3143_v0 }
0x2f5a   :  { %4089 = vmatmul.mubr.msk.f32.vlgmr.msra.gmra.mxu0 %vm182_vm3, %v3160_v11 }
0x301a   :  { %v4090_v14 = vpop.f32.mrf.mxu0 }
0x301b   :  { %v3299_v15 = vadd.f32 %v4090_v14, %v3171_v10 }
0x301c   :  { %v3293_v35 = vpop.f32.mrf.mxu0 }
0x301d   :  { %vm3303_vm4 = vcmp.gt.f32.partialorder %v3299_v15, 0.0  ;;  %v3305_v36 = vmul.f32 0.2, %v3299_v15  ;;  %v3294_v22 = vadd.f32 %v3293_v35, %v3166_v19 }
0x301f   :  { %vm3302_vm5 = vcmp.gt.f32.partialorder %v3294_v22, 0.0  ;;  %v3304_v17 = vmul.f32 0.2, %v3294_v22  ;;  %v3307_v6 = vsel %vm3303_vm4, %v3299_v15, %v3305_v36 }
0x3020   :  { %4092 = vmatpush3.msra.mxu1 %v3307_v6 }
0x3021   :  { %4093 = vmatprep.subr.mxu1 %v4324_v1  ;;  %v3306_v20 = vsel %vm3302_vm5, %v3294_v22, %v3304_v17 }
0x3022   :  { %4094 = vmatpush3.msra.mxu1 %v3306_v20 }
0x3023   :  { %4096 = vmatmul.mubr.msk.f32.vlgmr.msra.gmra.mxu1 %vm3319_vm6, %v3308_v25 }
0x30e3   :  { %v3389_v48 = vpop.f32.mrf.mxu1 }
0x30e4   :  { %v3390_v8 = vadd.f32 %v3389_v48, %v3318_v26 }
0x30e5   :  { %v4097_v27 = vpop.f32.mrf.mxu1 }
0x30e6   :  { %4245 = vtanh.f32 %v3390_v8 }
0x30f3   :  { %v4246_v29 = vpop.eup %4245 }
0x30f4   :  { %3394 = vst [vmem:[#allocation9] sm:$0x1] %v4246_v29 }
0x30f5   :  { %4305 = shalt.err (!%p4302_p0)
}
0x30f6   :  { %3404 = dma.vmem_to_hbm [thread:$0]  %s3402_s16, 16, %s5219_s9, [#allocation6]  }
0x30f7   :  { %4318 = dma.done.wait [#allocation6], 16  }
0x30f8   :  { %4319 = vsyncadd [#allocation6], 4294967280 }
0x30f9   :  { %3408 = vsyncpa [#allocation5], 1 }
0x30fa   :  { %3409 = vsyncpa [#allocation8], 1 }
0x30fb   :  { %3410 = vsyncpa [#allocation6], 1 }

</bundles_post_ra>
